<compile_context>
chip_gen: v7x
topology: tpu7x:2x2x1
jax: 0.10.0
libtpu: 0.0.40
codegen_flags: <defaults>
</compile_context>

<pallas_src>
import functools

import numpy as np
import jax
import jax.numpy as jnp
from jax.experimental import pallas as pl
from jax.experimental.pallas import tpu as pltpu


# ----------------------------------------------------------------------------
# Shift/mask matrices for 3x3 "same" convolution on flattened (H*W) lanes.
# (x @ S_k) gives x shifted by offset k with zero padding at the borders.
# ----------------------------------------------------------------------------
@functools.lru_cache(maxsize=None)
def _shift_mats_np(H, W):
    HW = H * W
    S = np.zeros((9, HW, HW), np.float32)
    k = 0
    for dy in (-1, 0, 1):
        for dx in (-1, 0, 1):
            for y in range(H):
                for x in range(W):
                    yy, xx = y + dy, x + dx
                    if 0 <= yy < H and 0 <= xx < W:
                        S[k, yy * W + xx, y * W + x] = 1.0
            k += 1
    return S


@functools.lru_cache(maxsize=None)
def _block_diag_shift_mats_np(H, W, V):
    # Block-diagonal version: V independent views share one lane axis.
    S = _shift_mats_np(H, W)
    HW = H * W
    out = np.zeros((9, V * HW, V * HW), np.float32)
    for v in range(V):
        out[:, v * HW:(v + 1) * HW, v * HW:(v + 1) * HW] = S
    return out


def shift_mats(H, W):
    return jnp.asarray(_shift_mats_np(H, W))


def block_diag_shift_mats(H, W, V):
    return jnp.asarray(_block_diag_shift_mats_np(H, W, V))


def _conv3x3_flat(x, w_ref, s_ref):
    """3x3 'same' conv, channel-first, spatial flattened on lanes.

    x: (Cin, HW) f32; w_ref: VMEM ref (9, Cout, Cin); s_ref: VMEM ref (9, HW, HW).
    Returns (Cout, HW) f32. Nine accumulated MXU matmuls; no in-kernel reshapes.
    """
    acc = None
    for k in range(9):
        t = jnp.dot(w_ref[k], x, preferred_element_type=jnp.float32)   # (Cout, HW)
        t = jnp.dot(t, s_ref[k], preferred_element_type=jnp.float32)   # (Cout, HW)
        acc = t if acc is None else acc + t
    return acc


# ----------------------------------------------------------------------------
# The single fused Pallas kernel
# ----------------------------------------------------------------------------
def _deepvoxels_kernel(x_ref, few1_ref, few2_ref, sfeat_ref, mlift_ref,
                       dvold_ref, coord_ref, wgt_ref, wgo_ref,
                       iw1dv_ref, iw1c_ref, iw2_ref,
                       pall_ref, wocc_ref, rnw1_ref, rnw2_ref, srend_ref,
                       dvnew_ref, img_ref, depth_ref):
    # --- FeatureExtractor stand-in: conv3x3 + ReLU -> conv3x3 (HW on lanes) ---
    h = jnp.maximum(_conv3x3_flat(x_ref[...], few1_ref, sfeat_ref), 0.0)
    feats = _conv3x3_flat(h, few2_ref, sfeat_ref)                    # (ngf, HW)

    # --- interpolate_lifting: bilinear sample + volume scatter as ONE matmul ---
    temp = jnp.dot(feats, mlift_ref[...],
                   preferred_element_type=jnp.float32)               # (ngf, G^3)

    # --- IntegrationNetOctree stand-in: sigmoid-gated blend (1x1x1 conv gate) ---
    old = dvold_ref[...]                                             # (ngf, G^3)
    g = (jnp.dot(wgt_ref[...], temp, preferred_element_type=jnp.float32)
         + jnp.dot(wgo_ref[...], old, preferred_element_type=jnp.float32))
    gate = 1.0 / (1.0 + jnp.exp(-g))
    dv_new = gate * temp + (1.0 - gate) * old
    dvnew_ref[...] = dv_new

    # --- Unet3d inpainting stand-in: per-voxel 2-layer MLP with coord-conv input ---
    hh = jnp.maximum(
        jnp.dot(iw1dv_ref[...], dv_new, preferred_element_type=jnp.float32)
        + jnp.dot(iw1c_ref[...], coord_ref[...], preferred_element_type=jnp.float32),
        0.0)
    dv_inp = jnp.dot(iw2_ref[...], hh,
                     preferred_element_type=jnp.float32)             # (ngf, G^3)

    # --- interpolate_trilinear (per-depth matmul) + OcclusionNet stand-in ---
    # Both views live side-by-side on the lane axis (V*HW lanes).
    D = pall_ref.shape[0]
    wocc = wocc_ref[...]                                             # (ngf, 1)
    fs, scores = [], []
    for d in range(D):
        f_d = jnp.dot(dv_inp, pall_ref[d],
                      preferred_element_type=jnp.float32)            # (ngf, V*HW)
        fs.append(f_d)
        scores.append(jnp.sum(f_d * wocc, axis=0, keepdims=True))    # (1, V*HW)
    m = scores[0]
    for d in range(1, D):
        m = jnp.maximum(m, scores[d])
    es = [jnp.exp(s - m) for s in scores]
    z = es[0]
    for d in range(1, D):
        z = z + es[d]
    inv_z = pl.reciprocal(z, approx=True)

    # TODO(synk): OcclusionNet definition not provided; depth values of the stand-in
    # are the normalized frustum slice indices d/D.
    depth_acc = jnp.zeros_like(z)
    col_acc = jnp.zeros_like(fs[0])
    for d in range(D):
        w_d = es[d] * inv_z                                          # softmax over D
        depth_acc = depth_acc + w_d * (float(d) / float(D))
        col_acc = col_acc + w_d * fs[d]
    depth_ref[...] = depth_acc                                       # (1, V*HW)
    # torch.mean(visibility_weights * can_view_vol, dim=2)
    collapsed = col_acc * (1.0 / float(D))                           # (ngf, V*HW)

    # --- RenderingNet stand-in: conv3x3+ReLU -> conv3x3 -> 0.5*tanh, both views ---
    rh = jnp.maximum(_conv3x3_flat(collapsed, rnw1_ref, srend_ref), 0.0)
    img_ref[...] = 0.5 * jnp.tanh(_conv3x3_flat(rh, rnw2_ref, srend_ref))  # (3, V*HW)


# ----------------------------------------------------------------------------
# Interpolation operators folded into dense matrices (built once in XLA).
# ----------------------------------------------------------------------------
def lifting_matrix(lift_img_coords, lift_volume_idcs, H, W, n_vox):
    # TODO(synk): interpolate_lifting helper not provided; bilinear-sample +
    # index-scatter folded into one (HW, G^3) matrix so the kernel does a matmul.
    y = jnp.clip(lift_img_coords[:, 0], 0.0, H - 1.0)
    x = jnp.clip(lift_img_coords[:, 1], 0.0, W - 1.0)
    y0 = jnp.floor(y).astype(jnp.int32)
    x0 = jnp.floor(x).astype(jnp.int32)
    y1 = jnp.minimum(y0 + 1, H - 1)
    x1 = jnp.minimum(x0 + 1, W - 1)
    wy = y - y0.astype(jnp.float32)
    wx = x - x0.astype(jnp.float32)
    idcs = lift_volume_idcs
    M = jnp.zeros((H * W, n_vox), jnp.float32)
    M = M.at[y0 * W + x0, idcs].add((1.0 - wy) * (1.0 - wx))
    M = M.at[y0 * W + x1, idcs].add((1.0 - wy) * wx)
    M = M.at[y1 * W + x0, idcs].add(wy * (1.0 - wx))
    M = M.at[y1 * W + x1, idcs].add(wy * wx)
    return M


def projection_matrix(proj_grid_coords, proj_frustrum_idcs, G, D, HW):
    # TODO(synk): interpolate_trilinear helper not provided; trilinear-sample +
    # frustum scatter folded into one (G^3, D*HW) matrix per view.
    c = jnp.clip(proj_grid_coords, 0.0, G - 1.0)
    c0 = jnp.floor(c).astype(jnp.int32)
    c1 = jnp.minimum(c0 + 1, G - 1)
    t = c - c0.astype(jnp.float32)
    P = jnp.zeros((G * G * G, D * HW), jnp.float32)
    for dz in (0, 1):
        for dy in (0, 1):
            for dx in (0, 1):
                zi = c1[:, 0] if dz else c0[:, 0]
                yi = c1[:, 1] if dy else c0[:, 1]
                xi = c1[:, 2] if dx else c0[:, 2]
                wz = t[:, 0] if dz else 1.0 - t[:, 0]
                wy = t[:, 1] if dy else 1.0 - t[:, 1]
                wx = t[:, 2] if dx else 1.0 - t[:, 2]
                vox = (zi * G + yi) * G + xi
                P = P.at[vox, proj_frustrum_idcs].add(wz * wy * wx)
    return P


# ----------------------------------------------------------------------------
# Octree <-> voxel (faithful to the sequential semantics of the PyTorch code)
# ----------------------------------------------------------------------------
def octree2voxel(octree, depth, n_feats, voxel_size, voxel_shape):
    # Faithful to the reference: parent index is `j + depth_length`, sequential
    # per-j updates.
    for i in range(depth - 1):
        depth_length = 8 ** (i + 1)
        start_idx = int(8 * (8 ** i - 1) / 7)
        end_idx = start_idx + depth_length

        def body(j, oct, depth_length=depth_length, end_idx=end_idx):
            idx = j + depth_length
            parent = jax.lax.dynamic_slice(oct, (0, 0, idx), (1, n_feats, 1))
            mask = parent < 1e-5
            oct = jax.lax.dynamic_update_slice(
                oct, jnp.where(mask, 0.0, parent), (0, 0, idx))
            child = jax.lax.dynamic_slice(oct, (0, 0, end_idx + j * 8),
                                          (1, n_feats, 8))
            oct = jax.lax.dynamic_update_slice(
                oct, jnp.where(mask, 0.0, child), (0, 0, end_idx + j * 8))
            return oct

        octree = jax.lax.fori_loop(0, depth_length, body, octree)
    return octree[:, :, -voxel_size:].reshape(voxel_shape)


def voxel2octree(dv_new, depth, n_feats, octree_length, voxel_size):
    octree_new = jnp.concatenate(
        [jnp.zeros((1, n_feats, octree_length - voxel_size), jnp.float32),
         dv_new.reshape(1, n_feats, voxel_size)], axis=2)
    # Vectorized per level; equivalent to the reference's sequential writes because
    # within a level no child read touches a parent index written earlier in it.
    for i in range(depth - 1):
        depth_idx = depth - 2 - i
        start_idx = int(8 * (8 ** depth_idx - 1) / 7)
        depth_length = 8 ** (depth_idx + 1)
        end_idx = start_idx + depth_length
        children = jax.lax.slice_in_dim(octree_new, end_idx,
                                        end_idx + 8 * depth_length, axis=2)
        parents = children.reshape(1, n_feats, depth_length, 8).mean(axis=-1)
        octree_new = jax.lax.dynamic_update_slice(octree_new, parents,
                                                  (0, 0, depth_length))
    return octree_new


# ----------------------------------------------------------------------------
# DeepVoxels forward
# ----------------------------------------------------------------------------
def deep_voxels_forward(params, octree, input_img,
                        proj_frustrum_idcs_list, proj_grid_coords_list,
                        lift_volume_idcs, lift_img_coords, cfg):
    grid_dims = cfg['grid_dims']
    G = grid_dims[0]
    ngf = cfg['num_grid_feats']
    depth = cfg['depth']
    voxel_size = cfg['voxel_size']
    voxel_shape = (1, ngf, G, G, G)
    Hf, Wf = cfg['frustrum_img_dims']
    HW = Hf * Wf
    frustrum_depth = 2 * grid_dims[-1]
    V = len(proj_frustrum_idcs_list)

    # TODO(synk): FeatureExtractor (U-Net) definition not provided; stand-in is an
    # avg-pool downsample (here) + two fused 3x3 same-convs (in the kernel).
    S = input_img.shape[-1]
    f = S // Hf
    x = input_img[0].reshape(3, Hf, f, Wf, f).mean(axis=(2, 4))
    x = x.reshape(3, HW).astype(jnp.float32)

    # --- octree -> voxel grid (pure-JAX glue, faithful to the reference loop) ---
    dv_old = octree2voxel(octree, depth, ngf, voxel_size,
                          voxel_shape).reshape(ngf, G ** 3)

    # --- fold data-dependent interpolation into dense matrices ---
    m_lift = lifting_matrix(lift_img_coords, lift_volume_idcs, Hf, Wf, G ** 3)
    p_views = []
    for idcs, coords in zip(proj_frustrum_idcs_list, proj_grid_coords_list):
        P = projection_matrix(coords, idcs, G, frustrum_depth, HW)   # (G^3, D*HW)
        p_views.append(jnp.transpose(P.reshape(G ** 3, frustrum_depth, HW),
                                     (1, 0, 2)))                     # (D, G^3, HW)
    p_all = jnp.concatenate(p_views, axis=-1)                        # (D, G^3, V*HW)

    coord = cfg['coord_conv_volume'].reshape(3, G ** 3)

    # --- the single fused Pallas call ---
    dv_new, img, depth_flat = pl.pallas_call(
        _deepvoxels_kernel,
        in_specs=[pl.BlockSpec(memory_space=pltpu.MemorySpace.VMEM)] * 17,
        out_specs=(pl.BlockSpec(memory_space=pltpu.MemorySpace.VMEM),
                   pl.BlockSpec(memory_space=pltpu.MemorySpace.VMEM),
                   pl.BlockSpec(memory_space=pltpu.MemorySpace.VMEM)),
        out_shape=(jax.ShapeDtypeStruct((ngf, G ** 3), jnp.float32),
                   jax.ShapeDtypeStruct((3, V * HW), jnp.float32),
                   jax.ShapeDtypeStruct((1, V * HW), jnp.float32)),
    )(x, params['fe_w1'], params['fe_w2'], shift_mats(Hf, Wf), m_lift,
      dv_old, coord, params['wg_t'], params['wg_o'],
      params['inp_w1_dv'], params['inp_w1_c'], params['inp_w2'],
      p_all, params['w_occ'], params['rn_w1'], params['rn_w2'],
      block_diag_shift_mats(Hf, Wf, V))

    new_octree = voxel2octree(dv_new, depth, ngf, cfg['octree_length'], voxel_size)

    # TODO(synk): RenderingNet definition not provided; stand-in renders at frustum
    # resolution inside the kernel (0.5*tanh folded in) and nearest-upsamples here.
    up = cfg['img_sidelength'] // Hf
    imgs_v = img.reshape(3, V, Hf, Wf)
    deps_v = depth_flat.reshape(1, V, Hf, Wf)
    novel_views, depth_maps = [], []
    for v in range(V):
        iv = imgs_v[:, v]
        iv = jnp.repeat(jnp.repeat(iv, up, axis=1), up, axis=2)
        novel_views.append(iv[None])                                 # (1, 3, S, S)
        depth_maps.append(deps_v[:, v][None])                        # (1, 1, Hf, Wf)
    return novel_views, depth_maps, new_octree


# ----------------------------------------------------------------------------
# Deterministic parameter init (stand-in parameterization; conv weights stored
# as (9, Cout, Cin) matching the shift-matrix ordering; gate / MLP weights split
# per-input so the kernel never concatenates along sublanes).
# ----------------------------------------------------------------------------
def init_params(key, nf0, ngf):
    keys = jax.random.split(key, 11)

    def w(k, shape, scale=0.1):
        return scale * jax.random.normal(k, shape, jnp.float32)

    return dict(
        fe_w1=w(keys[0], (9, nf0, 3)),        # feature extractor conv1: 3 -> nf0
        fe_w2=w(keys[1], (9, ngf, nf0)),      # feature extractor conv2: nf0 -> ngf
        wg_t=w(keys[2], (ngf, ngf)),          # integration gate (temp branch)
        wg_o=w(keys[3], (ngf, ngf)),          # integration gate (old branch)
        inp_w1_dv=w(keys[4], (ngf, ngf)),     # inpainting MLP layer 1 (features)
        inp_w1_c=w(keys[5], (ngf, 3)),        # inpainting MLP layer 1 (coord-conv)
        inp_w2=w(keys[6], (ngf, ngf)),        # inpainting MLP layer 2
        w_occ=w(keys[7], (ngf, 1)),           # occlusion per-channel score
        rn_w1=w(keys[8], (9, nf0, ngf)),      # rendering conv1: ngf -> nf0
        rn_w2=w(keys[9], (9, 3, nf0)),        # rendering conv2: nf0 -> 3
    )


if __name__ == "__main__":
    img_sidelength = 16
    lifting_img_dims = [8, 8]
    frustrum_img_dims = [8, 8]
    grid_dims = [4, 4, 4]
    num_grid_feats = 8
    nf0 = 8

    depth = int(np.round(np.log(grid_dims[0]) / np.log(2)))      # 2
    voxel_size = grid_dims[0] ** 3                                # 64
    octree_length = int(8 * (8 ** depth - 1) / 7)                 # 72
    frustrum_depth = 2 * grid_dims[-1]                            # 8

    cc = np.mgrid[-grid_dims[0] // 2: grid_dims[0] // 2,
                  -grid_dims[1] // 2: grid_dims[1] // 2,
                  -grid_dims[2] // 2: grid_dims[2] // 2]
    coord_conv_volume = (np.stack(cc, axis=0).astype(np.float32) / grid_dims[0])[None]

    cfg = dict(grid_dims=grid_dims, num_grid_feats=num_grid_feats, nf0=nf0,
               depth=depth, voxel_size=voxel_size, octree_length=octree_length,
               frustrum_img_dims=frustrum_img_dims, img_sidelength=img_sidelength,
               coord_conv_volume=jnp.asarray(coord_conv_volume))

    key = jax.random.PRNGKey(0)
    params = init_params(key, nf0, num_grid_feats)

    k1, k2, k3, k4 = jax.random.split(jax.random.PRNGKey(0), 4)
    input_img = jax.random.normal(k1, (1, 3, img_sidelength, img_sidelength),
                                  jnp.float32)
    octree = jnp.zeros((1, num_grid_feats, octree_length), jnp.float32)

    lift_volume_idcs = jnp.arange(voxel_size, dtype=jnp.int32)
    lift_img_coords = jax.random.uniform(
        k2, (voxel_size, 2), minval=0.0, maxval=float(frustrum_img_dims[0] - 1))

    n_frus = frustrum_depth * frustrum_img_dims[0] * frustrum_img_dims[1]
    proj_frustrum_idcs_list = [jnp.arange(n_frus, dtype=jnp.int32) for _ in range(2)]
    proj_grid_coords_list = [
        jax.random.uniform(k, (n_frus, 3), minval=0.0,
                           maxval=float(grid_dims[0] - 1))
        for k in (k3, k4)
    ]

    fwd = jax.jit(functools.partial(deep_voxels_forward, cfg=cfg))
    novel_views, depth_maps, new_octree = fwd(
        params, octree, input_img, proj_frustrum_idcs_list,
        proj_grid_coords_list, lift_volume_idcs, lift_img_coords)

    for v in novel_views:
        jax.block_until_ready(v)
    for d in depth_maps:
        jax.block_until_ready(d)
    jax.block_until_ready(new_octree)

    assert novel_views[0].shape == (1, 3, img_sidelength, img_sidelength)
    assert depth_maps[0].shape == (1, 1, frustrum_img_dims[0], frustrum_img_dims[1])
    assert new_octree.shape == (1, num_grid_feats, octree_length)
    assert all(bool(jnp.isfinite(v).all()) for v in novel_views)
    print("KERNEL_OK")
</pallas_src>

<mosaic_0001>
module attributes {stable_mosaic.version = 11 : i64} {
  func.func private @main(%arg0: i32) attributes {dimension_semantics = [#tpu.dimension_semantics<core_parallel>], iteration_bounds = array<i64: 2>, tpu.core_type = #tpu.core_type<sc_scalar_subcore>, window_params = []} {
    return
  }
}

module attributes {stable_mosaic.version = 11 : i64} {
  func.func private @main(%arg0: i32) attributes {dimension_semantics = [#tpu.dimension_semantics<core_parallel>], iteration_bounds = array<i64: 2>, tpu.core_type = #tpu.core_type<sc_scalar_subcore>, window_params = []} {
    return
  }
}

module attributes {stable_mosaic.version = 11 : i64} {
  func.func @_deepvoxels_kernel(%arg0: memref<3x64xf32, #tpu.memory_space<vmem>>, %arg1: memref<9x8x3xf32, #tpu.memory_space<vmem>>, %arg2: memref<9x8x8xf32, #tpu.memory_space<vmem>>, %arg3: memref<9x64x64xf32, #tpu.memory_space<vmem>>, %arg4: memref<64x64xf32, #tpu.memory_space<vmem>>, %arg5: memref<8x64xf32, #tpu.memory_space<vmem>>, %arg6: memref<3x64xf32, #tpu.memory_space<vmem>>, %arg7: memref<8x8xf32, #tpu.memory_space<vmem>>, %arg8: memref<8x8xf32, #tpu.memory_space<vmem>>, %arg9: memref<8x8xf32, #tpu.memory_space<vmem>>, %arg10: memref<8x3xf32, #tpu.memory_space<vmem>>, %arg11: memref<8x8xf32, #tpu.memory_space<vmem>>, %arg12: memref<8x64x128xf32, #tpu.memory_space<vmem>>, %arg13: memref<8x1xf32, #tpu.memory_space<vmem>>, %arg14: memref<9x8x8xf32, #tpu.memory_space<vmem>>, %arg15: memref<9x3x8xf32, #tpu.memory_space<vmem>>, %arg16: memref<9x128x128xf32, #tpu.memory_space<vmem>>, %arg17: memref<8x64xf32, #tpu.memory_space<vmem>>, %arg18: memref<3x128xf32, #tpu.memory_space<vmem>>, %arg19: memref<1x128xf32, #tpu.memory_space<vmem>>) attributes {dimension_semantics = [], scalar_prefetch = 0 : i64, scratch_operands = 0 : i64, tpu.core_type = #tpu.core_type<tc>} {
    %c0 = arith.constant 0 : index
    %c0_0 = arith.constant 0 : index
    %0 = vector.load %arg0[%c0, %c0_0] : memref<3x64xf32, #tpu.memory_space<vmem>>, vector<3x64xf32>
    %c0_1 = arith.constant 0 : index
    %c0_2 = arith.constant 0 : index
    %c0_3 = arith.constant 0 : index
    %1 = vector.load %arg1[%c0_1, %c0_2, %c0_3] : memref<9x8x3xf32, #tpu.memory_space<vmem>>, vector<1x8x3xf32>
    %2 = vector.shape_cast %1 : vector<1x8x3xf32> to vector<8x3xf32>
    %cst = arith.constant dense<0.000000e+00> : vector<8x64xf32>
    %3 = tpu.matmul %2, %0, %cst {dimension_numbers = #tpu.dot_dimension_numbers<[1], [0], [0], [1], [0, 0, 1, 1], [], []>} : vector<8x3xf32>, vector<3x64xf32>, vector<8x64xf32> -> vector<8x64xf32>
    %c0_4 = arith.constant 0 : index
    %c0_5 = arith.constant 0 : index
    %c0_6 = arith.constant 0 : index
    %4 = vector.load %arg3[%c0_4, %c0_5, %c0_6] : memref<9x64x64xf32, #tpu.memory_space<vmem>>, vector<1x64x64xf32>
    %5 = vector.shape_cast %4 : vector<1x64x64xf32> to vector<64x64xf32>
    %cst_7 = arith.constant dense<0.000000e+00> : vector<8x64xf32>
    %6 = tpu.matmul %3, %5, %cst_7 {dimension_numbers = #tpu.dot_dimension_numbers<[1], [0], [0], [1], [0, 0, 1, 1], [], []>} : vector<8x64xf32>, vector<64x64xf32>, vector<8x64xf32> -> vector<8x64xf32>
    %c1 = arith.constant 1 : index
    %c0_8 = arith.constant 0 : index
    %c0_9 = arith.constant 0 : index
    %7 = vector.load %arg1[%c1, %c0_8, %c0_9] : memref<9x8x3xf32, #tpu.memory_space<vmem>>, vector<1x8x3xf32>
    %8 = vector.shape_cast %7 : vector<1x8x3xf32> to vector<8x3xf32>
    %cst_10 = arith.constant dense<0.000000e+00> : vector<8x64xf32>
    %9 = tpu.matmul %8, %0, %cst_10 {dimension_numbers = #tpu.dot_dimension_numbers<[1], [0], [0], [1], [0, 0, 1, 1], [], []>} : vector<8x3xf32>, vector<3x64xf32>, vector<8x64xf32> -> vector<8x64xf32>
    %c1_11 = arith.constant 1 : index
    %c0_12 = arith.constant 0 : index
    %c0_13 = arith.constant 0 : index
    %10 = vector.load %arg3[%c1_11, %c0_12, %c0_13] : memref<9x64x64xf32, #tpu.memory_space<vmem>>, vector<1x64x64xf32>
    %11 = vector.shape_cast %10 : vector<1x64x64xf32> to vector<64x64xf32>
    %cst_14 = arith.constant dense<0.000000e+00> : vector<8x64xf32>
    %12 = tpu.matmul %9, %11, %cst_14 {dimension_numbers = #tpu.dot_dimension_numbers<[1], [0], [0], [1], [0, 0, 1, 1], [], []>} : vector<8x64xf32>, vector<64x64xf32>, vector<8x64xf32> -> vector<8x64xf32>
    %13 = arith.addf %6, %12 : vector<8x64xf32>
    %c2 = arith.constant 2 : index
    %c0_15 = arith.constant 0 : index
    %c0_16 = arith.constant 0 : index
    %14 = vector.load %arg1[%c2, %c0_15, %c0_16] : memref<9x8x3xf32, #tpu.memory_space<vmem>>, vector<1x8x3xf32>
    %15 = vector.shape_cast %14 : vector<1x8x3xf32> to vector<8x3xf32>
    %cst_17 = arith.constant dense<0.000000e+00> : vector<8x64xf32>
    %16 = tpu.matmul %15, %0, %cst_17 {dimension_numbers = #tpu.dot_dimension_numbers<[1], [0], [0], [1], [0, 0, 1, 1], [], []>} : vector<8x3xf32>, vector<3x64xf32>, vector<8x64xf32> -> vector<8x64xf32>
    %c2_18 = arith.constant 2 : index
    %c0_19 = arith.constant 0 : index
    %c0_20 = arith.constant 0 : index
    %17 = vector.load %arg3[%c2_18, %c0_19, %c0_20] : memref<9x64x64xf32, #tpu.memory_space<vmem>>, vector<1x64x64xf32>
    %18 = vector.shape_cast %17 : vector<1x64x64xf32> to vector<64x64xf32>
    %cst_21 = arith.constant dense<0.000000e+00> : vector<8x64xf32>
    %19 = tpu.matmul %16, %18, %cst_21 {dimension_numbers = #tpu.dot_dimension_numbers<[1], [0], [0], [1], [0, 0, 1, 1], [], []>} : vector<8x64xf32>, vector<64x64xf32>, vector<8x64xf32> -> vector<8x64xf32>
    %20 = arith.addf %13, %19 : vector<8x64xf32>
    %c3 = arith.constant 3 : index
    %c0_22 = arith.constant 0 : index
    %c0_23 = arith.constant 0 : index
    %21 = vector.load %arg1[%c3, %c0_22, %c0_23] : memref<9x8x3xf32, #tpu.memory_space<vmem>>, vector<1x8x3xf32>
    %22 = vector.shape_cast %21 : vector<1x8x3xf32> to vector<8x3xf32>
    %cst_24 = arith.constant dense<0.000000e+00> : vector<8x64xf32>
    %23 = tpu.matmul %22, %0, %cst_24 {dimension_numbers = #tpu.dot_dimension_numbers<[1], [0], [0], [1], [0, 0, 1, 1], [], []>} : vector<8x3xf32>, vector<3x64xf32>, vector<8x64xf32> -> vector<8x64xf32>
    %c3_25 = arith.constant 3 : index
    %c0_26 = arith.constant 0 : index
    %c0_27 = arith.constant 0 : index
    %24 = vector.load %arg3[%c3_25, %c0_26, %c0_27] : memref<9x64x64xf32, #tpu.memory_space<vmem>>, vector<1x64x64xf32>
    %25 = vector.shape_cast %24 : vector<1x64x64xf32> to vector<64x64xf32>
    %cst_28 = arith.constant dense<0.000000e+00> : vector<8x64xf32>
    %26 = tpu.matmul %23, %25, %cst_28 {dimension_numbers = #tpu.dot_dimension_numbers<[1], [0], [0], [1], [0, 0, 1, 1], [], []>} : vector<8x64xf32>, vector<64x64xf32>, vector<8x64xf32> -> vector<8x64xf32>
    %27 = arith.addf %20, %26 : vector<8x64xf32>
    %c4 = arith.constant 4 : index
    %c0_29 = arith.constant 0 : index
    %c0_30 = arith.constant 0 : index
    %28 = vector.load %arg1[%c4, %c0_29, %c0_30] : memref<9x8x3xf32, #tpu.memory_space<vmem>>, vector<1x8x3xf32>
    %29 = vector.shape_cast %28 : vector<1x8x3xf32> to vector<8x3xf32>
    %cst_31 = arith.constant dense<0.000000e+00> : vector<8x64xf32>
    %30 = tpu.matmul %29, %0, %cst_31 {dimension_numbers = #tpu.dot_dimension_numbers<[1], [0], [0], [1], [0, 0, 1, 1], [], []>} : vector<8x3xf32>, vector<3x64xf32>, vector<8x64xf32> -> vector<8x64xf32>
    %c4_32 = arith.constant 4 : index
    %c0_33 = arith.constant 0 : index
    %c0_34 = arith.constant 0 : index
    %31 = vector.load %arg3[%c4_32, %c0_33, %c0_34] : memref<9x64x64xf32, #tpu.memory_space<vmem>>, vector<1x64x64xf32>
    %32 = vector.shape_cast %31 : vector<1x64x64xf32> to vector<64x64xf32>
    %cst_35 = arith.constant dense<0.000000e+00> : vector<8x64xf32>
    %33 = tpu.matmul %30, %32, %cst_35 {dimension_numbers = #tpu.dot_dimension_numbers<[1], [0], [0], [1], [0, 0, 1, 1], [], []>} : vector<8x64xf32>, vector<64x64xf32>, vector<8x64xf32> -> vector<8x64xf32>
    %34 = arith.addf %27, %33 : vector<8x64xf32>
    %c5 = arith.constant 5 : index
    %c0_36 = arith.constant 0 : index
    %c0_37 = arith.constant 0 : index
    %35 = vector.load %arg1[%c5, %c0_36, %c0_37] : memref<9x8x3xf32, #tpu.memory_space<vmem>>, vector<1x8x3xf32>
    %36 = vector.shape_cast %35 : vector<1x8x3xf32> to vector<8x3xf32>
    %cst_38 = arith.constant dense<0.000000e+00> : vector<8x64xf32>
    %37 = tpu.matmul %36, %0, %cst_38 {dimension_numbers = #tpu.dot_dimension_numbers<[1], [0], [0], [1], [0, 0, 1, 1], [], []>} : vector<8x3xf32>, vector<3x64xf32>, vector<8x64xf32> -> vector<8x64xf32>
    %c5_39 = arith.constant 5 : index
    %c0_40 = arith.constant 0 : index
    %c0_41 = arith.constant 0 : index
    %38 = vector.load %arg3[%c5_39, %c0_40, %c0_41] : memref<9x64x64xf32, #tpu.memory_space<vmem>>, vector<1x64x64xf32>
    %39 = vector.shape_cast %38 : vector<1x64x64xf32> to vector<64x64xf32>
    %cst_42 = arith.constant dense<0.000000e+00> : vector<8x64xf32>
    %40 = tpu.matmul %37, %39, %cst_42 {dimension_numbers = #tpu.dot_dimension_numbers<[1], [0], [0], [1], [0, 0, 1, 1], [], []>} : vector<8x64xf32>, vector<64x64xf32>, vector<8x64xf32> -> vector<8x64xf32>
    %41 = arith.addf %34, %40 : vector<8x64xf32>
    %c6 = arith.constant 6 : index
    %c0_43 = arith.constant 0 : index
    %c0_44 = arith.constant 0 : index
    %42 = vector.load %arg1[%c6, %c0_43, %c0_44] : memref<9x8x3xf32, #tpu.memory_space<vmem>>, vector<1x8x3xf32>
    %43 = vector.shape_cast %42 : vector<1x8x3xf32> to vector<8x3xf32>
    %cst_45 = arith.constant dense<0.000000e+00> : vector<8x64xf32>
    %44 = tpu.matmul %43, %0, %cst_45 {dimension_numbers = #tpu.dot_dimension_numbers<[1], [0], [0], [1], [0, 0, 1, 1], [], []>} : vector<8x3xf32>, vector<3x64xf32>, vector<8x64xf32> -> vector<8x64xf32>
    %c6_46 = arith.constant 6 : index
    %c0_47 = arith.constant 0 : index
    %c0_48 = arith.constant 0 : index
    %45 = vector.load %arg3[%c6_46, %c0_47, %c0_48] : memref<9x64x64xf32, #tpu.memory_space<vmem>>, vector<1x64x64xf32>
    %46 = vector.shape_cast %45 : vector<1x64x64xf32> to vector<64x64xf32>
    %cst_49 = arith.constant dense<0.000000e+00> : vector<8x64xf32>
    %47 = tpu.matmul %44, %46, %cst_49 {dimension_numbers = #tpu.dot_dimension_numbers<[1], [0], [0], [1], [0, 0, 1, 1], [], []>} : vector<8x64xf32>, vector<64x64xf32>, vector<8x64xf32> -> vector<8x64xf32>
    %48 = arith.addf %41, %47 : vector<8x64xf32>
    %c7 = arith.constant 7 : index
    %c0_50 = arith.constant 0 : index
    %c0_51 = arith.constant 0 : index
    %49 = vector.load %arg1[%c7, %c0_50, %c0_51] : memref<9x8x3xf32, #tpu.memory_space<vmem>>, vector<1x8x3xf32>
    %50 = vector.shape_cast %49 : vector<1x8x3xf32> to vector<8x3xf32>
    %cst_52 = arith.constant dense<0.000000e+00> : vector<8x64xf32>
    %51 = tpu.matmul %50, %0, %cst_52 {dimension_numbers = #tpu.dot_dimension_numbers<[1], [0], [0], [1], [0, 0, 1, 1], [], []>} : vector<8x3xf32>, vector<3x64xf32>, vector<8x64xf32> -> vector<8x64xf32>
    %c7_53 = arith.constant 7 : index
    %c0_54 = arith.constant 0 : index
    %c0_55 = arith.constant 0 : index
    %52 = vector.load %arg3[%c7_53, %c0_54, %c0_55] : memref<9x64x64xf32, #tpu.memory_space<vmem>>, vector<1x64x64xf32>
    %53 = vector.shape_cast %52 : vector<1x64x64xf32> to vector<64x64xf32>
    %cst_56 = arith.constant dense<0.000000e+00> : vector<8x64xf32>
    %54 = tpu.matmul %51, %53, %cst_56 {dimension_numbers = #tpu.dot_dimension_numbers<[1], [0], [0], [1], [0, 0, 1, 1], [], []>} : vector<8x64xf32>, vector<64x64xf32>, vector<8x64xf32> -> vector<8x64xf32>
    %55 = arith.addf %48, %54 : vector<8x64xf32>
    %c8 = arith.constant 8 : index
    %c0_57 = arith.constant 0 : index
    %c0_58 = arith.constant 0 : index
    %56 = vector.load %arg1[%c8, %c0_57, %c0_58] : memref<9x8x3xf32, #tpu.memory_space<vmem>>, vector<1x8x3xf32>
    %57 = vector.shape_cast %56 : vector<1x8x3xf32> to vector<8x3xf32>
    %cst_59 = arith.constant dense<0.000000e+00> : vector<8x64xf32>
    %58 = tpu.matmul %57, %0, %cst_59 {dimension_numbers = #tpu.dot_dimension_numbers<[1], [0], [0], [1], [0, 0, 1, 1], [], []>} : vector<8x3xf32>, vector<3x64xf32>, vector<8x64xf32> -> vector<8x64xf32>
    %c8_60 = arith.constant 8 : index
    %c0_61 = arith.constant 0 : index
    %c0_62 = arith.constant 0 : index
    %59 = vector.load %arg3[%c8_60, %c0_61, %c0_62] : memref<9x64x64xf32, #tpu.memory_space<vmem>>, vector<1x64x64xf32>
    %60 = vector.shape_cast %59 : vector<1x64x64xf32> to vector<64x64xf32>
    %cst_63 = arith.constant dense<0.000000e+00> : vector<8x64xf32>
    %61 = tpu.matmul %58, %60, %cst_63 {dimension_numbers = #tpu.dot_dimension_numbers<[1], [0], [0], [1], [0, 0, 1, 1], [], []>} : vector<8x64xf32>, vector<64x64xf32>, vector<8x64xf32> -> vector<8x64xf32>
    %62 = arith.addf %55, %61 : vector<8x64xf32>
    %cst_64 = arith.constant 0.000000e+00 : f32
    %63 = vector.broadcast %cst_64 : f32 to vector<8x64xf32>
    %64 = arith.maximumf %62, %63 : vector<8x64xf32>
    %c0_65 = arith.constant 0 : index
    %c0_66 = arith.constant 0 : index
    %c0_67 = arith.constant 0 : index
    %65 = vector.load %arg2[%c0_65, %c0_66, %c0_67] : memref<9x8x8xf32, #tpu.memory_space<vmem>>, vector<1x8x8xf32>
    %66 = vector.shape_cast %65 : vector<1x8x8xf32> to vector<8x8xf32>
    %cst_68 = arith.constant dense<0.000000e+00> : vector<8x64xf32>
    %67 = tpu.matmul %66, %64, %cst_68 {dimension_numbers = #tpu.dot_dimension_numbers<[1], [0], [0], [1], [0, 0, 1, 1], [], []>} : vector<8x8xf32>, vector<8x64xf32>, vector<8x64xf32> -> vector<8x64xf32>
    %c0_69 = arith.constant 0 : index
    %c0_70 = arith.constant 0 : index
    %c0_71 = arith.constant 0 : index
    %68 = vector.load %arg3[%c0_69, %c0_70, %c0_71] : memref<9x64x64xf32, #tpu.memory_space<vmem>>, vector<1x64x64xf32>
    %69 = vector.shape_cast %68 : vector<1x64x64xf32> to vector<64x64xf32>
    %cst_72 = arith.constant dense<0.000000e+00> : vector<8x64xf32>
    %70 = tpu.matmul %67, %69, %cst_72 {dimension_numbers = #tpu.dot_dimension_numbers<[1], [0], [0], [1], [0, 0, 1, 1], [], []>} : vector<8x64xf32>, vector<64x64xf32>, vector<8x64xf32> -> vector<8x64xf32>
    %c1_73 = arith.constant 1 : index
    %c0_74 = arith.constant 0 : index
    %c0_75 = arith.constant 0 : index
    %71 = vector.load %arg2[%c1_73, %c0_74, %c0_75] : memref<9x8x8xf32, #tpu.memory_space<vmem>>, vector<1x8x8xf32>
    %72 = vector.shape_cast %71 : vector<1x8x8xf32> to vector<8x8xf32>
    %cst_76 = arith.constant dense<0.000000e+00> : vector<8x64xf32>
    %73 = tpu.matmul %72, %64, %cst_76 {dimension_numbers = #tpu.dot_dimension_numbers<[1], [0], [0], [1], [0, 0, 1, 1], [], []>} : vector<8x8xf32>, vector<8x64xf32>, vector<8x64xf32> -> vector<8x64xf32>
    %c1_77 = arith.constant 1 : index
    %c0_78 = arith.constant 0 : index
    %c0_79 = arith.constant 0 : index
    %74 = vector.load %arg3[%c1_77, %c0_78, %c0_79] : memref<9x64x64xf32, #tpu.memory_space<vmem>>, vector<1x64x64xf32>
    %75 = vector.shape_cast %74 : vector<1x64x64xf32> to vector<64x64xf32>
    %cst_80 = arith.constant dense<0.000000e+00> : vector<8x64xf32>
    %76 = tpu.matmul %73, %75, %cst_80 {dimension_numbers = #tpu.dot_dimension_numbers<[1], [0], [0], [1], [0, 0, 1, 1], [], []>} : vector<8x64xf32>, vector<64x64xf32>, vector<8x64xf32> -> vector<8x64xf32>
    %77 = arith.addf %70, %76 : vector<8x64xf32>
    %c2_81 = arith.constant 2 : index
    %c0_82 = arith.constant 0 : index
    %c0_83 = arith.constant 0 : index
    %78 = vector.load %arg2[%c2_81, %c0_82, %c0_83] : memref<9x8x8xf32, #tpu.memory_space<vmem>>, vector<1x8x8xf32>
    %79 = vector.shape_cast %78 : vector<1x8x8xf32> to vector<8x8xf32>
    %cst_84 = arith.constant dense<0.000000e+00> : vector<8x64xf32>
    %80 = tpu.matmul %79, %64, %cst_84 {dimension_numbers = #tpu.dot_dimension_numbers<[1], [0], [0], [1], [0, 0, 1, 1], [], []>} : vector<8x8xf32>, vector<8x64xf32>, vector<8x64xf32> -> vector<8x64xf32>
    %c2_85 = arith.constant 2 : index
    %c0_86 = arith.constant 0 : index
    %c0_87 = arith.constant 0 : index
    %81 = vector.load %arg3[%c2_85, %c0_86, %c0_87] : memref<9x64x64xf32, #tpu.memory_space<vmem>>, vector<1x64x64xf32>
    %82 = vector.shape_cast %81 : vector<1x64x64xf32> to vector<64x64xf32>
    %cst_88 = arith.constant dense<0.000000e+00> : vector<8x64xf32>
    %83 = tpu.matmul %80, %82, %cst_88 {dimension_numbers = #tpu.dot_dimension_numbers<[1], [0], [0], [1], [0, 0, 1, 1], [], []>} : vector<8x64xf32>, vector<64x64xf32>, vector<8x64xf32> -> vector<8x64xf32>
    %84 = arith.addf %77, %83 : vector<8x64xf32>
    %c3_89 = arith.constant 3 : index
    %c0_90 = arith.constant 0 : index
    %c0_91 = arith.constant 0 : index
    %85 = vector.load %arg2[%c3_89, %c0_90, %c0_91] : memref<9x8x8xf32, #tpu.memory_space<vmem>>, vector<1x8x8xf32>
    %86 = vector.shape_cast %85 : vector<1x8x8xf32> to vector<8x8xf32>
    %cst_92 = arith.constant dense<0.000000e+00> : vector<8x64xf32>
    %87 = tpu.matmul %86, %64, %cst_92 {dimension_numbers = #tpu.dot_dimension_numbers<[1], [0], [0], [1], [0, 0, 1, 1], [], []>} : vector<8x8xf32>, vector<8x64xf32>, vector<8x64xf32> -> vector<8x64xf32>
    %c3_93 = arith.constant 3 : index
    %c0_94 = arith.constant 0 : index
    %c0_95 = arith.constant 0 : index
    %88 = vector.load %arg3[%c3_93, %c0_94, %c0_95] : memref<9x64x64xf32, #tpu.memory_space<vmem>>, vector<1x64x64xf32>
    %89 = vector.shape_cast %88 : vector<1x64x64xf32> to vector<64x64xf32>
    %cst_96 = arith.constant dense<0.000000e+00> : vector<8x64xf32>
    %90 = tpu.matmul %87, %89, %cst_96 {dimension_numbers = #tpu.dot_dimension_numbers<[1], [0], [0], [1], [0, 0, 1, 1], [], []>} : vector<8x64xf32>, vector<64x64xf32>, vector<8x64xf32> -> vector<8x64xf32>
    %91 = arith.addf %84, %90 : vector<8x64xf32>
    %c4_97 = arith.constant 4 : index
    %c0_98 = arith.constant 0 : index
    %c0_99 = arith.constant 0 : index
    %92 = vector.load %arg2[%c4_97, %c0_98, %c0_99] : memref<9x8x8xf32, #tpu.memory_space<vmem>>, vector<1x8x8xf32>
    %93 = vector.shape_cast %92 : vector<1x8x8xf32> to vector<8x8xf32>
    %cst_100 = arith.constant dense<0.000000e+00> : vector<8x64xf32>
    %94 = tpu.matmul %93, %64, %cst_100 {dimension_numbers = #tpu.dot_dimension_numbers<[1], [0], [0], [1], [0, 0, 1, 1], [], []>} : vector<8x8xf32>, vector<8x64xf32>, vector<8x64xf32> -> vector<8x64xf32>
    %c4_101 = arith.constant 4 : index
    %c0_102 = arith.constant 0 : index
    %c0_103 = arith.constant 0 : index
    %95 = vector.load %arg3[%c4_101, %c0_102, %c0_103] : memref<9x64x64xf32, #tpu.memory_space<vmem>>, vector<1x64x64xf32>
    %96 = vector.shape_cast %95 : vector<1x64x64xf32> to vector<64x64xf32>
    %cst_104 = arith.constant dense<0.000000e+00> : vector<8x64xf32>
    %97 = tpu.matmul %94, %96, %cst_104 {dimension_numbers = #tpu.dot_dimension_numbers<[1], [0], [0], [1], [0, 0, 1, 1], [], []>} : vector<8x64xf32>, vector<64x64xf32>, vector<8x64xf32> -> vector<8x64xf32>
    %98 = arith.addf %91, %97 : vector<8x64xf32>
    %c5_105 = arith.constant 5 : index
    %c0_106 = arith.constant 0 : index
    %c0_107 = arith.constant 0 : index
    %99 = vector.load %arg2[%c5_105, %c0_106, %c0_107] : memref<9x8x8xf32, #tpu.memory_space<vmem>>, vector<1x8x8xf32>
    %100 = vector.shape_cast %99 : vector<1x8x8xf32> to vector<8x8xf32>
    %cst_108 = arith.constant dense<0.000000e+00> : vector<8x64xf32>
    %101 = tpu.matmul %100, %64, %cst_108 {dimension_numbers = #tpu.dot_dimension_numbers<[1], [0], [0], [1], [0, 0, 1, 1], [], []>} : vector<8x8xf32>, vector<8x64xf32>, vector<8x64xf32> -> vector<8x64xf32>
    %c5_109 = arith.constant 5 : index
    %c0_110 = arith.constant 0 : index
    %c0_111 = arith.constant 0 : index
    %102 = vector.load %arg3[%c5_109, %c0_110, %c0_111] : memref<9x64x64xf32, #tpu.memory_space<vmem>>, vector<1x64x64xf32>
    %103 = vector.shape_cast %102 : vector<1x64x64xf32> to vector<64x64xf32>
    %cst_112 = arith.constant dense<0.000000e+00> : vector<8x64xf32>
    %104 = tpu.matmul %101, %103, %cst_112 {dimension_numbers = #tpu.dot_dimension_numbers<[1], [0], [0], [1], [0, 0, 1, 1], [], []>} : vector<8x64xf32>, vector<64x64xf32>, vector<8x64xf32> -> vector<8x64xf32>
    %105 = arith.addf %98, %104 : vector<8x64xf32>
    %c6_113 = arith.constant 6 : index
    %c0_114 = arith.constant 0 : index
    %c0_115 = arith.constant 0 : index
    %106 = vector.load %arg2[%c6_113, %c0_114, %c0_115] : memref<9x8x8xf32, #tpu.memory_space<vmem>>, vector<1x8x8xf32>
    %107 = vector.shape_cast %106 : vector<1x8x8xf32> to vector<8x8xf32>
    %cst_116 = arith.constant dense<0.000000e+00> : vector<8x64xf32>
    %108 = tpu.matmul %107, %64, %cst_116 {dimension_numbers = #tpu.dot_dimension_numbers<[1], [0], [0], [1], [0, 0, 1, 1], [], []>} : vector<8x8xf32>, vector<8x64xf32>, vector<8x64xf32> -> vector<8x64xf32>
    %c6_117 = arith.constant 6 : index
    %c0_118 = arith.constant 0 : index
    %c0_119 = arith.constant 0 : index
    %109 = vector.load %arg3[%c6_117, %c0_118, %c0_119] : memref<9x64x64xf32, #tpu.memory_space<vmem>>, vector<1x64x64xf32>
    %110 = vector.shape_cast %109 : vector<1x64x64xf32> to vector<64x64xf32>
    %cst_120 = arith.constant dense<0.000000e+00> : vector<8x64xf32>
    %111 = tpu.matmul %108, %110, %cst_120 {dimension_numbers = #tpu.dot_dimension_numbers<[1], [0], [0], [1], [0, 0, 1, 1], [], []>} : vector<8x64xf32>, vector<64x64xf32>, vector<8x64xf32> -> vector<8x64xf32>
    %112 = arith.addf %105, %111 : vector<8x64xf32>
    %c7_121 = arith.constant 7 : index
    %c0_122 = arith.constant 0 : index
    %c0_123 = arith.constant 0 : index
    %113 = vector.load %arg2[%c7_121, %c0_122, %c0_123] : memref<9x8x8xf32, #tpu.memory_space<vmem>>, vector<1x8x8xf32>
    %114 = vector.shape_cast %113 : vector<1x8x8xf32> to vector<8x8xf32>
    %cst_124 = arith.constant dense<0.000000e+00> : vector<8x64xf32>
    %115 = tpu.matmul %114, %64, %cst_124 {dimension_numbers = #tpu.dot_dimension_numbers<[1], [0], [0], [1], [0, 0, 1, 1], [], []>} : vector<8x8xf32>, vector<8x64xf32>, vector<8x64xf32> -> vector<8x64xf32>
    %c7_125 = arith.constant 7 : index
    %c0_126 = arith.constant 0 : index
    %c0_127 = arith.constant 0 : index
    %116 = vector.load %arg3[%c7_125, %c0_126, %c0_127] : memref<9x64x64xf32, #tpu.memory_space<vmem>>, vector<1x64x64xf32>
    %117 = vector.shape_cast %116 : vector<1x64x64xf32> to vector<64x64xf32>
    %cst_128 = arith.constant dense<0.000000e+00> : vector<8x64xf32>
    %118 = tpu.matmul %115, %117, %cst_128 {dimension_numbers = #tpu.dot_dimension_numbers<[1], [0], [0], [1], [0, 0, 1, 1], [], []>} : vector<8x64xf32>, vector<64x64xf32>, vector<8x64xf32> -> vector<8x64xf32>
    %119 = arith.addf %112, %118 : vector<8x64xf32>
    %c8_129 = arith.constant 8 : index
    %c0_130 = arith.constant 0 : index
    %c0_131 = arith.constant 0 : index
    %120 = vector.load %arg2[%c8_129, %c0_130, %c0_131] : memref<9x8x8xf32, #tpu.memory_space<vmem>>, vector<1x8x8xf32>
    %121 = vector.shape_cast %120 : vector<1x8x8xf32> to vector<8x8xf32>
    %cst_132 = arith.constant dense<0.000000e+00> : vector<8x64xf32>
    %122 = tpu.matmul %121, %64, %cst_132 {dimension_numbers = #tpu.dot_dimension_numbers<[1], [0], [0], [1], [0, 0, 1, 1], [], []>} : vector<8x8xf32>, vector<8x64xf32>, vector<8x64xf32> -> vector<8x64xf32>
    %c8_133 = arith.constant 8 : index
    %c0_134 = arith.constant 0 : index
    %c0_135 = arith.constant 0 : index
    %123 = vector.load %arg3[%c8_133, %c0_134, %c0_135] : memref<9x64x64xf32, #tpu.memory_space<vmem>>, vector<1x64x64xf32>
    %124 = vector.shape_cast %123 : vector<1x64x64xf32> to vector<64x64xf32>
    %cst_136 = arith.constant dense<0.000000e+00> : vector<8x64xf32>
    %125 = tpu.matmul %122, %124, %cst_136 {dimension_numbers = #tpu.dot_dimension_numbers<[1], [0], [0], [1], [0, 0, 1, 1], [], []>} : vector<8x64xf32>, vector<64x64xf32>, vector<8x64xf32> -> vector<8x64xf32>
    %126 = arith.addf %119, %125 : vector<8x64xf32>
    %c0_137 = arith.constant 0 : index
    %c0_138 = arith.constant 0 : index
    %127 = vector.load %arg4[%c0_137, %c0_138] : memref<64x64xf32, #tpu.memory_space<vmem>>, vector<64x64xf32>
    %cst_139 = arith.constant dense<0.000000e+00> : vector<8x64xf32>
    %128 = tpu.matmul %126, %127, %cst_139 {dimension_numbers = #tpu.dot_dimension_numbers<[1], [0], [0], [1], [0, 0, 1, 1], [], []>} : vector<8x64xf32>, vector<64x64xf32>, vector<8x64xf32> -> vector<8x64xf32>
    %c0_140 = arith.constant 0 : index
    %c0_141 = arith.constant 0 : index
    %129 = vector.load %arg5[%c0_140, %c0_141] : memref<8x64xf32, #tpu.memory_space<vmem>>, vector<8x64xf32>
    %c0_142 = arith.constant 0 : index
    %c0_143 = arith.constant 0 : index
    %130 = vector.load %arg7[%c0_142, %c0_143] : memref<8x8xf32, #tpu.memory_space<vmem>>, vector<8x8xf32>
    %cst_144 = arith.constant dense<0.000000e+00> : vector<8x64xf32>
    %131 = tpu.matmul %130, %128, %cst_144 {dimension_numbers = #tpu.dot_dimension_numbers<[1], [0], [0], [1], [0, 0, 1, 1], [], []>} : vector<8x8xf32>, vector<8x64xf32>, vector<8x64xf32> -> vector<8x64xf32>
    %c0_145 = arith.constant 0 : index
    %c0_146 = arith.constant 0 : index
    %132 = vector.load %arg8[%c0_145, %c0_146] : memref<8x8xf32, #tpu.memory_space<vmem>>, vector<8x8xf32>
    %cst_147 = arith.constant dense<0.000000e+00> : vector<8x64xf32>
    %133 = tpu.matmul %132, %129, %cst_147 {dimension_numbers = #tpu.dot_dimension_numbers<[1], [0], [0], [1], [0, 0, 1, 1], [], []>} : vector<8x8xf32>, vector<8x64xf32>, vector<8x64xf32> -> vector<8x64xf32>
    %134 = arith.addf %131, %133 : vector<8x64xf32>
    %cst_148 = arith.constant 0.000000e+00 : f32
    %135 = vector.broadcast %cst_148 : f32 to vector<8x64xf32>
    %136 = arith.subf %135, %134 : vector<8x64xf32>
    %137 = math.exp %136 : vector<8x64xf32>
    %cst_149 = arith.constant 1.000000e+00 : f32
    %138 = vector.broadcast %cst_149 : f32 to vector<8x64xf32>
    %139 = arith.addf %138, %137 : vector<8x64xf32>
    %cst_150 = arith.constant 1.000000e+00 : f32
    %140 = vector.broadcast %cst_150 : f32 to vector<8x64xf32>
    %141 = arith.divf %140, %139 : vector<8x64xf32>
    %142 = arith.mulf %141, %128 : vector<8x64xf32>
    %cst_151 = arith.constant 1.000000e+00 : f32
    %143 = vector.broadcast %cst_151 : f32 to vector<8x64xf32>
    %144 = arith.subf %143, %141 : vector<8x64xf32>
    %145 = arith.mulf %144, %129 : vector<8x64xf32>
    %146 = arith.addf %142, %145 : vector<8x64xf32>
    %c0_152 = arith.constant 0 : index
    %c0_153 = arith.constant 0 : index
    %147 = vector.load %arg17[%c0_152, %c0_153] : memref<8x64xf32, #tpu.memory_space<vmem>>, vector<8x64xf32>
    tpu.vector_store %arg17[%c0_152, %c0_153], %146 {strides = array<i32>} : memref<8x64xf32, #tpu.memory_space<vmem>>, vector<8x64xf32>,
    %c0_154 = arith.constant 0 : index
    %c0_155 = arith.constant 0 : index
    %148 = vector.load %arg9[%c0_154, %c0_155] : memref<8x8xf32, #tpu.memory_space<vmem>>, vector<8x8xf32>
    %cst_156 = arith.constant dense<0.000000e+00> : vector<8x64xf32>
    %149 = tpu.matmul %148, %146, %cst_156 {dimension_numbers = #tpu.dot_dimension_numbers<[1], [0], [0], [1], [0, 0, 1, 1], [], []>} : vector<8x8xf32>, vector<8x64xf32>, vector<8x64xf32> -> vector<8x64xf32>
    %c0_157 = arith.constant 0 : index
    %c0_158 = arith.constant 0 : index
    %150 = vector.load %arg10[%c0_157, %c0_158] : memref<8x3xf32, #tpu.memory_space<vmem>>, vector<8x3xf32>
    %c0_159 = arith.constant 0 : index
    %c0_160 = arith.constant 0 : index
    %151 = vector.load %arg6[%c0_159, %c0_160] : memref<3x64xf32, #tpu.memory_space<vmem>>, vector<3x64xf32>
    %cst_161 = arith.constant dense<0.000000e+00> : vector<8x64xf32>
    %152 = tpu.matmul %150, %151, %cst_161 {dimension_numbers = #tpu.dot_dimension_numbers<[1], [0], [0], [1], [0, 0, 1, 1], [], []>} : vector<8x3xf32>, vector<3x64xf32>, vector<8x64xf32> -> vector<8x64xf32>
    %153 = arith.addf %149, %152 : vector<8x64xf32>
    %cst_162 = arith.constant 0.000000e+00 : f32
    %154 = vector.broadcast %cst_162 : f32 to vector<8x64xf32>
    %155 = arith.maximumf %153, %154 : vector<8x64xf32>
    %c0_163 = arith.constant 0 : index
    %c0_164 = arith.constant 0 : index
    %156 = vector.load %arg11[%c0_163, %c0_164] : memref<8x8xf32, #tpu.memory_space<vmem>>, vector<8x8xf32>
    %cst_165 = arith.constant dense<0.000000e+00> : vector<8x64xf32>
    %157 = tpu.matmul %156, %155, %cst_165 {dimension_numbers = #tpu.dot_dimension_numbers<[1], [0], [0], [1], [0, 0, 1, 1], [], []>} : vector<8x8xf32>, vector<8x64xf32>, vector<8x64xf32> -> vector<8x64xf32>
    %c0_166 = arith.constant 0 : index
    %c0_167 = arith.constant 0 : index
    %158 = vector.load %arg13[%c0_166, %c0_167] : memref<8x1xf32, #tpu.memory_space<vmem>>, vector<8x1xf32>
    %c0_168 = arith.constant 0 : index
    %c0_169 = arith.constant 0 : index
    %c0_170 = arith.constant 0 : index
    %159 = vector.load %arg12[%c0_168, %c0_169, %c0_170] : memref<8x64x128xf32, #tpu.memory_space<vmem>>, vector<1x64x128xf32>
    %160 = vector.shape_cast %159 : vector<1x64x128xf32> to vector<64x128xf32>
    %cst_171 = arith.constant dense<0.000000e+00> : vector<8x128xf32>
    %161 = tpu.matmul %157, %160, %cst_171 {dimension_numbers = #tpu.dot_dimension_numbers<[1], [0], [0], [1], [0, 0, 1, 1], [], []>} : vector<8x64xf32>, vector<64x128xf32>, vector<8x128xf32> -> vector<8x128xf32>
    %162 = vector.broadcast %158 : vector<8x1xf32> to vector<8x128xf32>
    %163 = arith.mulf %161, %162 : vector<8x128xf32>
    %cst_172 = arith.constant dense<0.000000e+00> : vector<128xf32>
    %164 = vector.multi_reduction <add>, %163, %cst_172 [0] : vector<8x128xf32> to vector<128xf32>
    %165 = vector.shape_cast %164 : vector<128xf32> to vector<1x128xf32>
    %c1_173 = arith.constant 1 : index
    %c0_174 = arith.constant 0 : index
    %c0_175 = arith.constant 0 : index
    %166 = vector.load %arg12[%c1_173, %c0_174, %c0_175] : memref<8x64x128xf32, #tpu.memory_space<vmem>>, vector<1x64x128xf32>
    %167 = vector.shape_cast %166 : vector<1x64x128xf32> to vector<64x128xf32>
    %cst_176 = arith.constant dense<0.000000e+00> : vector<8x128xf32>
    %168 = tpu.matmul %157, %167, %cst_176 {dimension_numbers = #tpu.dot_dimension_numbers<[1], [0], [0], [1], [0, 0, 1, 1], [], []>} : vector<8x64xf32>, vector<64x128xf32>, vector<8x128xf32> -> vector<8x128xf32>
    %169 = vector.broadcast %158 : vector<8x1xf32> to vector<8x128xf32>
    %170 = arith.mulf %168, %169 : vector<8x128xf32>
    %cst_177 = arith.constant dense<0.000000e+00> : vector<128xf32>
    %171 = vector.multi_reduction <add>, %170, %cst_177 [0] : vector<8x128xf32> to vector<128xf32>
    %172 = vector.shape_cast %171 : vector<128xf32> to vector<1x128xf32>
    %c2_178 = arith.constant 2 : index
    %c0_179 = arith.constant 0 : index
    %c0_180 = arith.constant 0 : index
    %173 = vector.load %arg12[%c2_178, %c0_179, %c0_180] : memref<8x64x128xf32, #tpu.memory_space<vmem>>, vector<1x64x128xf32>
    %174 = vector.shape_cast %173 : vector<1x64x128xf32> to vector<64x128xf32>
    %cst_181 = arith.constant dense<0.000000e+00> : vector<8x128xf32>
    %175 = tpu.matmul %157, %174, %cst_181 {dimension_numbers = #tpu.dot_dimension_numbers<[1], [0], [0], [1], [0, 0, 1, 1], [], []>} : vector<8x64xf32>, vector<64x128xf32>, vector<8x128xf32> -> vector<8x128xf32>
    %176 = vector.broadcast %158 : vector<8x1xf32> to vector<8x128xf32>
    %177 = arith.mulf %175, %176 : vector<8x128xf32>
    %cst_182 = arith.constant dense<0.000000e+00> : vector<128xf32>
    %178 = vector.multi_reduction <add>, %177, %cst_182 [0] : vector<8x128xf32> to vector<128xf32>
    %179 = vector.shape_cast %178 : vector<128xf32> to vector<1x128xf32>
    %c3_183 = arith.constant 3 : index
    %c0_184 = arith.constant 0 : index
    %c0_185 = arith.constant 0 : index
    %180 = vector.load %arg12[%c3_183, %c0_184, %c0_185] : memref<8x64x128xf32, #tpu.memory_space<vmem>>, vector<1x64x128xf32>
    %181 = vector.shape_cast %180 : vector<1x64x128xf32> to vector<64x128xf32>
    %cst_186 = arith.constant dense<0.000000e+00> : vector<8x128xf32>
    %182 = tpu.matmul %157, %181, %cst_186 {dimension_numbers = #tpu.dot_dimension_numbers<[1], [0], [0], [1], [0, 0, 1, 1], [], []>} : vector<8x64xf32>, vector<64x128xf32>, vector<8x128xf32> -> vector<8x128xf32>
    %183 = vector.broadcast %158 : vector<8x1xf32> to vector<8x128xf32>
    %184 = arith.mulf %182, %183 : vector<8x128xf32>
    %cst_187 = arith.constant dense<0.000000e+00> : vector<128xf32>
    %185 = vector.multi_reduction <add>, %184, %cst_187 [0] : vector<8x128xf32> to vector<128xf32>
    %186 = vector.shape_cast %185 : vector<128xf32> to vector<1x128xf32>
    %c4_188 = arith.constant 4 : index
    %c0_189 = arith.constant 0 : index
    %c0_190 = arith.constant 0 : index
    %187 = vector.load %arg12[%c4_188, %c0_189, %c0_190] : memref<8x64x128xf32, #tpu.memory_space<vmem>>, vector<1x64x128xf32>
    %188 = vector.shape_cast %187 : vector<1x64x128xf32> to vector<64x128xf32>
    %cst_191 = arith.constant dense<0.000000e+00> : vector<8x128xf32>
    %189 = tpu.matmul %157, %188, %cst_191 {dimension_numbers = #tpu.dot_dimension_numbers<[1], [0], [0], [1], [0, 0, 1, 1], [], []>} : vector<8x64xf32>, vector<64x128xf32>, vector<8x128xf32> -> vector<8x128xf32>
    %190 = vector.broadcast %158 : vector<8x1xf32> to vector<8x128xf32>
    %191 = arith.mulf %189, %190 : vector<8x128xf32>
    %cst_192 = arith.constant dense<0.000000e+00> : vector<128xf32>
    %192 = vector.multi_reduction <add>, %191, %cst_192 [0] : vector<8x128xf32> to vector<128xf32>
    %193 = vector.shape_cast %192 : vector<128xf32> to vector<1x128xf32>
    %c5_193 = arith.constant 5 : index
    %c0_194 = arith.constant 0 : index
    %c0_195 = arith.constant 0 : index
    %194 = vector.load %arg12[%c5_193, %c0_194, %c0_195] : memref<8x64x128xf32, #tpu.memory_space<vmem>>, vector<1x64x128xf32>
    %195 = vector.shape_cast %194 : vector<1x64x128xf32> to vector<64x128xf32>
    %cst_196 = arith.constant dense<0.000000e+00> : vector<8x128xf32>
    %196 = tpu.matmul %157, %195, %cst_196 {dimension_numbers = #tpu.dot_dimension_numbers<[1], [0], [0], [1], [0, 0, 1, 1], [], []>} : vector<8x64xf32>, vector<64x128xf32>, vector<8x128xf32> -> vector<8x128xf32>
    %197 = vector.broadcast %158 : vector<8x1xf32> to vector<8x128xf32>
    %198 = arith.mulf %196, %197 : vector<8x128xf32>
    %cst_197 = arith.constant dense<0.000000e+00> : vector<128xf32>
    %199 = vector.multi_reduction <add>, %198, %cst_197 [0] : vector<8x128xf32> to vector<128xf32>
    %200 = vector.shape_cast %199 : vector<128xf32> to vector<1x128xf32>
    %c6_198 = arith.constant 6 : index
    %c0_199 = arith.constant 0 : index
    %c0_200 = arith.constant 0 : index
    %201 = vector.load %arg12[%c6_198, %c0_199, %c0_200] : memref<8x64x128xf32, #tpu.memory_space<vmem>>, vector<1x64x128xf32>
    %202 = vector.shape_cast %201 : vector<1x64x128xf32> to vector<64x128xf32>
    %cst_201 = arith.constant dense<0.000000e+00> : vector<8x128xf32>
    %203 = tpu.matmul %157, %202, %cst_201 {dimension_numbers = #tpu.dot_dimension_numbers<[1], [0], [0], [1], [0, 0, 1, 1], [], []>} : vector<8x64xf32>, vector<64x128xf32>, vector<8x128xf32> -> vector<8x128xf32>
    %204 = vector.broadcast %158 : vector<8x1xf32> to vector<8x128xf32>
    %205 = arith.mulf %203, %204 : vector<8x128xf32>
    %cst_202 = arith.constant dense<0.000000e+00> : vector<128xf32>
    %206 = vector.multi_reduction <add>, %205, %cst_202 [0] : vector<8x128xf32> to vector<128xf32>
    %207 = vector.shape_cast %206 : vector<128xf32> to vector<1x128xf32>
    %c7_203 = arith.constant 7 : index
    %c0_204 = arith.constant 0 : index
    %c0_205 = arith.constant 0 : index
    %208 = vector.load %arg12[%c7_203, %c0_204, %c0_205] : memref<8x64x128xf32, #tpu.memory_space<vmem>>, vector<1x64x128xf32>
    %209 = vector.shape_cast %208 : vector<1x64x128xf32> to vector<64x128xf32>
    %cst_206 = arith.constant dense<0.000000e+00> : vector<8x128xf32>
    %210 = tpu.matmul %157, %209, %cst_206 {dimension_numbers = #tpu.dot_dimension_numbers<[1], [0], [0], [1], [0, 0, 1, 1], [], []>} : vector<8x64xf32>, vector<64x128xf32>, vector<8x128xf32> -> vector<8x128xf32>
    %211 = vector.broadcast %158 : vector<8x1xf32> to vector<8x128xf32>
    %212 = arith.mulf %210, %211 : vector<8x128xf32>
    %cst_207 = arith.constant dense<0.000000e+00> : vector<128xf32>
    %213 = vector.multi_reduction <add>, %212, %cst_207 [0] : vector<8x128xf32> to vector<128xf32>
    %214 = vector.shape_cast %213 : vector<128xf32> to vector<1x128xf32>
    %215 = arith.maximumf %165, %172 : vector<1x128xf32>
    %216 = arith.maximumf %215, %179 : vector<1x128xf32>
    %217 = arith.maximumf %216, %186 : vector<1x128xf32>
    %218 = arith.maximumf %217, %193 : vector<1x128xf32>
    %219 = arith.maximumf %218, %200 : vector<1x128xf32>
    %220 = arith.maximumf %219, %207 : vector<1x128xf32>
    %221 = arith.maximumf %220, %214 : vector<1x128xf32>
    %222 = arith.subf %165, %221 : vector<1x128xf32>
    %223 = math.exp %222 : vector<1x128xf32>
    %224 = arith.subf %172, %221 : vector<1x128xf32>
    %225 = math.exp %224 : vector<1x128xf32>
    %226 = arith.subf %179, %221 : vector<1x128xf32>
    %227 = math.exp %226 : vector<1x128xf32>
    %228 = arith.subf %186, %221 : vector<1x128xf32>
    %229 = math.exp %228 : vector<1x128xf32>
    %230 = arith.subf %193, %221 : vector<1x128xf32>
    %231 = math.exp %230 : vector<1x128xf32>
    %232 = arith.subf %200, %221 : vector<1x128xf32>
    %233 = math.exp %232 : vector<1x128xf32>
    %234 = arith.subf %207, %221 : vector<1x128xf32>
    %235 = math.exp %234 : vector<1x128xf32>
    %236 = arith.subf %214, %221 : vector<1x128xf32>
    %237 = math.exp %236 : vector<1x128xf32>
    %238 = arith.addf %223, %225 : vector<1x128xf32>
    %239 = arith.addf %238, %227 : vector<1x128xf32>
    %240 = arith.addf %239, %229 : vector<1x128xf32>
    %241 = arith.addf %240, %231 : vector<1x128xf32>
    %242 = arith.addf %241, %233 : vector<1x128xf32>
    %243 = arith.addf %242, %235 : vector<1x128xf32>
    %244 = arith.addf %243, %237 : vector<1x128xf32>
    %245 = tpu.reciprocal %244 {approx = true} : vector<1x128xf32> -> vector<1x128xf32>
    %cst_208 = arith.constant 0.000000e+00 : f32
    %246 = vector.broadcast %cst_208 : f32 to vector<1x128xf32>
    %cst_209 = arith.constant 0.000000e+00 : f32
    %247 = vector.broadcast %cst_209 : f32 to vector<8x128xf32>
    %248 = arith.mulf %223, %245 : vector<1x128xf32>
    %cst_210 = arith.constant 0.000000e+00 : f32
    %249 = vector.broadcast %cst_210 : f32 to vector<1x128xf32>
    %250 = arith.mulf %248, %249 : vector<1x128xf32>
    %251 = arith.addf %246, %250 : vector<1x128xf32>
    %252 = vector.broadcast %248 : vector<1x128xf32> to vector<8x128xf32>
    %253 = arith.mulf %252, %161 : vector<8x128xf32>
    %254 = arith.addf %247, %253 : vector<8x128xf32>
    %255 = arith.mulf %225, %245 : vector<1x128xf32>
    %cst_211 = arith.constant 1.250000e-01 : f32
    %256 = vector.broadcast %cst_211 : f32 to vector<1x128xf32>
    %257 = arith.mulf %255, %256 : vector<1x128xf32>
    %258 = arith.addf %251, %257 : vector<1x128xf32>
    %259 = vector.broadcast %255 : vector<1x128xf32> to vector<8x128xf32>
    %260 = arith.mulf %259, %168 : vector<8x128xf32>
    %261 = arith.addf %254, %260 : vector<8x128xf32>
    %262 = arith.mulf %227, %245 : vector<1x128xf32>
    %cst_212 = arith.constant 2.500000e-01 : f32
    %263 = vector.broadcast %cst_212 : f32 to vector<1x128xf32>
    %264 = arith.mulf %262, %263 : vector<1x128xf32>
    %265 = arith.addf %258, %264 : vector<1x128xf32>
    %266 = vector.broadcast %262 : vector<1x128xf32> to vector<8x128xf32>
    %267 = arith.mulf %266, %175 : vector<8x128xf32>
    %268 = arith.addf %261, %267 : vector<8x128xf32>
    %269 = arith.mulf %229, %245 : vector<1x128xf32>
    %cst_213 = arith.constant 3.750000e-01 : f32
    %270 = vector.broadcast %cst_213 : f32 to vector<1x128xf32>
    %271 = arith.mulf %269, %270 : vector<1x128xf32>
    %272 = arith.addf %265, %271 : vector<1x128xf32>
    %273 = vector.broadcast %269 : vector<1x128xf32> to vector<8x128xf32>
    %274 = arith.mulf %273, %182 : vector<8x128xf32>
    %275 = arith.addf %268, %274 : vector<8x128xf32>
    %276 = arith.mulf %231, %245 : vector<1x128xf32>
    %cst_214 = arith.constant 5.000000e-01 : f32
    %277 = vector.broadcast %cst_214 : f32 to vector<1x128xf32>
    %278 = arith.mulf %276, %277 : vector<1x128xf32>
    %279 = arith.addf %272, %278 : vector<1x128xf32>
    %280 = vector.broadcast %276 : vector<1x128xf32> to vector<8x128xf32>
    %281 = arith.mulf %280, %189 : vector<8x128xf32>
    %282 = arith.addf %275, %281 : vector<8x128xf32>
    %283 = arith.mulf %233, %245 : vector<1x128xf32>
    %cst_215 = arith.constant 6.250000e-01 : f32
    %284 = vector.broadcast %cst_215 : f32 to vector<1x128xf32>
    %285 = arith.mulf %283, %284 : vector<1x128xf32>
    %286 = arith.addf %279, %285 : vector<1x128xf32>
    %287 = vector.broadcast %283 : vector<1x128xf32> to vector<8x128xf32>
    %288 = arith.mulf %287, %196 : vector<8x128xf32>
    %289 = arith.addf %282, %288 : vector<8x128xf32>
    %290 = arith.mulf %235, %245 : vector<1x128xf32>
    %cst_216 = arith.constant 7.500000e-01 : f32
    %291 = vector.broadcast %cst_216 : f32 to vector<1x128xf32>
    %292 = arith.mulf %290, %291 : vector<1x128xf32>
    %293 = arith.addf %286, %292 : vector<1x128xf32>
    %294 = vector.broadcast %290 : vector<1x128xf32> to vector<8x128xf32>
    %295 = arith.mulf %294, %203 : vector<8x128xf32>
    %296 = arith.addf %289, %295 : vector<8x128xf32>
    %297 = arith.mulf %237, %245 : vector<1x128xf32>
    %cst_217 = arith.constant 8.750000e-01 : f32
    %298 = vector.broadcast %cst_217 : f32 to vector<1x128xf32>
    %299 = arith.mulf %297, %298 : vector<1x128xf32>
    %300 = arith.addf %293, %299 : vector<1x128xf32>
    %301 = vector.broadcast %297 : vector<1x128xf32> to vector<8x128xf32>
    %302 = arith.mulf %301, %210 : vector<8x128xf32>
    %303 = arith.addf %296, %302 : vector<8x128xf32>
    %c0_218 = arith.constant 0 : index
    %c0_219 = arith.constant 0 : index
    %304 = vector.load %arg19[%c0_218, %c0_219] : memref<1x128xf32, #tpu.memory_space<vmem>>, vector<1x128xf32>
    tpu.vector_store %arg19[%c0_218, %c0_219], %300 {strides = array<i32>} : memref<1x128xf32, #tpu.memory_space<vmem>>, vector<1x128xf32>,
    %cst_220 = arith.constant 1.250000e-01 : f32
    %305 = vector.broadcast %cst_220 : f32 to vector<8x128xf32>
    %306 = arith.mulf %303, %305 : vector<8x128xf32>
    %c0_221 = arith.constant 0 : index
    %c0_222 = arith.constant 0 : index
    %c0_223 = arith.constant 0 : index
    %307 = vector.load %arg14[%c0_221, %c0_222, %c0_223] : memref<9x8x8xf32, #tpu.memory_space<vmem>>, vector<1x8x8xf32>
    %308 = vector.shape_cast %307 : vector<1x8x8xf32> to vector<8x8xf32>
    %cst_224 = arith.constant dense<0.000000e+00> : vector<8x128xf32>
    %309 = tpu.matmul %308, %306, %cst_224 {dimension_numbers = #tpu.dot_dimension_numbers<[1], [0], [0], [1], [0, 0, 1, 1], [], []>} : vector<8x8xf32>, vector<8x128xf32>, vector<8x128xf32> -> vector<8x128xf32>
    %c0_225 = arith.constant 0 : index
    %c0_226 = arith.constant 0 : index
    %c0_227 = arith.constant 0 : index
    %310 = vector.load %arg16[%c0_225, %c0_226, %c0_227] : memref<9x128x128xf32, #tpu.memory_space<vmem>>, vector<1x128x128xf32>
    %311 = vector.shape_cast %310 : vector<1x128x128xf32> to vector<128x128xf32>
    %cst_228 = arith.constant dense<0.000000e+00> : vector<8x128xf32>
    %312 = tpu.matmul %309, %311, %cst_228 {dimension_numbers = #tpu.dot_dimension_numbers<[1], [0], [0], [1], [0, 0, 1, 1], [], []>} : vector<8x128xf32>, vector<128x128xf32>, vector<8x128xf32> -> vector<8x128xf32>
    %c1_229 = arith.constant 1 : index
    %c0_230 = arith.constant 0 : index
    %c0_231 = arith.constant 0 : index
    %313 = vector.load %arg14[%c1_229, %c0_230, %c0_231] : memref<9x8x8xf32, #tpu.memory_space<vmem>>, vector<1x8x8xf32>
    %314 = vector.shape_cast %313 : vector<1x8x8xf32> to vector<8x8xf32>
    %cst_232 = arith.constant dense<0.000000e+00> : vector<8x128xf32>
    %315 = tpu.matmul %314, %306, %cst_232 {dimension_numbers = #tpu.dot_dimension_numbers<[1], [0], [0], [1], [0, 0, 1, 1], [], []>} : vector<8x8xf32>, vector<8x128xf32>, vector<8x128xf32> -> vector<8x128xf32>
    %c1_233 = arith.constant 1 : index
    %c0_234 = arith.constant 0 : index
    %c0_235 = arith.constant 0 : index
    %316 = vector.load %arg16[%c1_233, %c0_234, %c0_235] : memref<9x128x128xf32, #tpu.memory_space<vmem>>, vector<1x128x128xf32>
    %317 = vector.shape_cast %316 : vector<1x128x128xf32> to vector<128x128xf32>
    %cst_236 = arith.constant dense<0.000000e+00> : vector<8x128xf32>
    %318 = tpu.matmul %315, %317, %cst_236 {dimension_numbers = #tpu.dot_dimension_numbers<[1], [0], [0], [1], [0, 0, 1, 1], [], []>} : vector<8x128xf32>, vector<128x128xf32>, vector<8x128xf32> -> vector<8x128xf32>
    %319 = arith.addf %312, %318 : vector<8x128xf32>
    %c2_237 = arith.constant 2 : index
    %c0_238 = arith.constant 0 : index
    %c0_239 = arith.constant 0 : index
    %320 = vector.load %arg14[%c2_237, %c0_238, %c0_239] : memref<9x8x8xf32, #tpu.memory_space<vmem>>, vector<1x8x8xf32>
    %321 = vector.shape_cast %320 : vector<1x8x8xf32> to vector<8x8xf32>
    %cst_240 = arith.constant dense<0.000000e+00> : vector<8x128xf32>
    %322 = tpu.matmul %321, %306, %cst_240 {dimension_numbers = #tpu.dot_dimension_numbers<[1], [0], [0], [1], [0, 0, 1, 1], [], []>} : vector<8x8xf32>, vector<8x128xf32>, vector<8x128xf32> -> vector<8x128xf32>
    %c2_241 = arith.constant 2 : index
    %c0_242 = arith.constant 0 : index
    %c0_243 = arith.constant 0 : index
    %323 = vector.load %arg16[%c2_241, %c0_242, %c0_243] : memref<9x128x128xf32, #tpu.memory_space<vmem>>, vector<1x128x128xf32>
    %324 = vector.shape_cast %323 : vector<1x128x128xf32> to vector<128x128xf32>
    %cst_244 = arith.constant dense<0.000000e+00> : vector<8x128xf32>
    %325 = tpu.matmul %322, %324, %cst_244 {dimension_numbers = #tpu.dot_dimension_numbers<[1], [0], [0], [1], [0, 0, 1, 1], [], []>} : vector<8x128xf32>, vector<128x128xf32>, vector<8x128xf32> -> vector<8x128xf32>
    %326 = arith.addf %319, %325 : vector<8x128xf32>
    %c3_245 = arith.constant 3 : index
    %c0_246 = arith.constant 0 : index
    %c0_247 = arith.constant 0 : index
    %327 = vector.load %arg14[%c3_245, %c0_246, %c0_247] : memref<9x8x8xf32, #tpu.memory_space<vmem>>, vector<1x8x8xf32>
    %328 = vector.shape_cast %327 : vector<1x8x8xf32> to vector<8x8xf32>
    %cst_248 = arith.constant dense<0.000000e+00> : vector<8x128xf32>
    %329 = tpu.matmul %328, %306, %cst_248 {dimension_numbers = #tpu.dot_dimension_numbers<[1], [0], [0], [1], [0, 0, 1, 1], [], []>} : vector<8x8xf32>, vector<8x128xf32>, vector<8x128xf32> -> vector<8x128xf32>
    %c3_249 = arith.constant 3 : index
    %c0_250 = arith.constant 0 : index
    %c0_251 = arith.constant 0 : index
    %330 = vector.load %arg16[%c3_249, %c0_250, %c0_251] : memref<9x128x128xf32, #tpu.memory_space<vmem>>, vector<1x128x128xf32>
    %331 = vector.shape_cast %330 : vector<1x128x128xf32> to vector<128x128xf32>
    %cst_252 = arith.constant dense<0.000000e+00> : vector<8x128xf32>
    %332 = tpu.matmul %329, %331, %cst_252 {dimension_numbers = #tpu.dot_dimension_numbers<[1], [0], [0], [1], [0, 0, 1, 1], [], []>} : vector<8x128xf32>, vector<128x128xf32>, vector<8x128xf32> -> vector<8x128xf32>
    %333 = arith.addf %326, %332 : vector<8x128xf32>
    %c4_253 = arith.constant 4 : index
    %c0_254 = arith.constant 0 : index
    %c0_255 = arith.constant 0 : index
    %334 = vector.load %arg14[%c4_253, %c0_254, %c0_255] : memref<9x8x8xf32, #tpu.memory_space<vmem>>, vector<1x8x8xf32>
    %335 = vector.shape_cast %334 : vector<1x8x8xf32> to vector<8x8xf32>
    %cst_256 = arith.constant dense<0.000000e+00> : vector<8x128xf32>
    %336 = tpu.matmul %335, %306, %cst_256 {dimension_numbers = #tpu.dot_dimension_numbers<[1], [0], [0], [1], [0, 0, 1, 1], [], []>} : vector<8x8xf32>, vector<8x128xf32>, vector<8x128xf32> -> vector<8x128xf32>
    %c4_257 = arith.constant 4 : index
    %c0_258 = arith.constant 0 : index
    %c0_259 = arith.constant 0 : index
    %337 = vector.load %arg16[%c4_257, %c0_258, %c0_259] : memref<9x128x128xf32, #tpu.memory_space<vmem>>, vector<1x128x128xf32>
    %338 = vector.shape_cast %337 : vector<1x128x128xf32> to vector<128x128xf32>
    %cst_260 = arith.constant dense<0.000000e+00> : vector<8x128xf32>
    %339 = tpu.matmul %336, %338, %cst_260 {dimension_numbers = #tpu.dot_dimension_numbers<[1], [0], [0], [1], [0, 0, 1, 1], [], []>} : vector<8x128xf32>, vector<128x128xf32>, vector<8x128xf32> -> vector<8x128xf32>
    %340 = arith.addf %333, %339 : vector<8x128xf32>
    %c5_261 = arith.constant 5 : index
    %c0_262 = arith.constant 0 : index
    %c0_263 = arith.constant 0 : index
    %341 = vector.load %arg14[%c5_261, %c0_262, %c0_263] : memref<9x8x8xf32, #tpu.memory_space<vmem>>, vector<1x8x8xf32>
    %342 = vector.shape_cast %341 : vector<1x8x8xf32> to vector<8x8xf32>
    %cst_264 = arith.constant dense<0.000000e+00> : vector<8x128xf32>
    %343 = tpu.matmul %342, %306, %cst_264 {dimension_numbers = #tpu.dot_dimension_numbers<[1], [0], [0], [1], [0, 0, 1, 1], [], []>} : vector<8x8xf32>, vector<8x128xf32>, vector<8x128xf32> -> vector<8x128xf32>
    %c5_265 = arith.constant 5 : index
    %c0_266 = arith.constant 0 : index
    %c0_267 = arith.constant 0 : index
    %344 = vector.load %arg16[%c5_265, %c0_266, %c0_267] : memref<9x128x128xf32, #tpu.memory_space<vmem>>, vector<1x128x128xf32>
    %345 = vector.shape_cast %344 : vector<1x128x128xf32> to vector<128x128xf32>
    %cst_268 = arith.constant dense<0.000000e+00> : vector<8x128xf32>
    %346 = tpu.matmul %343, %345, %cst_268 {dimension_numbers = #tpu.dot_dimension_numbers<[1], [0], [0], [1], [0, 0, 1, 1], [], []>} : vector<8x128xf32>, vector<128x128xf32>, vector<8x128xf32> -> vector<8x128xf32>
    %347 = arith.addf %340, %346 : vector<8x128xf32>
    %c6_269 = arith.constant 6 : index
    %c0_270 = arith.constant 0 : index
    %c0_271 = arith.constant 0 : index
    %348 = vector.load %arg14[%c6_269, %c0_270, %c0_271] : memref<9x8x8xf32, #tpu.memory_space<vmem>>, vector<1x8x8xf32>
    %349 = vector.shape_cast %348 : vector<1x8x8xf32> to vector<8x8xf32>
    %cst_272 = arith.constant dense<0.000000e+00> : vector<8x128xf32>
    %350 = tpu.matmul %349, %306, %cst_272 {dimension_numbers = #tpu.dot_dimension_numbers<[1], [0], [0], [1], [0, 0, 1, 1], [], []>} : vector<8x8xf32>, vector<8x128xf32>, vector<8x128xf32> -> vector<8x128xf32>
    %c6_273 = arith.constant 6 : index
    %c0_274 = arith.constant 0 : index
    %c0_275 = arith.constant 0 : index
    %351 = vector.load %arg16[%c6_273, %c0_274, %c0_275] : memref<9x128x128xf32, #tpu.memory_space<vmem>>, vector<1x128x128xf32>
    %352 = vector.shape_cast %351 : vector<1x128x128xf32> to vector<128x128xf32>
    %cst_276 = arith.constant dense<0.000000e+00> : vector<8x128xf32>
    %353 = tpu.matmul %350, %352, %cst_276 {dimension_numbers = #tpu.dot_dimension_numbers<[1], [0], [0], [1], [0, 0, 1, 1], [], []>} : vector<8x128xf32>, vector<128x128xf32>, vector<8x128xf32> -> vector<8x128xf32>
    %354 = arith.addf %347, %353 : vector<8x128xf32>
    %c7_277 = arith.constant 7 : index
    %c0_278 = arith.constant 0 : index
    %c0_279 = arith.constant 0 : index
    %355 = vector.load %arg14[%c7_277, %c0_278, %c0_279] : memref<9x8x8xf32, #tpu.memory_space<vmem>>, vector<1x8x8xf32>
    %356 = vector.shape_cast %355 : vector<1x8x8xf32> to vector<8x8xf32>
    %cst_280 = arith.constant dense<0.000000e+00> : vector<8x128xf32>
    %357 = tpu.matmul %356, %306, %cst_280 {dimension_numbers = #tpu.dot_dimension_numbers<[1], [0], [0], [1], [0, 0, 1, 1], [], []>} : vector<8x8xf32>, vector<8x128xf32>, vector<8x128xf32> -> vector<8x128xf32>
    %c7_281 = arith.constant 7 : index
    %c0_282 = arith.constant 0 : index
    %c0_283 = arith.constant 0 : index
    %358 = vector.load %arg16[%c7_281, %c0_282, %c0_283] : memref<9x128x128xf32, #tpu.memory_space<vmem>>, vector<1x128x128xf32>
    %359 = vector.shape_cast %358 : vector<1x128x128xf32> to vector<128x128xf32>
    %cst_284 = arith.constant dense<0.000000e+00> : vector<8x128xf32>
    %360 = tpu.matmul %357, %359, %cst_284 {dimension_numbers = #tpu.dot_dimension_numbers<[1], [0], [0], [1], [0, 0, 1, 1], [], []>} : vector<8x128xf32>, vector<128x128xf32>, vector<8x128xf32> -> vector<8x128xf32>
    %361 = arith.addf %354, %360 : vector<8x128xf32>
    %c8_285 = arith.constant 8 : index
    %c0_286 = arith.constant 0 : index
    %c0_287 = arith.constant 0 : index
    %362 = vector.load %arg14[%c8_285, %c0_286, %c0_287] : memref<9x8x8xf32, #tpu.memory_space<vmem>>, vector<1x8x8xf32>
    %363 = vector.shape_cast %362 : vector<1x8x8xf32> to vector<8x8xf32>
    %cst_288 = arith.constant dense<0.000000e+00> : vector<8x128xf32>
    %364 = tpu.matmul %363, %306, %cst_288 {dimension_numbers = #tpu.dot_dimension_numbers<[1], [0], [0], [1], [0, 0, 1, 1], [], []>} : vector<8x8xf32>, vector<8x128xf32>, vector<8x128xf32> -> vector<8x128xf32>
    %c8_289 = arith.constant 8 : index
    %c0_290 = arith.constant 0 : index
    %c0_291 = arith.constant 0 : index
    %365 = vector.load %arg16[%c8_289, %c0_290, %c0_291] : memref<9x128x128xf32, #tpu.memory_space<vmem>>, vector<1x128x128xf32>
    %366 = vector.shape_cast %365 : vector<1x128x128xf32> to vector<128x128xf32>
    %cst_292 = arith.constant dense<0.000000e+00> : vector<8x128xf32>
    %367 = tpu.matmul %364, %366, %cst_292 {dimension_numbers = #tpu.dot_dimension_numbers<[1], [0], [0], [1], [0, 0, 1, 1], [], []>} : vector<8x128xf32>, vector<128x128xf32>, vector<8x128xf32> -> vector<8x128xf32>
    %368 = arith.addf %361, %367 : vector<8x128xf32>
    %cst_293 = arith.constant 0.000000e+00 : f32
    %369 = vector.broadcast %cst_293 : f32 to vector<8x128xf32>
    %370 = arith.maximumf %368, %369 : vector<8x128xf32>
    %c0_294 = arith.constant 0 : index
    %c0_295 = arith.constant 0 : index
    %c0_296 = arith.constant 0 : index
    %371 = vector.load %arg15[%c0_294, %c0_295, %c0_296] : memref<9x3x8xf32, #tpu.memory_space<vmem>>, vector<1x3x8xf32>
    %372 = vector.shape_cast %371 : vector<1x3x8xf32> to vector<3x8xf32>
    %cst_297 = arith.constant dense<0.000000e+00> : vector<3x128xf32>
    %373 = tpu.matmul %372, %370, %cst_297 {dimension_numbers = #tpu.dot_dimension_numbers<[1], [0], [0], [1], [0, 0, 1, 1], [], []>} : vector<3x8xf32>, vector<8x128xf32>, vector<3x128xf32> -> vector<3x128xf32>
    %c0_298 = arith.constant 0 : index
    %c0_299 = arith.constant 0 : index
    %c0_300 = arith.constant 0 : index
    %374 = vector.load %arg16[%c0_298, %c0_299, %c0_300] : memref<9x128x128xf32, #tpu.memory_space<vmem>>, vector<1x128x128xf32>
    %375 = vector.shape_cast %374 : vector<1x128x128xf32> to vector<128x128xf32>
    %cst_301 = arith.constant dense<0.000000e+00> : vector<3x128xf32>
    %376 = tpu.matmul %373, %375, %cst_301 {dimension_numbers = #tpu.dot_dimension_numbers<[1], [0], [0], [1], [0, 0, 1, 1], [], []>} : vector<3x128xf32>, vector<128x128xf32>, vector<3x128xf32> -> vector<3x128xf32>
    %c1_302 = arith.constant 1 : index
    %c0_303 = arith.constant 0 : index
    %c0_304 = arith.constant 0 : index
    %377 = vector.load %arg15[%c1_302, %c0_303, %c0_304] : memref<9x3x8xf32, #tpu.memory_space<vmem>>, vector<1x3x8xf32>
    %378 = vector.shape_cast %377 : vector<1x3x8xf32> to vector<3x8xf32>
    %cst_305 = arith.constant dense<0.000000e+00> : vector<3x128xf32>
    %379 = tpu.matmul %378, %370, %cst_305 {dimension_numbers = #tpu.dot_dimension_numbers<[1], [0], [0], [1], [0, 0, 1, 1], [], []>} : vector<3x8xf32>, vector<8x128xf32>, vector<3x128xf32> -> vector<3x128xf32>
    %c1_306 = arith.constant 1 : index
    %c0_307 = arith.constant 0 : index
    %c0_308 = arith.constant 0 : index
    %380 = vector.load %arg16[%c1_306, %c0_307, %c0_308] : memref<9x128x128xf32, #tpu.memory_space<vmem>>, vector<1x128x128xf32>
    %381 = vector.shape_cast %380 : vector<1x128x128xf32> to vector<128x128xf32>
    %cst_309 = arith.constant dense<0.000000e+00> : vector<3x128xf32>
    %382 = tpu.matmul %379, %381, %cst_309 {dimension_numbers = #tpu.dot_dimension_numbers<[1], [0], [0], [1], [0, 0, 1, 1], [], []>} : vector<3x128xf32>, vector<128x128xf32>, vector<3x128xf32> -> vector<3x128xf32>
    %383 = arith.addf %376, %382 : vector<3x128xf32>
    %c2_310 = arith.constant 2 : index
    %c0_311 = arith.constant 0 : index
    %c0_312 = arith.constant 0 : index
    %384 = vector.load %arg15[%c2_310, %c0_311, %c0_312] : memref<9x3x8xf32, #tpu.memory_space<vmem>>, vector<1x3x8xf32>
    %385 = vector.shape_cast %384 : vector<1x3x8xf32> to vector<3x8xf32>
    %cst_313 = arith.constant dense<0.000000e+00> : vector<3x128xf32>
    %386 = tpu.matmul %385, %370, %cst_313 {dimension_numbers = #tpu.dot_dimension_numbers<[1], [0], [0], [1], [0, 0, 1, 1], [], []>} : vector<3x8xf32>, vector<8x128xf32>, vector<3x128xf32> -> vector<3x128xf32>
    %c2_314 = arith.constant 2 : index
    %c0_315 = arith.constant 0 : index
    %c0_316 = arith.constant 0 : index
    %387 = vector.load %arg16[%c2_314, %c0_315, %c0_316] : memref<9x128x128xf32, #tpu.memory_space<vmem>>, vector<1x128x128xf32>
    %388 = vector.shape_cast %387 : vector<1x128x128xf32> to vector<128x128xf32>
    %cst_317 = arith.constant dense<0.000000e+00> : vector<3x128xf32>
    %389 = tpu.matmul %386, %388, %cst_317 {dimension_numbers = #tpu.dot_dimension_numbers<[1], [0], [0], [1], [0, 0, 1, 1], [], []>} : vector<3x128xf32>, vector<128x128xf32>, vector<3x128xf32> -> vector<3x128xf32>
    %390 = arith.addf %383, %389 : vector<3x128xf32>
    %c3_318 = arith.constant 3 : index
    %c0_319 = arith.constant 0 : index
    %c0_320 = arith.constant 0 : index
    %391 = vector.load %arg15[%c3_318, %c0_319, %c0_320] : memref<9x3x8xf32, #tpu.memory_space<vmem>>, vector<1x3x8xf32>
    %392 = vector.shape_cast %391 : vector<1x3x8xf32> to vector<3x8xf32>
    %cst_321 = arith.constant dense<0.000000e+00> : vector<3x128xf32>
    %393 = tpu.matmul %392, %370, %cst_321 {dimension_numbers = #tpu.dot_dimension_numbers<[1], [0], [0], [1], [0, 0, 1, 1], [], []>} : vector<3x8xf32>, vector<8x128xf32>, vector<3x128xf32> -> vector<3x128xf32>
    %c3_322 = arith.constant 3 : index
    %c0_323 = arith.constant 0 : index
    %c0_324 = arith.constant 0 : index
    %394 = vector.load %arg16[%c3_322, %c0_323, %c0_324] : memref<9x128x128xf32, #tpu.memory_space<vmem>>, vector<1x128x128xf32>
    %395 = vector.shape_cast %394 : vector<1x128x128xf32> to vector<128x128xf32>
    %cst_325 = arith.constant dense<0.000000e+00> : vector<3x128xf32>
    %396 = tpu.matmul %393, %395, %cst_325 {dimension_numbers = #tpu.dot_dimension_numbers<[1], [0], [0], [1], [0, 0, 1, 1], [], []>} : vector<3x128xf32>, vector<128x128xf32>, vector<3x128xf32> -> vector<3x128xf32>
    %397 = arith.addf %390, %396 : vector<3x128xf32>
    %c4_326 = arith.constant 4 : index
    %c0_327 = arith.constant 0 : index
    %c0_328 = arith.constant 0 : index
    %398 = vector.load %arg15[%c4_326, %c0_327, %c0_328] : memref<9x3x8xf32, #tpu.memory_space<vmem>>, vector<1x3x8xf32>
    %399 = vector.shape_cast %398 : vector<1x3x8xf32> to vector<3x8xf32>
    %cst_329 = arith.constant dense<0.000000e+00> : vector<3x128xf32>
    %400 = tpu.matmul %399, %370, %cst_329 {dimension_numbers = #tpu.dot_dimension_numbers<[1], [0], [0], [1], [0, 0, 1, 1], [], []>} : vector<3x8xf32>, vector<8x128xf32>, vector<3x128xf32> -> vector<3x128xf32>
    %c4_330 = arith.constant 4 : index
    %c0_331 = arith.constant 0 : index
    %c0_332 = arith.constant 0 : index
    %401 = vector.load %arg16[%c4_330, %c0_331, %c0_332] : memref<9x128x128xf32, #tpu.memory_space<vmem>>, vector<1x128x128xf32>
    %402 = vector.shape_cast %401 : vector<1x128x128xf32> to vector<128x128xf32>
    %cst_333 = arith.constant dense<0.000000e+00> : vector<3x128xf32>
    %403 = tpu.matmul %400, %402, %cst_333 {dimension_numbers = #tpu.dot_dimension_numbers<[1], [0], [0], [1], [0, 0, 1, 1], [], []>} : vector<3x128xf32>, vector<128x128xf32>, vector<3x128xf32> -> vector<3x128xf32>
    %404 = arith.addf %397, %403 : vector<3x128xf32>
    %c5_334 = arith.constant 5 : index
    %c0_335 = arith.constant 0 : index
    %c0_336 = arith.constant 0 : index
    %405 = vector.load %arg15[%c5_334, %c0_335, %c0_336] : memref<9x3x8xf32, #tpu.memory_space<vmem>>, vector<1x3x8xf32>
    %406 = vector.shape_cast %405 : vector<1x3x8xf32> to vector<3x8xf32>
    %cst_337 = arith.constant dense<0.000000e+00> : vector<3x128xf32>
    %407 = tpu.matmul %406, %370, %cst_337 {dimension_numbers = #tpu.dot_dimension_numbers<[1], [0], [0], [1], [0, 0, 1, 1], [], []>} : vector<3x8xf32>, vector<8x128xf32>, vector<3x128xf32> -> vector<3x128xf32>
    %c5_338 = arith.constant 5 : index
    %c0_339 = arith.constant 0 : index
    %c0_340 = arith.constant 0 : index
    %408 = vector.load %arg16[%c5_338, %c0_339, %c0_340] : memref<9x128x128xf32, #tpu.memory_space<vmem>>, vector<1x128x128xf32>
    %409 = vector.shape_cast %408 : vector<1x128x128xf32> to vector<128x128xf32>
    %cst_341 = arith.constant dense<0.000000e+00> : vector<3x128xf32>
    %410 = tpu.matmul %407, %409, %cst_341 {dimension_numbers = #tpu.dot_dimension_numbers<[1], [0], [0], [1], [0, 0, 1, 1], [], []>} : vector<3x128xf32>, vector<128x128xf32>, vector<3x128xf32> -> vector<3x128xf32>
    %411 = arith.addf %404, %410 : vector<3x128xf32>
    %c6_342 = arith.constant 6 : index
    %c0_343 = arith.constant 0 : index
    %c0_344 = arith.constant 0 : index
    %412 = vector.load %arg15[%c6_342, %c0_343, %c0_344] : memref<9x3x8xf32, #tpu.memory_space<vmem>>, vector<1x3x8xf32>
    %413 = vector.shape_cast %412 : vector<1x3x8xf32> to vector<3x8xf32>
    %cst_345 = arith.constant dense<0.000000e+00> : vector<3x128xf32>
    %414 = tpu.matmul %413, %370, %cst_345 {dimension_numbers = #tpu.dot_dimension_numbers<[1], [0], [0], [1], [0, 0, 1, 1], [], []>} : vector<3x8xf32>, vector<8x128xf32>, vector<3x128xf32> -> vector<3x128xf32>
    %c6_346 = arith.constant 6 : index
    %c0_347 = arith.constant 0 : index
    %c0_348 = arith.constant 0 : index
    %415 = vector.load %arg16[%c6_346, %c0_347, %c0_348] : memref<9x128x128xf32, #tpu.memory_space<vmem>>, vector<1x128x128xf32>
    %416 = vector.shape_cast %415 : vector<1x128x128xf32> to vector<128x128xf32>
    %cst_349 = arith.constant dense<0.000000e+00> : vector<3x128xf32>
    %417 = tpu.matmul %414, %416, %cst_349 {dimension_numbers = #tpu.dot_dimension_numbers<[1], [0], [0], [1], [0, 0, 1, 1], [], []>} : vector<3x128xf32>, vector<128x128xf32>, vector<3x128xf32> -> vector<3x128xf32>
    %418 = arith.addf %411, %417 : vector<3x128xf32>
    %c7_350 = arith.constant 7 : index
    %c0_351 = arith.constant 0 : index
    %c0_352 = arith.constant 0 : index
    %419 = vector.load %arg15[%c7_350, %c0_351, %c0_352] : memref<9x3x8xf32, #tpu.memory_space<vmem>>, vector<1x3x8xf32>
    %420 = vector.shape_cast %419 : vector<1x3x8xf32> to vector<3x8xf32>
    %cst_353 = arith.constant dense<0.000000e+00> : vector<3x128xf32>
    %421 = tpu.matmul %420, %370, %cst_353 {dimension_numbers = #tpu.dot_dimension_numbers<[1], [0], [0], [1], [0, 0, 1, 1], [], []>} : vector<3x8xf32>, vector<8x128xf32>, vector<3x128xf32> -> vector<3x128xf32>
    %c7_354 = arith.constant 7 : index
    %c0_355 = arith.constant 0 : index
    %c0_356 = arith.constant 0 : index
    %422 = vector.load %arg16[%c7_354, %c0_355, %c0_356] : memref<9x128x128xf32, #tpu.memory_space<vmem>>, vector<1x128x128xf32>
    %423 = vector.shape_cast %422 : vector<1x128x128xf32> to vector<128x128xf32>
    %cst_357 = arith.constant dense<0.000000e+00> : vector<3x128xf32>
    %424 = tpu.matmul %421, %423, %cst_357 {dimension_numbers = #tpu.dot_dimension_numbers<[1], [0], [0], [1], [0, 0, 1, 1], [], []>} : vector<3x128xf32>, vector<128x128xf32>, vector<3x128xf32> -> vector<3x128xf32>
    %425 = arith.addf %418, %424 : vector<3x128xf32>
    %c8_358 = arith.constant 8 : index
    %c0_359 = arith.constant 0 : index
    %c0_360 = arith.constant 0 : index
    %426 = vector.load %arg15[%c8_358, %c0_359, %c0_360] : memref<9x3x8xf32, #tpu.memory_space<vmem>>, vector<1x3x8xf32>
    %427 = vector.shape_cast %426 : vector<1x3x8xf32> to vector<3x8xf32>
    %cst_361 = arith.constant dense<0.000000e+00> : vector<3x128xf32>
    %428 = tpu.matmul %427, %370, %cst_361 {dimension_numbers = #tpu.dot_dimension_numbers<[1], [0], [0], [1], [0, 0, 1, 1], [], []>} : vector<3x8xf32>, vector<8x128xf32>, vector<3x128xf32> -> vector<3x128xf32>
    %c8_362 = arith.constant 8 : index
    %c0_363 = arith.constant 0 : index
    %c0_364 = arith.constant 0 : index
    %429 = vector.load %arg16[%c8_362, %c0_363, %c0_364] : memref<9x128x128xf32, #tpu.memory_space<vmem>>, vector<1x128x128xf32>
    %430 = vector.shape_cast %429 : vector<1x128x128xf32> to vector<128x128xf32>
    %cst_365 = arith.constant dense<0.000000e+00> : vector<3x128xf32>
    %431 = tpu.matmul %428, %430, %cst_365 {dimension_numbers = #tpu.dot_dimension_numbers<[1], [0], [0], [1], [0, 0, 1, 1], [], []>} : vector<3x128xf32>, vector<128x128xf32>, vector<3x128xf32> -> vector<3x128xf32>
    %432 = arith.addf %425, %431 : vector<3x128xf32>
    %433 = math.tanh %432 : vector<3x128xf32>
    %cst_366 = arith.constant 5.000000e-01 : f32
    %434 = vector.broadcast %cst_366 : f32 to vector<3x128xf32>
    %435 = arith.mulf %434, %433 : vector<3x128xf32>
    %c0_367 = arith.constant 0 : index
    %c0_368 = arith.constant 0 : index
    %436 = vector.load %arg18[%c0_367, %c0_368] : memref<3x128xf32, #tpu.memory_space<vmem>>, vector<3x128xf32>
    tpu.vector_store %arg18[%c0_367, %c0_368], %435 {strides = array<i32>} : memref<3x128xf32, #tpu.memory_space<vmem>>, vector<3x128xf32>,
    return
  }
}

</mosaic_0001>

<bundles_post_ra>
// kernel: squeeze.101
= control target key start
LH: loop header
LB: loop body
LE: loop exit
PB: predicated region body
PF: predicated region fallthrough
CT: control target
= control target key end

     0   :  { %vm3_vm0 = vcmask 15360   ;;  %s553_s12 = smov 126   ;;  %s555_s14 = smov 122   ;;  %s983_s0 = inlined_call_operand.vmem [shape: f32[1,3,16,16], index: 0, kind: input, shape index: {}]   ;;  %s984_s1 = inlined_call_operand.vmem [shape: f32[3,8,2,8,2], index: 1, kind: output, shape index: {}]  }
   0x1   :  { %v573_v0 = vld [vmem:[%s983_s0 + $0x10] sm:$0xff]   ;;  %v41_v1 = vld [vmem:[%s983_s0] sm:$0xff]   ;;  %v435_v2 = vld [vmem:[%s983_s0 + $0x18] sm:$0xff]   ;;  %s556_s15 = smov 120   ;;  %s557_s16 = smov 118  }
   0x2   :  { %60 = vrot.lane.b32.xlu1 %v573_v0, %s553_s12  ;;  %42 = vrot.lane.b32.xlu0 %v41_v1, %s553_s12  ;;  %v429_v3 = vld [vmem:[%s983_s0 + $0x8] sm:$0xff]   ;;  %4 = vst.msk [vmem:[%s984_s1] ss:$8 sm:$0xf] %vm3_vm0, %v41_v1   ;;  %s558_s17 = smov 116   ;;  %s559_s18 = smov 114  }
   0x3   :  { %v441_v4 = vld [vmem:[%s983_s0 + $0x28] sm:$0xff]   ;;  %5 = vst.msk [vmem:[%s984_s1] ss:$8 sm:$0xf0] %vm3_vm0, %v41_v1   ;;  %v438_v5 = vld [vmem:[%s983_s0 + $0x20] sm:$0xff]  }
   0x4   :  { %416 = vst.msk [vmem:[%s984_s1 + $0x80] ss:$8 sm:$0xf] %vm3_vm0, %v573_v0   ;;  %417 = vst.msk [vmem:[%s984_s1 + $0x80] ss:$8 sm:$0xf0] %vm3_vm0, %v573_v0  }
   0x5   :  { %419 = vst.msk [vmem:[%s984_s1 + $0xc0] ss:$8 sm:$0xf] %vm3_vm0, %v435_v2   ;;  %420 = vst.msk [vmem:[%s984_s1 + $0xc0] ss:$8 sm:$0xf0] %vm3_vm0, %v435_v2  }
   0x6   :  { %413 = vst.msk [vmem:[%s984_s1 + $0x40] ss:$8 sm:$0xf] %vm3_vm0, %v429_v3   ;;  %414 = vst.msk [vmem:[%s984_s1 + $0x40] ss:$8 sm:$0xf0] %vm3_vm0, %v429_v3   ;;  %69 = vrot.lane.b32.xlu1 %v435_v2, %s553_s12  ;;  %51 = vrot.lane.b32.xlu0 %v429_v3, %s553_s12 }
   0x7   :  { %425 = vst.msk [vmem:[%s984_s1 + $0x140] ss:$8 sm:$0xf] %vm3_vm0, %v441_v4   ;;  %426 = vst.msk [vmem:[%s984_s1 + $0x140] ss:$8 sm:$0xf0] %vm3_vm0, %v441_v4  }
   0x8   :  { %422 = vst.msk [vmem:[%s984_s1 + $0x100] ss:$8 sm:$0xf] %vm3_vm0, %v438_v5   ;;  %423 = vst.msk [vmem:[%s984_s1 + $0x100] ss:$8 sm:$0xf0] %vm3_vm0, %v438_v5  }
   0xa   :  { %87 = vrot.lane.b32.xlu1 %v441_v4, %s553_s12  ;;  %78 = vrot.lane.b32.xlu0 %v438_v5, %s553_s12  ;;  %s554_s12 = smov 124  }
   0xe   :  { %104 = vrot.lane.b32.xlu1 %v429_v3, %s554_s12  ;;  %95 = vrot.lane.b32.xlu0 %v41_v1, %s554_s12 }
  0x12   :  { %122 = vrot.lane.b32.xlu1 %v435_v2, %s554_s12  ;;  %113 = vrot.lane.b32.xlu0 %v573_v0, %s554_s12 }
  0x16   :  { %140 = vrot.lane.b32.xlu1 %v441_v4, %s554_s12  ;;  %131 = vrot.lane.b32.xlu0 %v438_v5, %s554_s12 }
  0x1a   :  { %157 = vrot.lane.b32.xlu1 %v429_v3, %s555_s14  ;;  %148 = vrot.lane.b32.xlu0 %v41_v1, %s555_s14 }
  0x1e   :  { %175 = vrot.lane.b32.xlu1 %v435_v2, %s555_s14  ;;  %166 = vrot.lane.b32.xlu0 %v573_v0, %s555_s14 }
  0x22   :  { %193 = vrot.lane.b32.xlu1 %v441_v4, %s555_s14  ;;  %184 = vrot.lane.b32.xlu0 %v438_v5, %s555_s14 }
  0x26   :  { %210 = vrot.lane.b32.xlu1 %v429_v3, %s556_s15  ;;  %201 = vrot.lane.b32.xlu0 %v41_v1, %s556_s15 }
  0x2a   :  { %228 = vrot.lane.b32.xlu1 %v435_v2, %s556_s15  ;;  %219 = vrot.lane.b32.xlu0 %v573_v0, %s556_s15 }
  0x2e   :  { %246 = vrot.lane.b32.xlu1 %v441_v4, %s556_s15  ;;  %237 = vrot.lane.b32.xlu0 %v438_v5, %s556_s15 }
  0x32   :  { %263 = vrot.lane.b32.xlu1 %v429_v3, %s557_s16  ;;  %254 = vrot.lane.b32.xlu0 %v41_v1, %s557_s16 }
  0x36   :  { %281 = vrot.lane.b32.xlu1 %v435_v2, %s557_s16  ;;  %272 = vrot.lane.b32.xlu0 %v573_v0, %s557_s16 }
  0x3a   :  { %299 = vrot.lane.b32.xlu1 %v441_v4, %s557_s16  ;;  %290 = vrot.lane.b32.xlu0 %v438_v5, %s557_s16 }
  0x3e   :  { %316 = vrot.lane.b32.xlu1 %v429_v3, %s558_s17  ;;  %307 = vrot.lane.b32.xlu0 %v41_v1, %s558_s17 }
  0x42   :  { %334 = vrot.lane.b32.xlu1 %v435_v2, %s558_s17  ;;  %325 = vrot.lane.b32.xlu0 %v573_v0, %s558_s17 }
  0x46   :  { %352 = vrot.lane.b32.xlu1 %v441_v4, %s558_s17  ;;  %343 = vrot.lane.b32.xlu0 %v438_v5, %s558_s17 }
  0x4a   :  { %369 = vrot.lane.b32.xlu1 %v429_v3, %s559_s18  ;;  %360 = vrot.lane.b32.xlu0 %v41_v1, %s559_s18 }
  0x4e   :  { %387 = vrot.lane.b32.xlu1 %v435_v2, %s559_s18  ;;  %378 = vrot.lane.b32.xlu0 %v573_v0, %s559_s18 }
  0x52   :  { %405 = vrot.lane.b32.xlu1 %v441_v4, %s559_s18  ;;  %396 = vrot.lane.b32.xlu0 %v438_v5, %s559_s18 }
  0x74   :  { %v61_v6 = vpop.permute.xlu1 %60   ;;  %v43_v7 = vpop.permute.xlu0 %42  }
  0x75   :  { %433 = vst.msk [vmem:[%s984_s1 + $0x81] ss:$8 sm:$0xf] %vm3_vm0, %v61_v6   ;;  %434 = vst.msk [vmem:[%s984_s1 + $0x81] ss:$8 sm:$0xf0] %vm3_vm0, %v61_v6  }
  0x76   :  { %427 = vst.msk [vmem:[%s984_s1 + $0x1] ss:$8 sm:$0xf] %vm3_vm0, %v43_v7   ;;  %428 = vst.msk [vmem:[%s984_s1 + $0x1] ss:$8 sm:$0xf0] %vm3_vm0, %v43_v7  }
  0x78   :  { %v70_v8 = vpop.permute.xlu1 %69   ;;  %v52_v9 = vpop.permute.xlu0 %51  }
  0x79   :  { %436 = vst.msk [vmem:[%s984_s1 + $0xc1] ss:$8 sm:$0xf] %vm3_vm0, %v70_v8   ;;  %437 = vst.msk [vmem:[%s984_s1 + $0xc1] ss:$8 sm:$0xf0] %vm3_vm0, %v70_v8  }
  0x7a   :  { %430 = vst.msk [vmem:[%s984_s1 + $0x41] ss:$8 sm:$0xf] %vm3_vm0, %v52_v9   ;;  %431 = vst.msk [vmem:[%s984_s1 + $0x41] ss:$8 sm:$0xf0] %vm3_vm0, %v52_v9  }
  0x7c   :  { %v88_v10 = vpop.permute.xlu1 %87   ;;  %v79_v11 = vpop.permute.xlu0 %78  }
  0x7d   :  { %442 = vst.msk [vmem:[%s984_s1 + $0x141] ss:$8 sm:$0xf] %vm3_vm0, %v88_v10   ;;  %443 = vst.msk [vmem:[%s984_s1 + $0x141] ss:$8 sm:$0xf0] %vm3_vm0, %v88_v10  }
  0x7e   :  { %439 = vst.msk [vmem:[%s984_s1 + $0x101] ss:$8 sm:$0xf] %vm3_vm0, %v79_v11   ;;  %440 = vst.msk [vmem:[%s984_s1 + $0x101] ss:$8 sm:$0xf0] %vm3_vm0, %v79_v11  }
  0x80   :  { %v105_v12 = vpop.permute.xlu1 %104   ;;  %v96_v13 = vpop.permute.xlu0 %95  }
  0x81   :  { %447 = vst.msk [vmem:[%s984_s1 + $0x42] ss:$8 sm:$0xf] %vm3_vm0, %v105_v12   ;;  %448 = vst.msk [vmem:[%s984_s1 + $0x42] ss:$8 sm:$0xf0] %vm3_vm0, %v105_v12  }
  0x82   :  { %444 = vst.msk [vmem:[%s984_s1 + $0x2] ss:$8 sm:$0xf] %vm3_vm0, %v96_v13   ;;  %445 = vst.msk [vmem:[%s984_s1 + $0x2] ss:$8 sm:$0xf0] %vm3_vm0, %v96_v13  }
  0x84   :  { %v123_v14 = vpop.permute.xlu1 %122   ;;  %v114_v15 = vpop.permute.xlu0 %113  }
  0x85   :  { %453 = vst.msk [vmem:[%s984_s1 + $0xc2] ss:$8 sm:$0xf] %vm3_vm0, %v123_v14   ;;  %454 = vst.msk [vmem:[%s984_s1 + $0xc2] ss:$8 sm:$0xf0] %vm3_vm0, %v123_v14  }
  0x86   :  { %450 = vst.msk [vmem:[%s984_s1 + $0x82] ss:$8 sm:$0xf] %vm3_vm0, %v114_v15   ;;  %451 = vst.msk [vmem:[%s984_s1 + $0x82] ss:$8 sm:$0xf0] %vm3_vm0, %v114_v15  }
  0x88   :  { %v141_v16 = vpop.permute.xlu1 %140   ;;  %v132_v17 = vpop.permute.xlu0 %131  }
  0x89   :  { %459 = vst.msk [vmem:[%s984_s1 + $0x142] ss:$8 sm:$0xf] %vm3_vm0, %v141_v16   ;;  %460 = vst.msk [vmem:[%s984_s1 + $0x142] ss:$8 sm:$0xf0] %vm3_vm0, %v141_v16  }
  0x8a   :  { %456 = vst.msk [vmem:[%s984_s1 + $0x102] ss:$8 sm:$0xf] %vm3_vm0, %v132_v17   ;;  %457 = vst.msk [vmem:[%s984_s1 + $0x102] ss:$8 sm:$0xf0] %vm3_vm0, %v132_v17  }
  0x8c   :  { %v158_v18 = vpop.permute.xlu1 %157   ;;  %v149_v19 = vpop.permute.xlu0 %148  }
  0x8d   :  { %464 = vst.msk [vmem:[%s984_s1 + $0x43] ss:$8 sm:$0xf] %vm3_vm0, %v158_v18   ;;  %465 = vst.msk [vmem:[%s984_s1 + $0x43] ss:$8 sm:$0xf0] %vm3_vm0, %v158_v18  }
  0x8e   :  { %461 = vst.msk [vmem:[%s984_s1 + $0x3] ss:$8 sm:$0xf] %vm3_vm0, %v149_v19   ;;  %462 = vst.msk [vmem:[%s984_s1 + $0x3] ss:$8 sm:$0xf0] %vm3_vm0, %v149_v19  }
  0x90   :  { %v176_v20 = vpop.permute.xlu1 %175   ;;  %v167_v21 = vpop.permute.xlu0 %166  }
  0x91   :  { %470 = vst.msk [vmem:[%s984_s1 + $0xc3] ss:$8 sm:$0xf] %vm3_vm0, %v176_v20   ;;  %471 = vst.msk [vmem:[%s984_s1 + $0xc3] ss:$8 sm:$0xf0] %vm3_vm0, %v176_v20  }
  0x92   :  { %467 = vst.msk [vmem:[%s984_s1 + $0x83] ss:$8 sm:$0xf] %vm3_vm0, %v167_v21   ;;  %468 = vst.msk [vmem:[%s984_s1 + $0x83] ss:$8 sm:$0xf0] %vm3_vm0, %v167_v21  }
  0x94   :  { %v194_v22 = vpop.permute.xlu1 %193   ;;  %v185_v23 = vpop.permute.xlu0 %184  }
  0x95   :  { %476 = vst.msk [vmem:[%s984_s1 + $0x143] ss:$8 sm:$0xf] %vm3_vm0, %v194_v22   ;;  %477 = vst.msk [vmem:[%s984_s1 + $0x143] ss:$8 sm:$0xf0] %vm3_vm0, %v194_v22  }
  0x96   :  { %473 = vst.msk [vmem:[%s984_s1 + $0x103] ss:$8 sm:$0xf] %vm3_vm0, %v185_v23   ;;  %474 = vst.msk [vmem:[%s984_s1 + $0x103] ss:$8 sm:$0xf0] %vm3_vm0, %v185_v23  }
  0x98   :  { %v211_v24 = vpop.permute.xlu1 %210   ;;  %v202_v25 = vpop.permute.xlu0 %201  }
  0x99   :  { %481 = vst.msk [vmem:[%s984_s1 + $0x44] ss:$8 sm:$0xf] %vm3_vm0, %v211_v24   ;;  %482 = vst.msk [vmem:[%s984_s1 + $0x44] ss:$8 sm:$0xf0] %vm3_vm0, %v211_v24  }
  0x9a   :  { %478 = vst.msk [vmem:[%s984_s1 + $0x4] ss:$8 sm:$0xf] %vm3_vm0, %v202_v25   ;;  %479 = vst.msk [vmem:[%s984_s1 + $0x4] ss:$8 sm:$0xf0] %vm3_vm0, %v202_v25  }
  0x9c   :  { %v229_v26 = vpop.permute.xlu1 %228   ;;  %v220_v27 = vpop.permute.xlu0 %219  }
  0x9d   :  { %487 = vst.msk [vmem:[%s984_s1 + $0xc4] ss:$8 sm:$0xf] %vm3_vm0, %v229_v26   ;;  %488 = vst.msk [vmem:[%s984_s1 + $0xc4] ss:$8 sm:$0xf0] %vm3_vm0, %v229_v26  }
  0x9e   :  { %484 = vst.msk [vmem:[%s984_s1 + $0x84] ss:$8 sm:$0xf] %vm3_vm0, %v220_v27   ;;  %485 = vst.msk [vmem:[%s984_s1 + $0x84] ss:$8 sm:$0xf0] %vm3_vm0, %v220_v27  }
  0xa0   :  { %v247_v28 = vpop.permute.xlu1 %246   ;;  %v238_v29 = vpop.permute.xlu0 %237  }
  0xa1   :  { %493 = vst.msk [vmem:[%s984_s1 + $0x144] ss:$8 sm:$0xf] %vm3_vm0, %v247_v28   ;;  %494 = vst.msk [vmem:[%s984_s1 + $0x144] ss:$8 sm:$0xf0] %vm3_vm0, %v247_v28  }
  0xa2   :  { %490 = vst.msk [vmem:[%s984_s1 + $0x104] ss:$8 sm:$0xf] %vm3_vm0, %v238_v29   ;;  %491 = vst.msk [vmem:[%s984_s1 + $0x104] ss:$8 sm:$0xf0] %vm3_vm0, %v238_v29  }
  0xa4   :  { %v264_v30 = vpop.permute.xlu1 %263   ;;  %v255_v31 = vpop.permute.xlu0 %254  }
  0xa5   :  { %498 = vst.msk [vmem:[%s984_s1 + $0x45] ss:$8 sm:$0xf] %vm3_vm0, %v264_v30   ;;  %499 = vst.msk [vmem:[%s984_s1 + $0x45] ss:$8 sm:$0xf0] %vm3_vm0, %v264_v30  }
  0xa6   :  { %495 = vst.msk [vmem:[%s984_s1 + $0x5] ss:$8 sm:$0xf] %vm3_vm0, %v255_v31   ;;  %496 = vst.msk [vmem:[%s984_s1 + $0x5] ss:$8 sm:$0xf0] %vm3_vm0, %v255_v31  }
  0xa8   :  { %v282_v32 = vpop.permute.xlu1 %281   ;;  %v273_v33 = vpop.permute.xlu0 %272  }
  0xa9   :  { %504 = vst.msk [vmem:[%s984_s1 + $0xc5] ss:$8 sm:$0xf] %vm3_vm0, %v282_v32   ;;  %505 = vst.msk [vmem:[%s984_s1 + $0xc5] ss:$8 sm:$0xf0] %vm3_vm0, %v282_v32  }
  0xaa   :  { %501 = vst.msk [vmem:[%s984_s1 + $0x85] ss:$8 sm:$0xf] %vm3_vm0, %v273_v33   ;;  %502 = vst.msk [vmem:[%s984_s1 + $0x85] ss:$8 sm:$0xf0] %vm3_vm0, %v273_v33  }
  0xac   :  { %v300_v34 = vpop.permute.xlu1 %299   ;;  %v291_v35 = vpop.permute.xlu0 %290  }
  0xad   :  { %510 = vst.msk [vmem:[%s984_s1 + $0x145] ss:$8 sm:$0xf] %vm3_vm0, %v300_v34   ;;  %511 = vst.msk [vmem:[%s984_s1 + $0x145] ss:$8 sm:$0xf0] %vm3_vm0, %v300_v34  }
  0xae   :  { %507 = vst.msk [vmem:[%s984_s1 + $0x105] ss:$8 sm:$0xf] %vm3_vm0, %v291_v35   ;;  %508 = vst.msk [vmem:[%s984_s1 + $0x105] ss:$8 sm:$0xf0] %vm3_vm0, %v291_v35  }
  0xb0   :  { %v317_v36 = vpop.permute.xlu1 %316   ;;  %v308_v37 = vpop.permute.xlu0 %307  }
  0xb1   :  { %515 = vst.msk [vmem:[%s984_s1 + $0x46] ss:$8 sm:$0xf] %vm3_vm0, %v317_v36   ;;  %516 = vst.msk [vmem:[%s984_s1 + $0x46] ss:$8 sm:$0xf0] %vm3_vm0, %v317_v36  }
  0xb2   :  { %512 = vst.msk [vmem:[%s984_s1 + $0x6] ss:$8 sm:$0xf] %vm3_vm0, %v308_v37   ;;  %513 = vst.msk [vmem:[%s984_s1 + $0x6] ss:$8 sm:$0xf0] %vm3_vm0, %v308_v37  }
  0xb4   :  { %v335_v38 = vpop.permute.xlu1 %334   ;;  %v326_v39 = vpop.permute.xlu0 %325  }
  0xb5   :  { %521 = vst.msk [vmem:[%s984_s1 + $0xc6] ss:$8 sm:$0xf] %vm3_vm0, %v335_v38   ;;  %522 = vst.msk [vmem:[%s984_s1 + $0xc6] ss:$8 sm:$0xf0] %vm3_vm0, %v335_v38  }
  0xb6   :  { %518 = vst.msk [vmem:[%s984_s1 + $0x86] ss:$8 sm:$0xf] %vm3_vm0, %v326_v39   ;;  %519 = vst.msk [vmem:[%s984_s1 + $0x86] ss:$8 sm:$0xf0] %vm3_vm0, %v326_v39  }
  0xb8   :  { %v353_v40 = vpop.permute.xlu1 %352   ;;  %v344_v41 = vpop.permute.xlu0 %343  }
  0xb9   :  { %527 = vst.msk [vmem:[%s984_s1 + $0x146] ss:$8 sm:$0xf] %vm3_vm0, %v353_v40   ;;  %528 = vst.msk [vmem:[%s984_s1 + $0x146] ss:$8 sm:$0xf0] %vm3_vm0, %v353_v40  }
  0xba   :  { %524 = vst.msk [vmem:[%s984_s1 + $0x106] ss:$8 sm:$0xf] %vm3_vm0, %v344_v41   ;;  %525 = vst.msk [vmem:[%s984_s1 + $0x106] ss:$8 sm:$0xf0] %vm3_vm0, %v344_v41  }
  0xbc   :  { %v370_v42 = vpop.permute.xlu1 %369   ;;  %v361_v43 = vpop.permute.xlu0 %360  }
  0xbd   :  { %532 = vst.msk [vmem:[%s984_s1 + $0x47] ss:$8 sm:$0xf] %vm3_vm0, %v370_v42   ;;  %533 = vst.msk [vmem:[%s984_s1 + $0x47] ss:$8 sm:$0xf0] %vm3_vm0, %v370_v42  }
  0xbe   :  { %529 = vst.msk [vmem:[%s984_s1 + $0x7] ss:$8 sm:$0xf] %vm3_vm0, %v361_v43   ;;  %530 = vst.msk [vmem:[%s984_s1 + $0x7] ss:$8 sm:$0xf0] %vm3_vm0, %v361_v43  }
  0xc0   :  { %v388_v44 = vpop.permute.xlu1 %387   ;;  %v379_v45 = vpop.permute.xlu0 %378  }
  0xc1   :  { %538 = vst.msk [vmem:[%s984_s1 + $0xc7] ss:$8 sm:$0xf] %vm3_vm0, %v388_v44   ;;  %539 = vst.msk [vmem:[%s984_s1 + $0xc7] ss:$8 sm:$0xf0] %vm3_vm0, %v388_v44  }
  0xc2   :  { %535 = vst.msk [vmem:[%s984_s1 + $0x87] ss:$8 sm:$0xf] %vm3_vm0, %v379_v45   ;;  %536 = vst.msk [vmem:[%s984_s1 + $0x87] ss:$8 sm:$0xf0] %vm3_vm0, %v379_v45  }
  0xc4   :  { %v406_v46 = vpop.permute.xlu1 %405   ;;  %v397_v47 = vpop.permute.xlu0 %396  }
  0xc5   :  { %544 = vst.msk [vmem:[%s984_s1 + $0x147] ss:$8 sm:$0xf] %vm3_vm0, %v406_v46   ;;  %545 = vst.msk [vmem:[%s984_s1 + $0x147] ss:$8 sm:$0xf0] %vm3_vm0, %v406_v46  }
  0xc6   :  { %541 = vst.msk [vmem:[%s984_s1 + $0x107] ss:$8 sm:$0xf] %vm3_vm0, %v397_v47   ;;  %542 = vst.msk [vmem:[%s984_s1 + $0x107] ss:$8 sm:$0xf0] %vm3_vm0, %v397_v47  }

// kernel: deep_voxels_forward.1
= control target key start
LH: loop header
LB: loop body
LE: loop exit
PB: predicated region body
PF: predicated region fallthrough
CT: control target
= control target key end

     0   :  { %s12301_s0 = inlined_call_operand.vmem [shape: f32[3,64], index: 0, kind: input, shape index: {}]   ;;  %s12302_s1 = inlined_call_operand.vmem [shape: f32[9,8,3], index: 1, kind: input, shape index: {}]   ;;  %s12303_s2 = inlined_call_operand.vmem [shape: f32[9,8,8], index: 2, kind: input, shape index: {}]   ;;  %s12304_s3 = inlined_call_operand.vmem [shape: f32[9,64,64], index: 3, kind: input, shape index: {}]   ;;  %s12305_s4 = inlined_call_operand.hbm [shape: f32[64,64], index: 4, kind: input, shape index: {}]   ;;  %s12306_s5 = inlined_call_operand.vmem [shape: f32[8,64], index: 5, kind: input, shape index: {}]   ;;  %s12307_s6 = inlined_call_operand.vmem [shape: f32[3,64], index: 6, kind: input, shape index: {}]   ;;  %s12308_s7 = inlined_call_operand.vmem [shape: f32[8,8], index: 7, kind: input, shape index: {}]   ;;  %s12309_s8 = inlined_call_operand.vmem [shape: f32[8,8], index: 8, kind: input, shape index: {}]   ;;  %s12310_s9 = inlined_call_operand.vmem [shape: f32[8,8], index: 9, kind: input, shape index: {}]   ;;  %s12311_s10 = inlined_call_operand.vmem [shape: f32[8,3], index: 10, kind: input, shape index: {}]   ;;  %s12312_s11 = inlined_call_operand.vmem [shape: f32[8,8], index: 11, kind: input, shape index: {}]   ;;  %s12313_s12 = inlined_call_operand.vmem [shape: f32[8,64,128], index: 12, kind: input, shape index: {}]   ;;  %s12314_s13 = inlined_call_operand.vmem [shape: f32[8,1], index: 13, kind: input, shape index: {}]   ;;  %s12315_s14 = inlined_call_operand.vmem [shape: f32[9,8,8], index: 14, kind: input, shape index: {}]   ;;  %s12316_s15 = inlined_call_operand.vmem [shape: f32[9,3,8], index: 15, kind: input, shape index: {}]   ;;  %s12317_s16 = inlined_call_operand.vmem [shape: f32[9,128,128], index: 16, kind: input, shape index: {}]   ;;  %s12318_s17 = inlined_call_operand.vmem [shape: f32[8,64], index: 17, kind: output, shape index: {0}]   ;;  %s12319_s18 = inlined_call_operand.vmem [shape: f32[3,128], index: 18, kind: output, shape index: {1}]   ;;  %s12320_s19 = inlined_call_operand.vmem [shape: f32[1,128], index: 19, kind: output, shape index: {2}]  }
   0x1   :  { %12341 = sst [smem:[#allocation20_spill]] %s12301_s0 }
   0x2   :  { %12342 = sst [smem:[#allocation21_spill]] %s12302_s1 }
   0x3   :  { %12343 = sst [smem:[#allocation22_spill]] %s12303_s2 }
   0x4   :  { %12344 = sst [smem:[#allocation23_spill]] %s12304_s3 }
   0x5   :  { %25 = vsyncpa [#allocation3], 0  ;;  %s10090_s0 = smov [#allocation2]   ;;  %s10066_s1 = scalar_lea.hbm %s12305_s4, 1024 }
   0x6   :  { %s39_s30 = sshll.u32 %s10090_s0, 4  ;;  %p10067_p0 = scmp.ne.s32.totalorder %s12305_s4, %s10066_s1  ;;  %s40_s30 = int_to_ptr.vmem [resolvable:$true] %s39_s30 }
   0x7   :  { %p10070_p1 = scmp.lt.u32.totalorder %s10066_s1, %s12305_s4 }
   0x9   :  { %p10072_p2 = pnand %p10070_p1, %p10067_p0 }
   0xb   :  { %10075 = shalt.err (!%p10072_p2)
}
   0xc   :  { %s10076_s25 = scalar_lea.vmem %s40_s30, 1024  ;;  %p10081_p4 = scmp.lt.s32.totalorder %s40_s30, %s40_s30 }
   0xd   :  { %p10077_p3 = scmp.ne.s32.totalorder %s40_s30, %s10076_s25  ;;  %p10082_p5 = scmp.lt.s32.totalorder %s10076_s25, %s10076_s25 }
   0xf   :  { %p10083_p6 = por %p10082_p5, %p10081_p4 }
  0x11   :  { %p10084_p7 = pnand %p10083_p6, %p10077_p3 }
  0x13   :  { %10087 = shalt.err (!%p10084_p7)
}
  0x14   :  { %s10091_s3 = smov 128   ;;  %s10092_s26 = smov 8  }
  0x15   :  { %45 = dma.hbm_to_vmem [thread:$0]  %s12305_s4, 1024, %s40_s30, [#allocation3], %s10091_s3, %s10091_s3, %s10092_s26  }
  0x16   :  { %10088 = dma.done.wait [#allocation3], 1024  }
  0x17   :  { %10089 = vsyncadd [#allocation3], 4294966272  ;;  %v12324_v0 = vmov 0.0   ;;  %vm10094_vm0 = vmmov 0   ;;  %vm79_vm1 = vcmask 1042432   ;;  %vm75_vm2 = vcmask 23552  }
  0x18   :  { %7868 = vmatprep.subr.mxu1 %v12324_v0  ;;  %7870 = vmatprep.mubr.msk.f32.mxu1 %vm10094_vm0, %v12324_v0  ;;  %s12345_s20 = sld [smem:[#allocation20_spill]]  ;;  %s12346_s21 = sld [smem:[#allocation21_spill]]  ;;  %v10095_v7 = vmov 0.0|0.0   ;;  %vm245_vm3 = vcmask 523264   ;;  %vm1500_vm4 = vcmask 64512  }
  0x19   :  { %7863 = vmatprep.subr.mxu0 %v12324_v0  ;;  %7865 = vmatprep.mubr.msk.f32.mxu0 %vm10094_vm0, %v12324_v0  ;;  %s12347_s3 = sld [smem:[#allocation23_spill]]  ;;  %s12348_s4 = sld [smem:[#allocation22_spill]] }
  0x1e   :  { %v73_v1 = vld [vmem:[%s12345_s20] sm:$0x7]  ;;  %v6876_v2 = vld [vmem:[%s12346_s21 + $0x8] sm:$0xff]  ;;  %v6889_v4 = vld [vmem:[%s12346_s21 + $0x10] sm:$0xff] }
  0x1f   :  { %v74_v3 = vld [vmem:[%s12346_s21] sm:$0xff]  ;;  %7869 = vmatpush3.msk.msra.mxu1 %vm79_vm1, %v73_v1  ;;  %7864 = vmatpush3.msk.msra.mxu0 %vm79_vm1, %v73_v1  ;;  %v6880_v6 = vld [vmem:[%s12347_s3 + $0x48] sm:$0xff]  ;;  %v6881_v9 = vld [vmem:[%s12347_s3 + $0x50] sm:$0xff] }
  0x20   :  { %7871 = vmatmul.mubr.msk.f32.vlgmr.msra.gmra.mrb[0].mxu1 %vm75_vm2, %v6876_v2  ;;  %7866 = vmatmul.mubr.msk.f32.vlgmr.msra.gmra.mrb[0].mxu0 %vm75_vm2, %v74_v3  ;;  %v6879_v5 = vld [vmem:[%s12347_s3 + $0x40] sm:$0xff]  ;;  %v6882_v10 = vld [vmem:[%s12347_s3 + $0x58] sm:$0xff]  ;;  %v6884_v14 = vld [vmem:[%s12347_s3 + $0x68] sm:$0xff] }
  0x21   :  { %7911 = vmatprep.subr.mxu1 %v12324_v0  ;;  %7913 = vmatprep.mubr.msk.f32.mxu1 %vm10094_vm0, %v12324_v0  ;;  %v10242_v8 = vpack.c.bf16 %v6880_v6, %v6879_v5  ;;  %v10255_v11 = vpack.c.bf16 %v6882_v10, %v6881_v9  ;;  %v6901_v12 = vld [vmem:[%s12346_s21 + $0x18] sm:$0xff]  ;;  %v6883_v13 = vld [vmem:[%s12347_s3 + $0x60] sm:$0xff]  ;;  %v6885_v17 = vld [vmem:[%s12347_s3 + $0x70] sm:$0xff] }
  0x22   :  { %7912 = vmatpush3.msk.msra.mxu1 %vm79_vm1, %v73_v1  ;;  %9211 = vmatprep.subr.bf16.mxu0 %v10095_v7  ;;  %v10273_v15 = vpack.c.bf16 %v6884_v14, %v6883_v13  ;;  %v6913_v16 = vld [vmem:[%s12346_s21 + $0x20] sm:$0xff]  ;;  %v6886_v18 = vld [vmem:[%s12347_s3 + $0x78] sm:$0xff]  ;;  %v6925_v20 = vld [vmem:[%s12346_s21 + $0x28] sm:$0xff] }
  0x23   :  { %7935 = vmatprep.subr.mxu1 %v12324_v0  ;;  %7889 = vmatprep.mubr.msk.f32.mxu0 %vm10094_vm0, %v12324_v0  ;;  %v10291_v19 = vpack.c.bf16 %v6886_v18, %v6885_v17  ;;  %v6937_v21 = vld [vmem:[%s12346_s21 + $0x30] sm:$0xff]  ;;  %v6949_v22 = vld [vmem:[%s12346_s21 + $0x38] sm:$0xff]  ;;  %v6961_v23 = vld [vmem:[%s12346_s21 + $0x40] sm:$0xff] }
  0x24   :  { %7914 = vmatmul.mubr.msk.f32.vlgmr.msra.gmra.mrb[2].mxu1 %vm75_vm2, %v6889_v4  ;;  %9213 = vmatpush3.bf16.msra.mxu0 %v10242_v8  ;;  %v153_v24 = vld [vmem:[%s12347_s3] sm:$0xff]  ;;  %v154_v25 = vld [vmem:[%s12347_s3 + $0x8] sm:$0xff]  ;;  %v155_v27 = vld [vmem:[%s12347_s3 + $0x10] sm:$0xff] }
  0x25   :  { %7936 = vmatpush3.msk.msra.mxu1 %vm79_vm1, %v73_v1  ;;  %7937 = vmatprep.mubr.msk.f32.mxu1 %vm10094_vm0, %v12324_v0  ;;  %v10336_v26 = vpack.c.bf16 %v154_v25, %v153_v24  ;;  %v156_v28 = vld [vmem:[%s12347_s3 + $0x18] sm:$0xff]  ;;  %v157_v34 = vld [vmem:[%s12347_s3 + $0x20] sm:$0xff]  ;;  %v158_v35 = vld [vmem:[%s12347_s3 + $0x28] sm:$0xff] }
  0x26   :  { %7959 = vmatprep.subr.mxu1 %v12324_v0  ;;  %9214 = vmatprep.subr.bf16.mxu0 %v10095_v7  ;;  %v10346_v33 = vpack.c.bf16 %v156_v28, %v155_v27  ;;  %v10358_v38 = vpack.c.bf16 %v158_v35, %v157_v34  ;;  %v159_v39 = vld [vmem:[%s12347_s3 + $0x30] sm:$0xff]  ;;  %v160_v40 = vld [vmem:[%s12347_s3 + $0x38] sm:$0xff]  ;;  %v6892_v44 = vld [vmem:[%s12347_s3 + $0x80] sm:$0xff] }
  0x27   :  { %v10370_v43 = vpack.c.bf16 %v160_v40, %v159_v39  ;;  %v6893_v45 = vld [vmem:[%s12347_s3 + $0x88] sm:$0xff]  ;;  %v6894_v49 = vld [vmem:[%s12347_s3 + $0x90] sm:$0xff]  ;;  %v6895_v50 = vld [vmem:[%s12347_s3 + $0x98] sm:$0xff] }
  0x28   :  { %7938 = vmatmul.mubr.msk.f32.vlgmr.msra.gmra.mrb[4].mxu1 %vm75_vm2, %v6901_v12  ;;  %9216 = vmatpush3.bf16.msra.mxu0 %v10255_v11  ;;  %v10382_v48 = vpack.c.bf16 %v6893_v45, %v6892_v44  ;;  %v10395_v53 = vpack.c.bf16 %v6895_v50, %v6894_v49  ;;  %v6896_v54 = vld [vmem:[%s12347_s3 + $0xa0] sm:$0xff]  ;;  %v6897_v55 = vld [vmem:[%s12347_s3 + $0xa8] sm:$0xff]  ;;  %v6898_v59 = vld [vmem:[%s12347_s3 + $0xb0] sm:$0xff] }
  0x29   :  { %7960 = vmatpush3.msk.msra.mxu1 %vm79_vm1, %v73_v1  ;;  %7961 = vmatprep.mubr.msk.f32.mxu1 %vm10094_vm0, %v12324_v0  ;;  %v10409_v58 = vpack.c.bf16 %v6897_v55, %v6896_v54  ;;  %v6899_v60 = vld [vmem:[%s12347_s3 + $0xb8] sm:$0xff]  ;;  %v6905_v2 = vld [vmem:[%s12347_s3 + $0xc8] sm:$0xff]  ;;  %v6906_v6 = vld [vmem:[%s12347_s3 + $0xd0] sm:$0xff] }
  0x2a   :  { %7983 = vmatprep.subr.mxu1 %v12324_v0  ;;  %9217 = vmatprep.subr.bf16.mxu0 %v10095_v7  ;;  %v10421_v63 = vpack.c.bf16 %v6899_v60, %v6898_v59  ;;  %v6907_v9 = vld [vmem:[%s12347_s3 + $0xd8] sm:$0xff]  ;;  %v6908_v12 = vld [vmem:[%s12347_s3 + $0xe0] sm:$0xff]  ;;  %v6909_v13 = vld [vmem:[%s12347_s3 + $0xe8] sm:$0xff] }
  0x2b   :  { %v10444_v10 = vpack.c.bf16 %v6907_v9, %v6906_v6  ;;  %v10456_v14 = vpack.c.bf16 %v6909_v13, %v6908_v12  ;;  %v6911_v17 = vld [vmem:[%s12347_s3 + $0xf8] sm:$0xff]  ;;  %v6920_v27 = vld [vmem:[%s12347_s3 + $0x120] sm:$0xff]  ;;  %v6921_v28 = vld [vmem:[%s12347_s3 + $0x128] sm:$0xff] }
  0x2c   :  { %7962 = vmatmul.mubr.msk.f32.vlgmr.msra.gmra.mrb[6].mxu1 %vm75_vm2, %v6913_v16  ;;  %9219 = vmatpush3.bf16.msra.mxu0 %v10273_v15  ;;  %v6910_v16 = vld [vmem:[%s12347_s3 + $0xf0] sm:$0xff]  ;;  %v6919_v24 = vld [vmem:[%s12347_s3 + $0x118] sm:$0xff]  ;;  %v6928_v34 = vld [vmem:[%s12347_s3 + $0x140] sm:$0xff] }
  0x2d   :  { %7984 = vmatpush3.msk.msra.mxu1 %vm79_vm1, %v73_v1  ;;  %7985 = vmatprep.mubr.msk.f32.mxu1 %vm10094_vm0, %v12324_v0  ;;  %v10466_v18 = vpack.c.bf16 %v6911_v17, %v6910_v16  ;;  %v6929_v35 = vld [vmem:[%s12347_s3 + $0x148] sm:$0xff]  ;;  %v6931_v39 = vld [vmem:[%s12347_s3 + $0x158] sm:$0xff]  ;;  %v6934_v45 = vld [vmem:[%s12347_s3 + $0x170] sm:$0xff] }
  0x2e   :  { %8007 = vmatprep.subr.mxu1 %v12324_v0  ;;  %9220 = vmatprep.subr.bf16.mxu0 %v10095_v7  ;;  %v6940_v49 = vld [vmem:[%s12347_s3 + $0x180] sm:$0xff]  ;;  %v6941_v50 = vld [vmem:[%s12347_s3 + $0x188] sm:$0xff]  ;;  %v6942_v54 = vld [vmem:[%s12347_s3 + $0x190] sm:$0xff] }
  0x2f   :  { %v6943_v55 = vld [vmem:[%s12347_s3 + $0x198] sm:$0xff]  ;;  %v6944_v59 = vld [vmem:[%s12347_s3 + $0x1a0] sm:$0xff]  ;;  %v6945_v60 = vld [vmem:[%s12347_s3 + $0x1a8] sm:$0xff] }
  0x30   :  { %7986 = vmatmul.mubr.msk.f32.vlgmr.msra.gmra.mrb[8].mxu1 %vm75_vm2, %v6925_v20  ;;  %9222 = vmatpush3.bf16.msra.mxu0 %v10291_v19  ;;  %v6916_v20 = vld [vmem:[%s12347_s3 + $0x100] sm:$0xff]  ;;  %v6953_v6 = vld [vmem:[%s12347_s3 + $0x1c8] sm:$0xff]  ;;  %v6954_v12 = vld [vmem:[%s12347_s3 + $0x1d0] sm:$0xff] }
  0x31   :  { %8008 = vmatpush3.msk.msra.mxu1 %vm79_vm1, %v73_v1  ;;  %8009 = vmatprep.mubr.msk.f32.mxu1 %vm10094_vm0, %v12324_v0  ;;  %v6955_v13 = vld [vmem:[%s12347_s3 + $0x1d8] sm:$0xff]  ;;  %v6956_v17 = vld [vmem:[%s12347_s3 + $0x1e0] sm:$0xff] }
  0x32   :  { %8031 = vmatprep.subr.mxu1 %v12324_v0  ;;  %9223 = vmatprep.subr.bf16.mxu0 %v10095_v7  ;;  %v10620_v16 = vpack.c.bf16 %v6955_v13, %v6954_v12  ;;  %v2843_v12 = vld [vmem:[#allocation2 + $0x28] sm:$0xff]  ;;  %v2844_v13 = vld [vmem:[#allocation2 + $0x30] sm:$0xff] }
  0x34   :  { %8010 = vmatmul.mubr.msk.f32.vlgmr.msra.gmra.mrb[10].mxu1 %vm75_vm2, %v6937_v21  ;;  %v6917_v21 = vld [vmem:[%s12347_s3 + $0x108] sm:$0xff] }
  0x35   :  { %8032 = vmatpush3.msk.msra.mxu1 %vm79_vm1, %v73_v1  ;;  %8033 = vmatprep.mubr.msk.f32.mxu1 %vm10094_vm0, %v12324_v0 }
  0x36   :  { %8055 = vmatprep.subr.mxu1 %v12324_v0 }
  0x38   :  { %8034 = vmatmul.mubr.msk.f32.vlgmr.msra.gmra.mrb[12].mxu1 %vm75_vm2, %v6949_v22  ;;  %v10476_v22 = vpack.c.bf16 %v6917_v21, %v6916_v20  ;;  %v6957_v20 = vld [vmem:[%s12347_s3 + $0x1e8] sm:$0xff]  ;;  %v6958_v21 = vld [vmem:[%s12347_s3 + $0x1f0] sm:$0xff] }
  0x39   :  { %8056 = vmatpush3.msk.msra.mxu1 %vm79_vm1, %v73_v1  ;;  %8057 = vmatprep.mubr.msk.f32.mxu1 %vm10094_vm0, %v12324_v0  ;;  %v6904_v1 = vld [vmem:[%s12347_s3 + $0xc0] sm:$0xff] }
  0x3a   :  { %8079 = vmatprep.subr.mxu1 %v12324_v0  ;;  %v10433_v5 = vpack.c.bf16 %v6905_v2, %v6904_v1  ;;  %v6947_v1 = vld [vmem:[%s12347_s3 + $0x1b8] sm:$0xff] }
  0x3c   :  { %8058 = vmatmul.mubr.msk.f32.vlgmr.msra.gmra.mrb[14].mxu1 %vm75_vm2, %v6961_v23  ;;  %v6918_v23 = vld [vmem:[%s12347_s3 + $0x110] sm:$0xff] }
  0x3d   :  { %8081 = vmatprep.mubr.msk.f32.mxu1 %vm10094_vm0, %v12324_v0  ;;  %v10488_v25 = vpack.c.bf16 %v6919_v24, %v6918_v23  ;;  %v6959_v23 = vld [vmem:[%s12347_s3 + $0x1f8] sm:$0xff] }
  0x3e   :  { %v10642_v24 = vpack.c.bf16 %v6959_v23, %v6958_v21 }
  0xf3   :  { %v232_v29 = vpop.f32.mrb[0].mxu1  ;;  %v149_v30 = vpop.f32.mrb[0].mxu0 }
  0xf4   :  { %v7872_v31 = vpop.f32.mrb[1].mxu1  ;;  %7890 = vmatmul.mubr.msk.f32.vlgmr.msra.gmra.mrb[2].mxu0 %vm245_vm3, %v232_v29  ;;  %v7867_v32 = vpop.f32.mrb[1].mxu0  ;;  %v10500_v29 = vpack.c.bf16 %v6921_v28, %v6920_v27  ;;  %v6964_v27 = vld [vmem:[%s12347_s3 + $0x200] sm:$0xff]  ;;  %v6965_v28 = vld [vmem:[%s12347_s3 + $0x208] sm:$0xff] }
  0xf5   :  { %9225 = vmatpush3.bf16.msra.mxu0 %v10336_v26  ;;  %7908 = vmatprep.mubr.msk.f32.mxu0 %vm10094_vm0, %v12324_v0  ;;  %v6923_v31 = vld [vmem:[%s12347_s3 + $0x138] sm:$0xff] }
  0xf6   :  { %9226 = vmatprep.subr.bf16.mxu0 %v10095_v7 }
  0xf7   :  { %v463_v36 = vpop.f32.mrb[2].mxu1 }
  0xf8   :  { %v7915_v37 = vpop.f32.mrb[3].mxu1 }
  0xf9   :  { %9228 = vmatpush3.bf16.msra.mxu0 %v10346_v33  ;;  %v6930_v37 = vld [vmem:[%s12347_s3 + $0x150] sm:$0xff] }
  0xfa   :  { %9229 = vmatprep.subr.bf16.mxu0 %v10095_v7  ;;  %v10532_v40 = vpack.c.bf16 %v6931_v39, %v6930_v37  ;;  %v6968_v37 = vld [vmem:[%s12347_s3 + $0x220] sm:$0xff]  ;;  %v6969_v39 = vld [vmem:[%s12347_s3 + $0x228] sm:$0xff] }
  0xfb   :  { %v10367_v41 = vpop.f32.mrb[4].mxu1 }
  0xfc   :  { %v7939_v42 = vpop.f32.mrb[5].mxu1 }
  0xfd   :  { %9231 = vmatpush3.bf16.msra.mxu0 %v10358_v38  ;;  %v6933_v42 = vld [vmem:[%s12347_s3 + $0x168] sm:$0xff] }
  0xfe   :  { %9232 = vmatprep.subr.bf16.mxu0 %v10095_v7 }
  0xff   :  { %v10379_v46 = vpop.f32.mrb[6].mxu1 }
 0x100   :  { %v7963_v47 = vpop.f32.mrb[7].mxu1 }
 0x101   :  { %9234 = vmatpush3.bf16.msra.mxu0 %v10370_v43 }
 0x102   :  { %9235 = vmatprep.subr.bf16.mxu0 %v10095_v7 }
 0x103   :  { %v10391_v51 = vpop.f32.mrb[8].mxu1 }
 0x104   :  { %7909 = vmatmul.mubr.msk.f32.vlgmr.msra.gmra.mrb[2].mxu0 %vm245_vm3, %v149_v30  ;;  %v7987_v52 = vpop.f32.mrb[9].mxu1  ;;  %v6922_v30 = vld [vmem:[%s12347_s3 + $0x130] sm:$0xff] }
 0x105   :  { %9237 = vmatpush3.bf16.msra.mxu0 %v10382_v48  ;;  %7932 = vmatprep.mubr.msk.f32.mxu0 %vm10094_vm0, %v12324_v0  ;;  %v10510_v32 = vpack.c.bf16 %v6923_v31, %v6922_v30  ;;  %v10564_v52 = vpack.c.bf16 %v6941_v50, %v6940_v49  ;;  %v10652_v30 = vpack.c.bf16 %v6965_v28, %v6964_v27  ;;  %v6966_v31 = vld [vmem:[%s12347_s3 + $0x210] sm:$0xff]  ;;  %v3080_v27 = vld [vmem:[%s12311_s10] sm:$0xff] }
 0x106   :  { %9238 = vmatprep.subr.bf16.mxu0 %v10095_v7 }
 0x107   :  { %v10406_v56 = vpop.f32.mrb[10].mxu1 }
 0x108   :  { %v8011_v57 = vpop.f32.mrb[11].mxu1 }
 0x109   :  { %9240 = vmatpush3.bf16.msra.mxu0 %v10395_v53  ;;  %v10576_v57 = vpack.c.bf16 %v6943_v55, %v6942_v54  ;;  %v1499_v54 = vld [vmem:[%s12348_s4] sm:$0xff]  ;;  %v6990_v55 = vld [vmem:[%s12348_s4 + $0x30] sm:$0xff] }
 0x10a   :  { %9241 = vmatprep.subr.bf16.mxu0 %v10095_v7 }
 0x10b   :  { %v10418_v61 = vpop.f32.mrb[12].mxu1 }
 0x10c   :  { %v8035_v62 = vpop.f32.mrb[13].mxu1 }
 0x10d   :  { %9243 = vmatpush3.bf16.msra.mxu0 %v10409_v58  ;;  %v6946_v62 = vld [vmem:[%s12347_s3 + $0x1b0] sm:$0xff] }
 0x10e   :  { %9244 = vmatprep.subr.bf16.mxu0 %v10095_v7  ;;  %v10598_v2 = vpack.c.bf16 %v6947_v1, %v6946_v62 }
 0x10f   :  { %v10430_v3 = vpop.f32.mrb[14].mxu1 }
 0x110   :  { %v8059_v4 = vpop.f32.mrb[15].mxu1 }
 0x111   :  { %9246 = vmatpush3.bf16.msra.mxu0 %v10421_v63  ;;  %v6952_v4 = vld [vmem:[%s12347_s3 + $0x1c0] sm:$0xff] }
 0x112   :  { %9247 = vmatprep.subr.bf16.mxu0 %v10095_v7  ;;  %v10608_v9 = vpack.c.bf16 %v6953_v6, %v6952_v4  ;;  %v2841_v4 = vld [vmem:[#allocation2 + $0x18] sm:$0xff] }
 0x114   :  { %7933 = vmatmul.mubr.msk.f32.vlgmr.msra.gmra.mrb[2].mxu0 %vm245_vm3, %v463_v36  ;;  %v10520_v36 = vpack.c.bf16 %v6929_v35, %v6928_v34  ;;  %v6967_v34 = vld [vmem:[%s12347_s3 + $0x218] sm:$0xff] }
 0x115   :  { %9249 = vmatpush3.bf16.msra.mxu0 %v10433_v5  ;;  %7956 = vmatprep.mubr.msk.f32.mxu0 %vm10094_vm0, %v12324_v0  ;;  %v10664_v35 = vpack.c.bf16 %v6967_v34, %v6966_v31 }
 0x116   :  { %9250 = vmatprep.subr.bf16.mxu0 %v10095_v7 }
 0x119   :  { %9252 = vmatpush3.bf16.msra.mxu0 %v10444_v10 }
 0x11a   :  { %9253 = vmatprep.subr.bf16.mxu0 %v10095_v7 }
 0x11d   :  { %9255 = vmatpush3.bf16.msra.mxu0 %v10456_v14 }
 0x11e   :  { %9256 = vmatprep.subr.bf16.mxu0 %v10095_v7 }
 0x121   :  { %9258 = vmatpush3.bf16.msra.mxu0 %v10466_v18 }
 0x122   :  { %9259 = vmatprep.subr.bf16.mxu0 %v10095_v7 }
 0x124   :  { %7957 = vmatmul.mubr.msk.f32.vlgmr.msra.gmra.mrb[2].mxu0 %vm245_vm3, %v10367_v41  ;;  %v6932_v41 = vld [vmem:[%s12347_s3 + $0x160] sm:$0xff] }
 0x125   :  { %9261 = vmatpush3.bf16.msra.mxu0 %v10476_v22  ;;  %7980 = vmatprep.mubr.msk.f32.mxu0 %vm10094_vm0, %v12324_v0  ;;  %v10544_v44 = vpack.c.bf16 %v6933_v42, %v6932_v41  ;;  %v6970_v41 = vld [vmem:[%s12347_s3 + $0x230] sm:$0xff]  ;;  %v6971_v42 = vld [vmem:[%s12347_s3 + $0x238] sm:$0xff] }
 0x126   :  { %9262 = vmatprep.subr.bf16.mxu0 %v10095_v7 }
 0x129   :  { %9264 = vmatpush3.bf16.msra.mxu0 %v10488_v25 }
 0x12a   :  { %9265 = vmatprep.subr.bf16.mxu0 %v10095_v7 }
 0x12d   :  { %9267 = vmatpush3.bf16.msra.mxu0 %v10500_v29 }
 0x12e   :  { %9268 = vmatprep.subr.bf16.mxu0 %v10095_v7 }
 0x131   :  { %9270 = vmatpush3.bf16.msra.mxu0 %v10510_v32 }
 0x132   :  { %9271 = vmatprep.subr.bf16.mxu0 %v10095_v7 }
 0x134   :  { %7981 = vmatmul.mubr.msk.f32.vlgmr.msra.gmra.mrb[2].mxu0 %vm245_vm3, %v10379_v46  ;;  %v6935_v46 = vld [vmem:[%s12347_s3 + $0x178] sm:$0xff] }
 0x135   :  { %9273 = vmatpush3.bf16.msra.mxu0 %v10520_v36  ;;  %8004 = vmatprep.mubr.msk.f32.mxu0 %vm10094_vm0, %v12324_v0  ;;  %v10554_v47 = vpack.c.bf16 %v6935_v46, %v6934_v45  ;;  %v10686_v45 = vpack.c.bf16 %v6971_v42, %v6970_v41 }
 0x136   :  { %9274 = vmatprep.subr.bf16.mxu0 %v10095_v7 }
 0x139   :  { %9276 = vmatpush3.bf16.msra.mxu0 %v10532_v40 }
 0x13a   :  { %9277 = vmatprep.subr.bf16.mxu0 %v10095_v7 }
 0x13d   :  { %9279 = vmatpush3.bf16.msra.mxu0 %v10544_v44 }
 0x13e   :  { %9280 = vmatprep.subr.bf16.mxu0 %v10095_v7 }
 0x141   :  { %9282 = vmatpush3.bf16.msra.mxu0 %v10554_v47 }
 0x142   :  { %9283 = vmatprep.subr.bf16.mxu0 %v10095_v7 }
 0x144   :  { %8005 = vmatmul.mubr.msk.f32.vlgmr.msra.gmra.mrb[2].mxu0 %vm245_vm3, %v10391_v51  ;;  %v10588_v51 = vpack.c.bf16 %v6945_v60, %v6944_v59  ;;  %v6993_v59 = vld [vmem:[%s12348_s4 + $0x38] sm:$0xff] }
 0x145   :  { %9285 = vmatpush3.bf16.msra.mxu0 %v10564_v52  ;;  %8028 = vmatprep.mubr.msk.f32.mxu0 %vm10094_vm0, %v12324_v0 }
 0x146   :  { %9286 = vmatprep.subr.bf16.mxu0 %v10095_v7 }
 0x149   :  { %9288 = vmatpush3.bf16.msra.mxu0 %v10576_v57 }
 0x14a   :  { %9289 = vmatprep.subr.bf16.mxu0 %v10095_v7 }
 0x14d   :  { %9291 = vmatpush3.bf16.msra.mxu0 %v10588_v51 }
 0x14e   :  { %9292 = vmatprep.subr.bf16.mxu0 %v10095_v7 }
 0x151   :  { %9294 = vmatpush3.bf16.msra.mxu0 %v10598_v2 }
 0x152   :  { %9295 = vmatprep.subr.bf16.mxu0 %v10095_v7 }
 0x154   :  { %8029 = vmatmul.mubr.msk.f32.vlgmr.msra.gmra.mrb[2].mxu0 %vm245_vm3, %v10406_v56  ;;  %v10632_v56 = vpack.c.bf16 %v6957_v20, %v6956_v17  ;;  %v2845_v17 = vld [vmem:[#allocation2 + $0x38] sm:$0xff] }
 0x155   :  { %9297 = vmatpush3.bf16.msra.mxu0 %v10608_v9  ;;  %8052 = vmatprep.mubr.msk.f32.mxu0 %vm10094_vm0, %v12324_v0  ;;  %v9437_v20 = vpack.c.bf16 %v2845_v17, %v2844_v13  ;;  %v7018_v13 = vld [vmem:[%s12313_s12 + $0x90] sm:$0xff]  ;;  %v7019_v17 = vld [vmem:[%s12313_s12 + $0x98] sm:$0xff] }
 0x156   :  { %9298 = vmatprep.subr.bf16.mxu0 %v10095_v7 }
 0x159   :  { %9300 = vmatpush3.bf16.msra.mxu0 %v10620_v16 }
 0x15a   :  { %9301 = vmatprep.subr.bf16.mxu0 %v10095_v7 }
 0x15d   :  { %9303 = vmatpush3.bf16.msra.mxu0 %v10632_v56 }
 0x15e   :  { %9304 = vmatprep.subr.bf16.mxu0 %v10095_v7 }
 0x161   :  { %9306 = vmatpush3.bf16.msra.mxu0 %v10642_v24 }
 0x162   :  { %9307 = vmatprep.subr.bf16.mxu0 %v10095_v7 }
 0x164   :  { %8053 = vmatmul.mubr.msk.f32.vlgmr.msra.gmra.mrb[2].mxu0 %vm245_vm3, %v10418_v61  ;;  %v10676_v61 = vpack.c.bf16 %v6969_v39, %v6968_v37 }
 0x165   :  { %9309 = vmatpush3.bf16.msra.mxu0 %v10652_v30  ;;  %8076 = vmatprep.mubr.msk.f32.mxu0 %vm10094_vm0, %v12324_v0 }
 0x166   :  { %9310 = vmatprep.subr.bf16.mxu0 %v10095_v7 }
 0x169   :  { %9312 = vmatpush3.bf16.msra.mxu0 %v10664_v35 }
 0x16a   :  { %9313 = vmatprep.subr.bf16.mxu0 %v10095_v7 }
 0x16d   :  { %9315 = vmatpush3.bf16.msra.mxu0 %v10676_v61 }
 0x16e   :  { %9316 = vmatprep.subr.bf16.mxu0 %v10095_v7 }
 0x171   :  { %9318 = vmatpush3.bf16.msra.mxu0 %v10686_v45 }
 0x172   :  { %8223 = vmatprep.subr.mxu0 %v12324_v0 }
 0x174   :  { %8077 = vmatmul.mubr.msk.f32.vlgmr.msra.gmra.mrb[2].mxu0 %vm245_vm3, %v10430_v3  ;;  %v6974_v3 = vld [vmem:[%s12348_s4 + $0x8] sm:$0xff] }
 0x175   :  { %8225 = vmatprep.mubr.msk.f32.mxu0 %vm10094_vm0, %v12324_v0 }
 0x247   :  { %v1493_v46 = vpop.f32.mrb[2].mxu0 }
 0x248   :  { %v10695_v49 = vmax.f32 %v1493_v46, 0.0  ;;  %v8078_v50 = vpop.f32.mrb[3].mxu0  ;;  %v3079_v46 = vld [vmem:[%s12310_s9] sm:$0xff] }
 0x249   :  { %v7008_v50 = vld [vmem:[%s12313_s12 + $0x48] sm:$0xff] }
 0x24a   :  { %8080 = vmatpush3.msra.mxu1 %v10695_v49  ;;  %8224 = vmatpush3.msra.mxu0 %v10695_v49 }
 0x24b   :  { %8082 = vmatmul.mubr.msk.f32.vlgmr.msra.gmra.mrb[16].mxu1 %vm1500_vm4, %v1499_v54  ;;  %8084 = vmatprep.subr.mxu1 %v12324_v0 }
 0x24c   :  { %8226 = vmatmul.mubr.msk.f32.vlgmr.msra.gmra.mrb[4].mxu0 %vm1500_vm4, %v6990_v55  ;;  %8247 = vmatprep.subr.mxu0 %v12324_v0  ;;  %v7009_v55 = vld [vmem:[%s12313_s12 + $0x50] sm:$0xff] }
 0x24d   :  { %8085 = vmatpush3.msra.mxu1 %v10695_v49  ;;  %8248 = vmatpush3.msra.mxu0 %v10695_v49 }
 0x24e   :  { %8086 = vmatprep.mubr.msk.f32.mxu1 %vm10094_vm0, %v12324_v0  ;;  %8249 = vmatprep.mubr.msk.f32.mxu0 %vm10094_vm0, %v12324_v0 }
 0x24f   :  { %8271 = vmatprep.subr.mxu0 %v12324_v0  ;;  %8087 = vmatmul.mubr.msk.f32.vlgmr.msra.gmra.mrb[18].mxu1 %vm1500_vm4, %v6974_v3  ;;  %v7010_v3 = vld [vmem:[%s12313_s12 + $0x58] sm:$0xff] }
 0x250   :  { %8250 = vmatmul.mubr.msk.f32.vlgmr.msra.gmra.mrb[6].mxu0 %vm1500_vm4, %v6993_v59  ;;  %9319 = vmatprep.subr.bf16.mxu1 %v10095_v7  ;;  %v9455_v59 = vpack.c.bf16 %v7010_v3, %v7009_v55  ;;  %v7046_v55 = vld [vmem:[%s12313_s12 + $0x158] sm:$0xff] }
 0x251   :  { %8272 = vmatpush3.msra.mxu0 %v10695_v49  ;;  %9321 = vmatpush3.bf16.msra.mxu1 %v10242_v8 }
 0x252   :  { %9322 = vmatprep.subr.bf16.mxu1 %v10095_v7  ;;  %8105 = vmatprep.mubr.msk.f32.mxu1 %vm10094_vm0, %v12324_v0 }
 0x253   :  { %8273 = vmatprep.mubr.msk.f32.mxu0 %vm10094_vm0, %v12324_v0  ;;  %9427 = vmatprep.subr.bf16.mxu0 %v10095_v7 }
 0x255   :  { %9324 = vmatpush3.bf16.msra.mxu1 %v10255_v11  ;;  %v6978_v11 = vld [vmem:[%s12348_s4 + $0x10] sm:$0xff] }
 0x256   :  { %9325 = vmatprep.subr.bf16.mxu1 %v10095_v7 }
 0x259   :  { %9327 = vmatpush3.bf16.msra.mxu1 %v10273_v15 }
 0x25a   :  { %9328 = vmatprep.subr.bf16.mxu1 %v10095_v7 }
 0x25d   :  { %9330 = vmatpush3.bf16.msra.mxu1 %v10291_v19 }
 0x25e   :  { %9331 = vmatprep.subr.bf16.mxu1 %v10095_v7 }
 0x31e   :  { %v1570_v8 = vpop.f32.mrb[16].mxu1 }
 0x31f   :  { %v8083_v60 = vpop.f32.mrb[17].mxu1 }
 0x320   :  { %v7012_v60 = vld [vmem:[%s12313_s12 + $0x68] sm:$0xff] }
 0x322   :  { %v1645_v62 = vpop.f32.mrb[18].mxu1 }
 0x323   :  { %v8088_v1 = vpop.f32.mrb[19].mxu1  ;;  %8106 = vmatmul.mubr.msk.f32.vlgmr.msra.gmra.mrb[20].mxu1 %vm245_vm3, %v1645_v62 }
 0x324   :  { %9333 = vmatpush3.bf16.msra.mxu1 %v10336_v26  ;;  %8124 = vmatprep.mubr.msk.f32.mxu1 %vm10094_vm0, %v12324_v0  ;;  %v6981_v26 = vld [vmem:[%s12348_s4 + $0x18] sm:$0xff]  ;;  %v7013_v1 = vld [vmem:[%s12313_s12 + $0x70] sm:$0xff] }
 0x325   :  { %9334 = vmatprep.subr.bf16.mxu1 %v10095_v7 }
 0x328   :  { %9336 = vmatpush3.bf16.msra.mxu1 %v10346_v33 }
 0x329   :  { %9337 = vmatprep.subr.bf16.mxu1 %v10095_v7 }
 0x32c   :  { %9339 = vmatpush3.bf16.msra.mxu1 %v10358_v38 }
 0x32d   :  { %9340 = vmatprep.subr.bf16.mxu1 %v10095_v7 }
 0x330   :  { %9342 = vmatpush3.bf16.msra.mxu1 %v10370_v43  ;;  %v6984_v43 = vld [vmem:[%s12348_s4 + $0x20] sm:$0xff] }
 0x331   :  { %8127 = vmatprep.subr.mxu1 %v12324_v0 }
 0x333   :  { %8125 = vmatmul.mubr.msk.f32.vlgmr.msra.gmra.mrb[20].mxu1 %vm245_vm3, %v1570_v8  ;;  %v7011_v8 = vld [vmem:[%s12313_s12 + $0x60] sm:$0xff] }
 0x334   :  { %8128 = vmatpush3.msra.mxu1 %v10695_v49  ;;  %8129 = vmatprep.mubr.msk.f32.mxu1 %vm10094_vm0, %v12324_v0  ;;  %v9458_v62 = vpack.c.bf16 %v7012_v60, %v7011_v8  ;;  %v7038_v8 = vld [vmem:[%s12313_s12 + $0x120] sm:$0xff]  ;;  %v7039_v60 = vld [vmem:[%s12313_s12 + $0x128] sm:$0xff] }
 0x335   :  { %9343 = vmatprep.subr.bf16.mxu1 %v10095_v7 }
 0x337   :  { %8130 = vmatmul.mubr.msk.f32.vlgmr.msra.gmra.mrb[22].mxu1 %vm1500_vm4, %v6978_v11  ;;  %v7014_v11 = vld [vmem:[%s12313_s12 + $0x78] sm:$0xff] }
 0x338   :  { %9345 = vmatpush3.bf16.msra.mxu1 %v10382_v48  ;;  %8148 = vmatprep.mubr.msk.f32.mxu1 %vm10094_vm0, %v12324_v0  ;;  %v6996_v48 = vld [vmem:[%s12348_s4 + $0x40] sm:$0xff] }
 0x339   :  { %9346 = vmatprep.subr.bf16.mxu1 %v10095_v7  ;;  %8274 = vmatmul.mubr.msk.f32.vlgmr.msra.gmra.mrb[8].mxu0 %vm1500_vm4, %v6996_v48  ;;  %v3232_v48 = vld [vmem:[%s12312_s11] sm:$0xff] }
 0x33a   :  { %8311 = vmatprep.mubr.msk.f32.mxu0 %vm10094_vm0, %v12324_v0 }
 0x33c   :  { %9348 = vmatpush3.bf16.msra.mxu1 %v10395_v53 }
 0x33d   :  { %9349 = vmatprep.subr.bf16.mxu1 %v10095_v7 }
 0x340   :  { %9351 = vmatpush3.bf16.msra.mxu1 %v10409_v58 }
 0x341   :  { %9352 = vmatprep.subr.bf16.mxu1 %v10095_v7 }
 0x344   :  { %9354 = vmatpush3.bf16.msra.mxu1 %v10421_v63  ;;  %v6987_v63 = vld [vmem:[%s12348_s4 + $0x28] sm:$0xff] }
 0x345   :  { %8151 = vmatprep.subr.mxu1 %v12324_v0 }
 0x40a   :  { %v1866_v15 = vpop.f32.mrb[22].mxu1 }
 0x40b   :  { %v8131_v19 = vpop.f32.mrb[23].mxu1  ;;  %8149 = vmatmul.mubr.msk.f32.vlgmr.msra.gmra.mrb[20].mxu1 %vm245_vm3, %v1866_v15  ;;  %v9461_v15 = vpack.c.bf16 %v7014_v11, %v7013_v1  ;;  %v7048_v1 = vld [vmem:[%s12313_s12 + $0x168] sm:$0xff]  ;;  %v9494_v11 = vpack.c.bf16 %v7039_v60, %v7038_v8 }
 0x40c   :  { %8152 = vmatpush3.msra.mxu1 %v10695_v49  ;;  %8153 = vmatprep.mubr.msk.f32.mxu1 %vm10094_vm0, %v12324_v0  ;;  %v3307_v19 = vld [vmem:[%s12313_s12] sm:$0xff] }
 0x40d   :  { %9355 = vmatprep.subr.bf16.mxu1 %v10095_v7 }
 0x40f   :  { %8154 = vmatmul.mubr.msk.f32.vlgmr.msra.gmra.mrb[24].mxu1 %vm1500_vm4, %v6981_v26  ;;  %v3308_v26 = vld [vmem:[%s12313_s12 + $0x8] sm:$0xff] }
 0x410   :  { %9357 = vmatpush3.bf16.msra.mxu1 %v10433_v5  ;;  %8172 = vmatprep.mubr.msk.f32.mxu1 %vm10094_vm0, %v12324_v0  ;;  %v2462_v5 = vpop.f32.mrb[4].mxu0 }
 0x411   :  { %9358 = vmatprep.subr.bf16.mxu1 %v10095_v7 }
 0x414   :  { %9360 = vmatpush3.bf16.msra.mxu1 %v10444_v10  ;;  %v8227_v10 = vpop.f32.mrb[5].mxu0 }
 0x415   :  { %9361 = vmatprep.subr.bf16.mxu1 %v10095_v7  ;;  %v3311_v10 = vld [vmem:[%s12313_s12 + $0x20] sm:$0xff] }
 0x418   :  { %9363 = vmatpush3.bf16.msra.mxu1 %v10456_v14  ;;  %v2611_v14 = vpop.f32.mrb[6].mxu0 }
 0x419   :  { %9364 = vmatprep.subr.bf16.mxu1 %v10095_v7 }
 0x41c   :  { %9366 = vmatpush3.bf16.msra.mxu1 %v10466_v18  ;;  %v8251_v18 = vpop.f32.mrb[7].mxu0 }
 0x41d   :  { %8175 = vmatprep.subr.mxu1 %v12324_v0 }
 0x4e2   :  { %v2015_v33 = vpop.f32.mrb[24].mxu1 }
 0x4e3   :  { %v8155_v38 = vpop.f32.mrb[25].mxu1  ;;  %8173 = vmatmul.mubr.msk.f32.vlgmr.msra.gmra.mrb[20].mxu1 %vm245_vm3, %v2015_v33 }
 0x4e4   :  { %8176 = vmatpush3.msra.mxu1 %v10695_v49  ;;  %8177 = vmatprep.mubr.msk.f32.mxu1 %vm10094_vm0, %v12324_v0 }
 0x4e5   :  { %9367 = vmatprep.subr.bf16.mxu1 %v10095_v7 }
 0x4e7   :  { %8178 = vmatmul.mubr.msk.f32.vlgmr.msra.gmra.mrb[26].mxu1 %vm1500_vm4, %v6984_v43 }
 0x4e8   :  { %9369 = vmatpush3.bf16.msra.mxu1 %v10476_v22  ;;  %8196 = vmatprep.mubr.msk.f32.mxu1 %vm10094_vm0, %v12324_v0  ;;  %v2760_v22 = vpop.f32.mrb[8].mxu0 }
 0x4e9   :  { %9370 = vmatprep.subr.bf16.mxu1 %v10095_v7 }
 0x4ec   :  { %9372 = vmatpush3.bf16.msra.mxu1 %v10488_v25  ;;  %v8275_v25 = vpop.f32.mrb[9].mxu0 }
 0x4ed   :  { %9373 = vmatprep.subr.bf16.mxu1 %v10095_v7  ;;  %v3314_v25 = vld [vmem:[%s12313_s12 + $0x38] sm:$0xff] }
 0x4f0   :  { %9375 = vmatpush3.bf16.msra.mxu1 %v10500_v29  ;;  %v2838_v29 = vld [vmem:[#allocation2] sm:$0xff] }
 0x4f1   :  { %9376 = vmatprep.subr.bf16.mxu1 %v10095_v7 }
 0x4f4   :  { %9378 = vmatpush3.bf16.msra.mxu1 %v10510_v32  ;;  %v2839_v32 = vld [vmem:[#allocation2 + $0x8] sm:$0xff] }
 0x4f5   :  { %8199 = vmatprep.subr.mxu1 %v12324_v0 }
 0x5ba   :  { %v2164_v53 = vpop.f32.mrb[26].mxu1 }
 0x5bb   :  { %v8179_v58 = vpop.f32.mrb[27].mxu1  ;;  %8197 = vmatmul.mubr.msk.f32.vlgmr.msra.gmra.mrb[20].mxu1 %vm245_vm3, %v2164_v53  ;;  %v9440_v53 = vpack.c.bf16 %v3308_v26, %v3307_v19  ;;  %v7040_v19 = vld [vmem:[%s12313_s12 + $0x130] sm:$0xff]  ;;  %v7041_v26 = vld [vmem:[%s12313_s12 + $0x138] sm:$0xff] }
 0x5bc   :  { %8200 = vmatpush3.msra.mxu1 %v10695_v49  ;;  %8201 = vmatprep.mubr.msk.f32.mxu1 %vm10094_vm0, %v12324_v0  ;;  %v7007_v49 = vld [vmem:[%s12313_s12 + $0x40] sm:$0xff]  ;;  %v3309_v58 = vld [vmem:[%s12313_s12 + $0x10] sm:$0xff] }
 0x5bd   :  { %9379 = vmatprep.subr.bf16.mxu1 %v10095_v7  ;;  %v9452_v54 = vpack.c.bf16 %v7008_v50, %v7007_v49  ;;  %v7036_v49 = vld [vmem:[%s12313_s12 + $0x110] sm:$0xff]  ;;  %v7037_v50 = vld [vmem:[%s12313_s12 + $0x118] sm:$0xff] }
 0x5be   :  { %v9491_v3 = vpack.c.bf16 %v7037_v50, %v7036_v49 }
 0x5bf   :  { %8202 = vmatmul.mubr.msk.f32.vlgmr.msra.gmra.mrb[28].mxu1 %vm1500_vm4, %v6987_v63  ;;  %v3310_v63 = vld [vmem:[%s12313_s12 + $0x18] sm:$0xff] }
 0x5c0   :  { %9381 = vmatpush3.bf16.msra.mxu1 %v10520_v36  ;;  %8220 = vmatprep.mubr.msk.f32.mxu1 %vm10094_vm0, %v12324_v0  ;;  %v2840_v36 = vld [vmem:[#allocation2 + $0x10] sm:$0xff] }
 0x5c1   :  { %9382 = vmatprep.subr.bf16.mxu1 %v10095_v7  ;;  %v9431_v6 = vpack.c.bf16 %v2841_v4, %v2840_v36  ;;  %v10096_v36 = vmov 0   ;;  %v7017_v4 = vld [vmem:[%s12313_s12 + $0x88] sm:$0xff] }
 0x5c2   :  { %10041 = vset.pattern.permute.xlu0 %v10096_v36 }
 0x5c4   :  { %9384 = vmatpush3.bf16.msra.mxu1 %v10532_v40  ;;  %v9428_v40 = vpack.c.bf16 %v2839_v32, %v2838_v29  ;;  %v3306_v32 = vld [vmem:[%s12314_s13] sm:$0xff] }
 0x5c5   :  { %9385 = vmatprep.subr.bf16.mxu1 %v10095_v7  ;;  %3390 = vperm.xlu0 %10041, %v3306_v32  }
 0x5c6   :  { %9429 = vmatpush3.bf16.msra.mxu0 %v9428_v40  ;;  %v7016_v40 = vld [vmem:[%s12313_s12 + $0x80] sm:$0xff] }
 0x5c7   :  { %9430 = vmatprep.subr.bf16.mxu0 %v10095_v7 }
 0x5c8   :  { %9387 = vmatpush3.bf16.msra.mxu1 %v10544_v44  ;;  %v2842_v44 = vld [vmem:[#allocation2 + $0x20] sm:$0xff] }
 0x5c9   :  { %9388 = vmatprep.subr.bf16.mxu1 %v10095_v7 }
 0x5ca   :  { %9432 = vmatpush3.bf16.msra.mxu0 %v9431_v6  ;;  %v7025_v6 = vld [vmem:[%s12313_s12 + $0xc0] sm:$0xff] }
 0x5cb   :  { %9433 = vmatprep.subr.bf16.mxu0 %v10095_v7 }
 0x5cc   :  { %9390 = vmatpush3.bf16.msra.mxu1 %v10554_v47  ;;  %v9434_v47 = vpack.c.bf16 %v2843_v12, %v2842_v44  ;;  %v7026_v44 = vld [vmem:[%s12313_s12 + $0xc8] sm:$0xff]  ;;  %v9464_v12 = vpack.c.bf16 %v7017_v4, %v7016_v40  ;;  %v7056_v40 = vld [vmem:[%s12313_s12 + $0x1a0] sm:$0xff] }
 0x5cd   :  { %9391 = vmatprep.subr.bf16.mxu1 %v10095_v7  ;;  %v7057_v4 = vld [vmem:[%s12313_s12 + $0x1a8] sm:$0xff] }
 0x5ce   :  { %9435 = vmatpush3.bf16.msra.mxu0 %v9434_v47  ;;  %v9476_v47 = vpack.c.bf16 %v7026_v44, %v7025_v6  ;;  %v7065_v6 = vld [vmem:[%s12313_s12 + $0x1e0] sm:$0xff]  ;;  %v7066_v44 = vld [vmem:[%s12313_s12 + $0x1e8] sm:$0xff] }
 0x5cf   :  { %9436 = vmatprep.subr.bf16.mxu0 %v10095_v7 }
 0x5d2   :  { %9438 = vmatpush3.bf16.msra.mxu0 %v9437_v20  ;;  %v7027_v20 = vld [vmem:[%s12313_s12 + $0xd0] sm:$0xff] }
 0x5d3   :  { %8314 = vmatprep.subr.mxu0 %v12324_v0 }
 0x692   :  { %v2313_v21 = vpop.f32.mrb[28].mxu1 }
 0x693   :  { %v8203_v23 = vpop.f32.mrb[29].mxu1  ;;  %8221 = vmatmul.mubr.msk.f32.vlgmr.msra.gmra.mrb[20].mxu1 %vm245_vm3, %v2313_v21  ;;  %v7028_v21 = vld [vmem:[%s12313_s12 + $0xd8] sm:$0xff] }
 0x694   :  { %9393 = vmatpush3.bf16.msra.mxu1 %v10564_v52  ;;  %8244 = vmatprep.mubr.msk.f32.mxu1 %vm10094_vm0, %v12324_v0  ;;  %v2919_v52 = vld [vmem:[%s12306_s5] sm:$0xff] }
 0x695   :  { %9394 = vmatprep.subr.bf16.mxu1 %v10095_v7 }
 0x698   :  { %9396 = vmatpush3.bf16.msra.mxu1 %v10576_v57 }
 0x699   :  { %9397 = vmatprep.subr.bf16.mxu1 %v10095_v7 }
 0x69c   :  { %9399 = vmatpush3.bf16.msra.mxu1 %v10588_v51 }
 0x69d   :  { %9400 = vmatprep.subr.bf16.mxu1 %v10095_v7 }
 0x6a0   :  { %9402 = vmatpush3.bf16.msra.mxu1 %v10598_v2  ;;  %v2921_v2 = vld [vmem:[%s12309_s8] sm:$0xff] }
 0x6a1   :  { %9403 = vmatprep.subr.bf16.mxu1 %v10095_v7 }
 0x6a3   :  { %8245 = vmatmul.mubr.msk.f32.vlgmr.msra.gmra.mrb[20].mxu1 %vm245_vm3, %v2462_v5  ;;  %v9443_v5 = vpack.c.bf16 %v3310_v63, %v3309_v58  ;;  %v7053_v58 = vld [vmem:[%s12313_s12 + $0x188] sm:$0xff]  ;;  %v7061_v63 = vld [vmem:[%s12313_s12 + $0x1c0] sm:$0xff] }
 0x6a4   :  { %9405 = vmatpush3.bf16.msra.mxu1 %v10608_v9  ;;  %8268 = vmatprep.mubr.msk.f32.mxu1 %vm10094_vm0, %v12324_v0  ;;  %v2920_v9 = vld [vmem:[%s12308_s7] sm:$0xff] }
 0x6a5   :  { %9406 = vmatprep.subr.bf16.mxu1 %v10095_v7 }
 0x6a8   :  { %9408 = vmatpush3.bf16.msra.mxu1 %v10620_v16 }
 0x6a9   :  { %9409 = vmatprep.subr.bf16.mxu1 %v10095_v7 }
 0x6ac   :  { %9411 = vmatpush3.bf16.msra.mxu1 %v10632_v56 }
 0x6ad   :  { %9412 = vmatprep.subr.bf16.mxu1 %v10095_v7 }
 0x6b0   :  { %9414 = vmatpush3.bf16.msra.mxu1 %v10642_v24  ;;  %v3081_v24 = vld [vmem:[%s12307_s6] sm:$0x7] }
 0x6b1   :  { %9415 = vmatprep.subr.bf16.mxu1 %v10095_v7 }
 0x6b3   :  { %8269 = vmatmul.mubr.msk.f32.vlgmr.msra.gmra.mrb[20].mxu1 %vm245_vm3, %v2611_v14  ;;  %v3312_v14 = vld [vmem:[%s12313_s12 + $0x28] sm:$0xff] }
 0x6b4   :  { %9417 = vmatpush3.bf16.msra.mxu1 %v10652_v30  ;;  %8292 = vmatprep.mubr.msk.f32.mxu1 %vm10094_vm0, %v12324_v0  ;;  %v9446_v18 = vpack.c.bf16 %v3312_v14, %v3311_v10 }
 0x6b5   :  { %9418 = vmatprep.subr.bf16.mxu1 %v10095_v7 }
 0x6b8   :  { %9420 = vmatpush3.bf16.msra.mxu1 %v10664_v35 }
 0x6b9   :  { %9421 = vmatprep.subr.bf16.mxu1 %v10095_v7 }
 0x6bc   :  { %9423 = vmatpush3.bf16.msra.mxu1 %v10676_v61 }
 0x6bd   :  { %9424 = vmatprep.subr.bf16.mxu1 %v10095_v7 }
 0x6c0   :  { %9426 = vmatpush3.bf16.msra.mxu1 %v10686_v45 }
 0x6c1   :  { %9451 = vmatprep.subr.bf16.mxu1 %v10095_v7 }
 0x6c3   :  { %8293 = vmatmul.mubr.msk.f32.vlgmr.msra.gmra.mrb[20].mxu1 %vm245_vm3, %v2760_v22  ;;  %v3313_v22 = vld [vmem:[%s12313_s12 + $0x30] sm:$0xff] }
 0x6c4   :  { %8374 = vmatprep.mubr.msk.f32.mxu1 %vm10094_vm0, %v12324_v0  ;;  %9453 = vmatpush3.bf16.msra.mxu1 %v9452_v54  ;;  %v9449_v29 = vpack.c.bf16 %v3314_v25, %v3313_v22  ;;  %v7045_v54 = vld [vmem:[%s12313_s12 + $0x150] sm:$0xff]  ;;  %v7055_v22 = vld [vmem:[%s12313_s12 + $0x198] sm:$0xff] }
 0x6c5   :  { %9454 = vmatprep.subr.bf16.mxu1 %v10095_v7  ;;  %v7063_v25 = vld [vmem:[%s12313_s12 + $0x1d0] sm:$0xff] }
 0x6c8   :  { %9456 = vmatpush3.bf16.msra.mxu1 %v9455_v59  ;;  %v9503_v59 = vpack.c.bf16 %v7046_v55, %v7045_v54 }
 0x6c9   :  { %9457 = vmatprep.subr.bf16.mxu1 %v10095_v7 }
 0x6cc   :  { %9459 = vmatpush3.bf16.msra.mxu1 %v9458_v62  ;;  %v7047_v62 = vld [vmem:[%s12313_s12 + $0x160] sm:$0xff] }
 0x6cd   :  { %9460 = vmatprep.subr.bf16.mxu1 %v10095_v7 }
 0x6d0   :  { %9462 = vmatpush3.bf16.msra.mxu1 %v9461_v15  ;;  %v9506_v15 = vpack.c.bf16 %v7048_v1, %v7047_v62 }
 0x6d1   :  { %9475 = vmatprep.subr.bf16.mxu1 %v10095_v7 }
 0x796   :  { %v2833_v57 = vpop.f32.mrb[20].mxu1 }
 0x797   :  { %v8294_v51 = vpop.f32.mrb[21].mxu1  ;;  %8312 = vmatmul.mubr.msk.f32.vlgmr.msra.gmra.mrb[10].mxu0 %vm245_vm3, %v2833_v57  ;;  %v9467_v57 = vpack.c.bf16 %v7019_v17, %v7018_v13  ;;  %v7058_v13 = vld [vmem:[%s12313_s12 + $0x1b0] sm:$0xff]  ;;  %v7059_v17 = vld [vmem:[%s12313_s12 + $0x1b8] sm:$0xff] }
 0x798   :  { %8315 = vmatpush3.msra.mxu0 %v2919_v52  ;;  %8316 = vmatprep.mubr.msk.f32.mxu0 %vm10094_vm0, %v12324_v0  ;;  %v9479_v51 = vpack.c.bf16 %v7028_v21, %v7027_v20  ;;  %v7067_v20 = vld [vmem:[%s12313_s12 + $0x1f0] sm:$0xff]  ;;  %v7068_v21 = vld [vmem:[%s12313_s12 + $0x1f8] sm:$0xff] }
 0x799   :  { %8319 = vmatprep.subr.mxu0 %v12324_v0 }
 0x79b   :  { %8317 = vmatmul.mubr.msk.f32.vlgmr.msra.gmra.mrb[12].mxu0 %vm1500_vm4, %v2921_v2  ;;  %v7020_v2 = vld [vmem:[%s12313_s12 + $0xa0] sm:$0xff] }
 0x79c   :  { %8321 = vmatprep.mubr.msk.f32.mxu0 %vm10094_vm0, %v12324_v0 }
 0x86a   :  { %v2915_v16 = vpop.f32.mrb[10].mxu0 }
 0x86b   :  { %v8313_v56 = vpop.f32.mrb[11].mxu0  ;;  %8320 = vmatpush3.msra.mxu0 %v2915_v16 }
 0x86c   :  { %8322 = vmatmul.mubr.msk.f32.vlgmr.msra.gmra.mrb[12].mxu0 %vm1500_vm4, %v2920_v9  ;;  %8324 = vmatprep.subr.mxu0 %v12324_v0  ;;  %v7021_v9 = vld [vmem:[%s12313_s12 + $0xa8] sm:$0xff] }
 0x86d   :  { %8326 = vmatprep.mubr.msk.f32.mxu0 %vm10094_vm0, %v12324_v0  ;;  %8325 = vmatpush3.msk.msra.mxu0 %vm79_vm1, %v3081_v24  ;;  %v7030_v56 = vld [vmem:[%s12313_s12 + $0xe8] sm:$0xff]  ;;  %v9470_v24 = vpack.c.bf16 %v7021_v9, %v7020_v2 }
 0x86e   :  { %8329 = vmatprep.subr.mxu0 %v12324_v0 }
 0x870   :  { %8327 = vmatmul.mubr.msk.f32.vlgmr.msra.gmra.mrb[14].mxu0 %vm75_vm2, %v3080_v27 }
 0x871   :  { %8331 = vmatprep.mubr.msk.f32.mxu0 %vm10094_vm0, %v12324_v0 }
 0x93f   :  { %v3064_v28 = vpop.f32.mrb[12].mxu0 }
 0x940   :  { %v3068_v30 = vsub.f32 0.0, %v3064_v28  ;;  %v8323_v31 = vpop.f32.mrb[13].mxu0  ;;  %v7022_v28 = vld [vmem:[%s12313_s12 + $0xb0] sm:$0xff] }
 0x941   :  { %v7031_v31 = vld [vmem:[%s12313_s12 + $0xf0] sm:$0xff] }
 0x942   :  { %v3069_v34 = vmul.f32 1.442695, %v3068_v30  ;;  %v7023_v30 = vld [vmem:[%s12313_s12 + $0xb8] sm:$0xff] }
 0x944   :  { %10042 = vpow2.f32 %v3069_v34  ;;  %v7032_v34 = vld [vmem:[%s12313_s12 + $0xf8] sm:$0xff] }
 0x94e   :  { %v10043_v35 = vpop.eup %10042 }
 0x94f   :  { %v3071_v37 = vadd.f32 1.0, %v10043_v35  ;;  %v9473_v35 = vpack.c.bf16 %v7023_v30, %v7022_v28 }
 0x951   :  { %10044 = vrcp.f32 %v3071_v37  ;;  %v9485_v37 = vpack.c.bf16 %v7032_v34, %v7031_v31 }
 0x95b   :  { %v10045_v39 = vpop.eup %10044 }
 0x95c   :  { %v3074_v61 = vmul.f32 %v10045_v39, %v2915_v16  ;;  %v3075_v41 = vsub.f32 1.0, %v10045_v39  ;;  %v7029_v16 = vld [vmem:[%s12313_s12 + $0xe0] sm:$0xff] }
 0x95d   :  { %v9482_v27 = vpack.c.bf16 %v7030_v56, %v7029_v16  ;;  %v7034_v39 = vld [vmem:[%s12313_s12 + $0x100] sm:$0xff] }
 0x95e   :  { %v3076_v42 = vmul.f32 %v3075_v41, %v2919_v52  ;;  %v7043_v41 = vld [vmem:[%s12313_s12 + $0x140] sm:$0xff] }
 0x960   :  { %v3077_v45 = vadd.f32 %v3076_v42, %v3074_v61  ;;  %v7035_v61 = vld [vmem:[%s12313_s12 + $0x108] sm:$0xff] }
 0x961   :  { %v7044_v42 = vld [vmem:[%s12313_s12 + $0x148] sm:$0xff] }
 0x962   :  { %3078 = vst.msk [vmem:[%s12318_s17] sm:$0xff] %vm245_vm3, %v3077_v45  ;;  %8330 = vmatpush3.msra.mxu0 %v3077_v45  ;;  %v9488_v45 = vpack.c.bf16 %v7035_v61, %v7034_v39 }
 0x963   :  { %8332 = vmatmul.mubr.msk.f32.vlgmr.msra.gmra.mrb[14].mxu0 %vm1500_vm4, %v3079_v46  ;;  %8334 = vmatprep.subr.mxu0 %v12324_v0  ;;  %v9500_v46 = vpack.c.bf16 %v7044_v42, %v7043_v41 }
 0x964   :  { %8336 = vmatprep.mubr.msk.f32.mxu0 %vm10094_vm0, %v12324_v0 }
 0xa36   :  { %v3227_v33 = vpop.f32.mrb[14].mxu0 }
 0xa37   :  { %v3231_v38 = vmax.f32 %v3227_v33, 0.0  ;;  %v8333_v43 = vpop.f32.mrb[15].mxu0  ;;  %v7049_v33 = vld [vmem:[%s12313_s12 + $0x170] sm:$0xff] }
 0xa38   :  { %v9497_v43 = vpack.c.bf16 %v7041_v26, %v7040_v19 }
 0xa39   :  { %8335 = vmatpush3.msra.mxu0 %v3231_v38  ;;  %v7050_v38 = vld [vmem:[%s12313_s12 + $0x178] sm:$0xff] }
 0xa3a   :  { %8337 = vmatmul.mubr.msk.f32.vlgmr.msra.gmra.mrb[16].mxu0 %vm1500_vm4, %v3232_v48  ;;  %9439 = vmatprep.subr.bf16.mxu0 %v10095_v7  ;;  %v9509_v48 = vpack.c.bf16 %v7050_v38, %v7049_v33 }
 0xa3b   :  { %9441 = vmatpush3.bf16.msra.mxu0 %v9440_v53  ;;  %8355 = vmatprep.mubr.msk.f32.mxu0 %vm10094_vm0, %v12324_v0  ;;  %v7052_v53 = vld [vmem:[%s12313_s12 + $0x180] sm:$0xff] }
 0xa3c   :  { %9442 = vmatprep.subr.bf16.mxu0 %v10095_v7  ;;  %v9512_v10 = vpack.c.bf16 %v7053_v58, %v7052_v53  ;;  %v7074_v53 = vld [vmem:[%s12317_s16 + $0x88] sm:$0xff]  ;;  %v7075_v58 = vld [vmem:[%s12317_s16 + $0x90] sm:$0xff] }
 0xa3f   :  { %9444 = vmatpush3.bf16.msra.mxu0 %v9443_v5  ;;  %v7062_v5 = vld [vmem:[%s12313_s12 + $0x1c8] sm:$0xff] }
 0xa40   :  { %9445 = vmatprep.subr.bf16.mxu0 %v10095_v7  ;;  %v9524_v14 = vpack.c.bf16 %v7062_v5, %v7061_v63 }
 0xa43   :  { %9447 = vmatpush3.bf16.msra.mxu0 %v9446_v18  ;;  %v7054_v18 = vld [vmem:[%s12313_s12 + $0x190] sm:$0xff] }
 0xa44   :  { %9448 = vmatprep.subr.bf16.mxu0 %v10095_v7  ;;  %v9515_v32 = vpack.c.bf16 %v7055_v22, %v7054_v18 }
 0xa47   :  { %9450 = vmatpush3.bf16.msra.mxu0 %v9449_v29  ;;  %v7064_v29 = vld [vmem:[%s12313_s12 + $0x1d8] sm:$0xff] }
 0xa48   :  { %9463 = vmatprep.subr.bf16.mxu0 %v10095_v7  ;;  %v9527_v36 = vpack.c.bf16 %v7064_v29, %v7063_v25 }
 0xb0d   :  { %v11004_v23 = vpop.f32.mrb[16].mxu0 }
 0xb0e   :  { %8356 = vmatmul.mubr.msk.f32.vlgmr.msra.gmra.mrb[18].mxu0 %vm245_vm3, %v11004_v23  ;;  %8375 = vmatmul.mubr.msk.f32.vlgmr.msra.gmra.mrb[30].mxu1 %vm245_vm3, %v11004_v23  ;;  %v8338_v52 = vpop.f32.mrb[17].mxu0 }
 0xb0f   :  { %9465 = vmatpush3.bf16.msra.mxu0 %v9464_v12  ;;  %9477 = vmatpush3.bf16.msra.mxu1 %v9476_v47  ;;  %v9518_v12 = vpack.c.bf16 %v7057_v4, %v7056_v40  ;;  %v9530_v47 = vpack.c.bf16 %v7066_v44, %v7065_v6  ;;  %v9521_v52 = vpack.c.bf16 %v7059_v17, %v7058_v13  ;;  %v7077_v6 = vld [vmem:[%s12317_s16 + $0xa0] sm:$0xff]  ;;  %v7078_v44 = vld [vmem:[%s12317_s16 + $0xa8] sm:$0xff] }
 0xb10   :  { %9466 = vmatprep.subr.bf16.mxu0 %v10095_v7  ;;  %9478 = vmatprep.subr.bf16.mxu1 %v10095_v7 }
 0xb11   :  { %8393 = vmatprep.mubr.msk.f32.mxu0 %vm10094_vm0, %v12324_v0  ;;  %8412 = vmatprep.mubr.msk.f32.mxu1 %vm10094_vm0, %v12324_v0 }
 0xb13   :  { %9468 = vmatpush3.bf16.msra.mxu0 %v9467_v57  ;;  %9480 = vmatpush3.bf16.msra.mxu1 %v9479_v51  ;;  %v9533_v57 = vpack.c.bf16 %v7068_v21, %v7067_v20  ;;  %v11182_v51 = vpop.permute.xlu0 %3390  ;;  %v11245_v20 = vpack.c.bf16 %v7078_v44, %v7077_v6  ;;  %v7079_v21 = vld [vmem:[%s12317_s16 + $0xb0] sm:$0xff] }
 0xb14   :  { %9469 = vmatprep.subr.bf16.mxu0 %v10095_v7  ;;  %9481 = vmatprep.subr.bf16.mxu1 %v10095_v7 }
 0xb17   :  { %9471 = vmatpush3.bf16.msra.mxu0 %v9470_v24  ;;  %9483 = vmatpush3.bf16.msra.mxu1 %v9482_v27 }
 0xb18   :  { %9472 = vmatprep.subr.bf16.mxu0 %v10095_v7  ;;  %9484 = vmatprep.subr.bf16.mxu1 %v10095_v7 }
 0xb1b   :  { %9474 = vmatpush3.bf16.msra.mxu0 %v9473_v35  ;;  %9486 = vmatpush3.bf16.msra.mxu1 %v9485_v37 }
 0xb1c   :  { %9487 = vmatprep.subr.bf16.mxu0 %v10095_v7  ;;  %9499 = vmatprep.subr.bf16.mxu1 %v10095_v7 }
 0xb1e   :  { %8394 = vmatmul.mubr.msk.f32.vlgmr.msra.gmra.mrb[20].mxu0 %vm245_vm3, %v11004_v23  ;;  %8413 = vmatmul.mubr.msk.f32.vlgmr.msra.gmra.mrb[32].mxu1 %vm245_vm3, %v11004_v23 }
 0xb1f   :  { %9489 = vmatpush3.bf16.msra.mxu0 %v9488_v45  ;;  %9501 = vmatpush3.bf16.msra.mxu1 %v9500_v46 }
 0xb20   :  { %9490 = vmatprep.subr.bf16.mxu0 %v10095_v7  ;;  %9502 = vmatprep.subr.bf16.mxu1 %v10095_v7 }
 0xb21   :  { %8431 = vmatprep.mubr.msk.f32.mxu0 %vm10094_vm0, %v12324_v0  ;;  %8450 = vmatprep.mubr.msk.f32.mxu1 %vm10094_vm0, %v12324_v0 }
 0xb23   :  { %9492 = vmatpush3.bf16.msra.mxu0 %v9491_v3  ;;  %9504 = vmatpush3.bf16.msra.mxu1 %v9503_v59 }
 0xb24   :  { %9493 = vmatprep.subr.bf16.mxu0 %v10095_v7  ;;  %9505 = vmatprep.subr.bf16.mxu1 %v10095_v7 }
 0xb27   :  { %9495 = vmatpush3.bf16.msra.mxu0 %v9494_v11  ;;  %9507 = vmatpush3.bf16.msra.mxu1 %v9506_v15 }
 0xb28   :  { %9496 = vmatprep.subr.bf16.mxu0 %v10095_v7  ;;  %9508 = vmatprep.subr.bf16.mxu1 %v10095_v7 }
 0xb2b   :  { %9498 = vmatpush3.bf16.msra.mxu0 %v9497_v43  ;;  %9510 = vmatpush3.bf16.msra.mxu1 %v9509_v48  ;;  %v7073_v48 = vld [vmem:[%s12317_s16 + $0x80] sm:$0xff] }
 0xb2c   :  { %9511 = vmatprep.subr.bf16.mxu0 %v10095_v7  ;;  %9523 = vmatprep.subr.bf16.mxu1 %v10095_v7 }
 0xb2e   :  { %8432 = vmatmul.mubr.msk.f32.vlgmr.msra.gmra.mrb[22].mxu0 %vm245_vm3, %v11004_v23  ;;  %8451 = vmatmul.mubr.msk.f32.vlgmr.msra.gmra.mrb[34].mxu1 %vm245_vm3, %v11004_v23 }
 0xb2f   :  { %9513 = vmatpush3.bf16.msra.mxu0 %v9512_v10  ;;  %9525 = vmatpush3.bf16.msra.mxu1 %v9524_v14  ;;  %v11220_v10 = vpack.c.bf16 %v7074_v53, %v7073_v48  ;;  %v7076_v14 = vld [vmem:[%s12317_s16 + $0x98] sm:$0xff] }
 0xb30   :  { %9514 = vmatprep.subr.bf16.mxu0 %v10095_v7  ;;  %9526 = vmatprep.subr.bf16.mxu1 %v10095_v7  ;;  %v11235_v4 = vpack.c.bf16 %v7076_v14, %v7075_v58  ;;  %v7088_v48 = vld [vmem:[%s12317_s16 + $0xf8] sm:$0xff] }
 0xb31   :  { %8469 = vmatprep.mubr.msk.f32.mxu0 %vm10094_vm0, %v12324_v0  ;;  %8488 = vmatprep.mubr.msk.f32.mxu1 %vm10094_vm0, %v12324_v0 }
 0xb33   :  { %9516 = vmatpush3.bf16.msra.mxu0 %v9515_v32  ;;  %9528 = vmatpush3.bf16.msra.mxu1 %v9527_v36 }
 0xb34   :  { %9517 = vmatprep.subr.bf16.mxu0 %v10095_v7  ;;  %9529 = vmatprep.subr.bf16.mxu1 %v10095_v7 }
 0xb37   :  { %9519 = vmatpush3.bf16.msra.mxu0 %v9518_v12  ;;  %9531 = vmatpush3.bf16.msra.mxu1 %v9530_v47 }
 0xb38   :  { %9520 = vmatprep.subr.bf16.mxu0 %v10095_v7  ;;  %9532 = vmatprep.subr.bf16.mxu1 %v10095_v7 }
 0xb3b   :  { %9522 = vmatpush3.bf16.msra.mxu0 %v9521_v52  ;;  %9534 = vmatpush3.bf16.msra.mxu1 %v9533_v57  ;;  %v7080_v52 = vld [vmem:[%s12317_s16 + $0xb8] sm:$0xff] }
 0xb3c   :  { %8491 = vmatprep.subr.mxu0 %v12324_v0  ;;  %9535 = vmatprep.subr.bf16.mxu1 %v10095_v7 }
 0xb3e   :  { %8470 = vmatmul.mubr.msk.f32.vlgmr.msra.gmra.mrb[24].mxu0 %vm245_vm3, %v11004_v23  ;;  %8489 = vmatmul.mubr.msk.f32.vlgmr.msra.gmra.mrb[36].mxu1 %vm245_vm3, %v11004_v23 }
 0xb3f   :  { %8493 = vmatprep.mubr.msk.f32.mxu0 %vm10094_vm0, %v12324_v0  ;;  %8533 = vmatprep.mubr.msk.f32.mxu1 %vm10094_vm0, %v12324_v0 }
 0xb40   :  { %9537 = vmatpush3.bf16.msra.mxu1 %v11220_v10 }
 0xb41   :  { %9538 = vmatprep.subr.bf16.mxu1 %v10095_v7 }
 0xb44   :  { %9540 = vmatpush3.bf16.msra.mxu1 %v11235_v4 }
 0xb45   :  { %9541 = vmatprep.subr.bf16.mxu1 %v10095_v7 }
 0xb48   :  { %9543 = vmatpush3.bf16.msra.mxu1 %v11245_v20 }
 0xb49   :  { %9544 = vmatprep.subr.bf16.mxu1 %v10095_v7 }
 0xbe1   :  { %v11184_v2 = vpop.f32.mrb[18].mxu0  ;;  %v11186_v9 = vpop.f32.mrb[30].mxu1 }
 0xbe2   :  { %v3393_v16 = vmul.f32 %v11182_v51, %v11184_v2  ;;  %v3479_v56 = vmul.f32 %v11186_v9, %v11182_v51  ;;  %v8357_v24 = vpop.f32.mrb[19].mxu0  ;;  %v8376_v23 = vpop.f32.mrb[31].mxu1 }
 0xbe3   :  { %v11255_v23 = vpack.c.bf16 %v7080_v52, %v7079_v21 }
 0xbe4   :  { %v3394_v27 = vrot.slane %v3393_v16, 4  ;;  %v3480_v28 = vrot.slane %v3479_v56, 4 }
 0xbe5   :  { %9546 = vmatpush3.bf16.msra.mxu1 %v11255_v23 }
 0xbe6   :  { %v3395_v30 = vadd.f32 %v3394_v27, %v3393_v16  ;;  %v3481_v31 = vadd.f32 %v3480_v28, %v3479_v56  ;;  %v7081_v27 = vld [vmem:[%s12317_s16 + $0xc0] sm:$0xff]  ;;  %v7082_v28 = vld [vmem:[%s12317_s16 + $0xc8] sm:$0xff]  ;;  %9547 = vmatprep.subr.bf16.mxu1 %v10095_v7 }
 0xbe8   :  { %v3396_v34 = vrot.slane %v3395_v30, 2  ;;  %v3482_v35 = vrot.slane %v3481_v31, 2 }
 0xbea   :  { %v3397_v37 = vadd.f32 %v3396_v34, %v3395_v30  ;;  %v3483_v39 = vadd.f32 %v3482_v35, %v3481_v31  ;;  %v11265_v35 = vpack.c.bf16 %v7082_v28, %v7081_v27 }
 0xbec   :  { %v3398_v61 = vrot.slane %v3397_v37, 1  ;;  %v3484_v41 = vrot.slane %v3483_v39, 1  ;;  %9549 = vmatpush3.bf16.msra.mxu1 %v11265_v35 }
 0xbed   :  { %9550 = vmatprep.subr.bf16.mxu1 %v10095_v7 }
 0xbee   :  { %v11192_v42 = vadd.f32 %v3398_v61, %v3397_v37  ;;  %v11194_v45 = vadd.f32 %v3484_v41, %v3483_v39  ;;  %v7083_v37 = vld [vmem:[%s12317_s16 + $0xd0] sm:$0xff]  ;;  %v7084_v39 = vld [vmem:[%s12317_s16 + $0xd8] sm:$0xff] }
 0xbf0   :  { %v4002_v46 = vmax.f32 %v11192_v42, %v11194_v45 }
 0xbf1   :  { %v11198_v49 = vpop.f32.mrb[20].mxu0  ;;  %v11200_v50 = vpop.f32.mrb[32].mxu1 }
 0xbf2   :  { %v3565_v54 = vmul.f32 %v11198_v49, %v11182_v51  ;;  %v3651_v55 = vmul.f32 %v11200_v50, %v11182_v51  ;;  %v8395_v3 = vpop.f32.mrb[21].mxu0  ;;  %v8414_v59 = vpop.f32.mrb[33].mxu1 }
 0xbf4   :  { %v3566_v8 = vrot.slane %v3565_v54, 4  ;;  %v3652_v60 = vrot.slane %v3651_v55, 4 }
 0xbf6   :  { %v3567_v62 = vadd.f32 %v3566_v8, %v3565_v54  ;;  %v3653_v1 = vadd.f32 %v3652_v60, %v3651_v55 }
 0xbf8   :  { %v3568_v11 = vrot.slane %v3567_v62, 2  ;;  %v3654_v15 = vrot.slane %v3653_v1, 2 }
 0xbfa   :  { %v3569_v19 = vadd.f32 %v3568_v11, %v3567_v62  ;;  %v3655_v26 = vadd.f32 %v3654_v15, %v3653_v1  ;;  %v11283_v62 = vpack.c.bf16 %v7084_v39, %v7083_v37  ;;  %v7085_v1 = vld [vmem:[%s12317_s16 + $0xe0] sm:$0xff]  ;;  %v7086_v11 = vld [vmem:[%s12317_s16 + $0xe8] sm:$0xff] }
 0xbfc   :  { %v3570_v33 = vrot.slane %v3569_v19, 1  ;;  %v3656_v38 = vrot.slane %v3655_v26, 1  ;;  %9552 = vmatpush3.bf16.msra.mxu1 %v11283_v62 }
 0xbfd   :  { %9553 = vmatprep.subr.bf16.mxu1 %v10095_v7 }
 0xbfe   :  { %v11206_v43 = vadd.f32 %v3570_v33, %v3569_v19  ;;  %v11218_v5 = vadd.f32 %v3656_v38, %v3655_v26  ;;  %v11293_v33 = vpack.c.bf16 %v7086_v11, %v7085_v1  ;;  %v7087_v38 = vld [vmem:[%s12317_s16 + $0xf0] sm:$0xff] }
 0xc00   :  { %v4003_v63 = vmax.f32 %v4002_v46, %v11206_v43  ;;  %9555 = vmatpush3.bf16.msra.mxu1 %v11293_v33 }
 0xc01   :  { %v11225_v18 = vpop.f32.mrb[22].mxu0  ;;  %v11227_v22 = vpop.f32.mrb[34].mxu1  ;;  %9556 = vmatprep.subr.bf16.mxu1 %v10095_v7 }
 0xc02   :  { %v4004_v25 = vmax.f32 %v4003_v63, %v11218_v5  ;;  %v3737_v29 = vmul.f32 %v11225_v18, %v11182_v51  ;;  %v3823_v32 = vmul.f32 %v11227_v22, %v11182_v51  ;;  %v8433_v36 = vpop.f32.mrb[23].mxu0  ;;  %v8452_v40 = vpop.f32.mrb[35].mxu1 }
 0xc04   :  { %v3738_v12 = vrot.slane %v3737_v29, 4  ;;  %v3824_v47 = vrot.slane %v3823_v32, 4 }
 0xc06   :  { %v3739_v13 = vadd.f32 %v3738_v12, %v3737_v29  ;;  %v3825_v17 = vadd.f32 %v3824_v47, %v3823_v32 }
 0xc08   :  { %v3740_v57 = vrot.slane %v3739_v13, 2  ;;  %v3826_v16 = vrot.slane %v3825_v17, 2 }
 0xc0a   :  { %v3741_v56 = vadd.f32 %v3740_v57, %v3739_v13  ;;  %v3827_v24 = vadd.f32 %v3826_v16, %v3825_v17 }
 0xc0c   :  { %v3742_v30 = vrot.slane %v3741_v56, 1  ;;  %v3828_v31 = vrot.slane %v3827_v24, 1 }
 0xc0e   :  { %v3743_v34 = vadd.f32 %v3742_v30, %v3741_v56  ;;  %v3829_v41 = vadd.f32 %v3828_v31, %v3827_v24 }
 0xc10   :  { %v4005_v61 = vmax.f32 %v4004_v25, %v3743_v34  ;;  %v11303_v25 = vpack.c.bf16 %v7088_v48, %v7087_v38 }
 0xc11   :  { %v11274_v46 = vpop.f32.mrb[24].mxu0  ;;  %v11276_v54 = vpop.f32.mrb[36].mxu1 }
 0xc12   :  { %v4006_v55 = vmax.f32 %v4005_v61, %v3829_v41  ;;  %v3909_v3 = vmul.f32 %v11274_v46, %v11182_v51  ;;  %v3995_v59 = vmul.f32 %v11276_v54, %v11182_v51  ;;  %v8471_v8 = vpop.f32.mrb[25].mxu0  ;;  %v8490_v60 = vpop.f32.mrb[37].mxu1  ;;  %9558 = vmatpush3.bf16.msra.mxu1 %v11303_v25 }
 0xc13   :  { %9559 = vmatprep.subr.bf16.mxu1 %v10095_v7 }
 0xc14   :  { %v3910_v15 = vrot.slane %v3909_v3, 4  ;;  %v3996_v19 = vrot.slane %v3995_v59, 4 }
 0xc16   :  { %v3911_v26 = vadd.f32 %v3910_v15, %v3909_v3  ;;  %v3997_v51 = vadd.f32 %v3996_v19, %v3995_v59 }
 0xc18   :  { %v3912_v53 = vrot.slane %v3911_v26, 2  ;;  %v3998_v58 = vrot.slane %v3997_v51, 2 }
 0xc1a   :  { %v3913_v63 = vadd.f32 %v3912_v53, %v3911_v26  ;;  %v3999_v14 = vadd.f32 %v3998_v58, %v3997_v51 }
 0xc1c   :  { %v3914_v29 = vrot.slane %v3913_v63, 1  ;;  %v4000_v32 = vrot.slane %v3999_v14, 1 }
 0xc1e   :  { %v3915_v36 = vadd.f32 %v3914_v29, %v3913_v63  ;;  %v4001_v6 = vadd.f32 %v4000_v32, %v3999_v14 }
 0xc20   :  { %v4007_v40 = vmax.f32 %v4006_v55, %v3915_v36 }
 0xc22   :  { %v4008_v44 = vmax.f32 %v4007_v40, %v4001_v6 }
 0xc24   :  { %v4009_v12 = vsub.f32 %v11192_v42, %v4008_v44  ;;  %v4012_v47 = vsub.f32 %v11194_v45, %v4008_v44  ;;  %v4015_v13 = vsub.f32 %v11206_v43, %v4008_v44  ;;  %v4018_v17 = vsub.f32 %v11218_v5, %v4008_v44 }
 0xc25   :  { %v4021_v21 = vsub.f32 %v3743_v34, %v4008_v44  ;;  %v4024_v52 = vsub.f32 %v3829_v41, %v4008_v44  ;;  %v4027_v57 = vsub.f32 %v3915_v36, %v4008_v44  ;;  %v4030_v16 = vsub.f32 %v4001_v6, %v4008_v44 }
 0xc26   :  { %v4010_v56 = vmul.f32 1.442695, %v4009_v12  ;;  %v4013_v24 = vmul.f32 1.442695, %v4012_v47  ;;  %v4016_v27 = vmul.f32 1.442695, %v4015_v13 }
 0xc27   :  { %v4019_v28 = vmul.f32 1.442695, %v4018_v17  ;;  %v4022_v30 = vmul.f32 1.442695, %v4021_v21  ;;  %v4025_v42 = vmul.f32 1.442695, %v4024_v52 }
 0xc28   :  { %10046 = vpow2.f32 %v4010_v56  ;;  %v4028_v45 = vmul.f32 1.442695, %v4027_v57  ;;  %v4031_v43 = vmul.f32 1.442695, %v4030_v16 }
 0xc29   :  { %10048 = vpow2.f32 %v4013_v24 }
 0xc2a   :  { %10050 = vpow2.f32 %v4016_v27 }
 0xc2b   :  { %10052 = vpow2.f32 %v4019_v28 }
 0xc2c   :  { %10054 = vpow2.f32 %v4022_v30 }
 0xc2d   :  { %10056 = vpow2.f32 %v4025_v42 }
 0xc2e   :  { %10058 = vpow2.f32 %v4028_v45 }
 0xc2f   :  { %10060 = vpow2.f32 %v4031_v43 }
 0xc32   :  { %v10047_v31 = vpop.eup %10046 }
 0xc33   :  { %v10049_v5 = vpop.eup %10048 }
 0xc34   :  { %v4033_v34 = vadd.f32 %v10049_v5, %v10047_v31  ;;  %v10051_v37 = vpop.eup %10050 }
 0xc35   :  { %v10053_v61 = vpop.eup %10052 }
 0xc36   :  { %v4034_v39 = vadd.f32 %v10051_v37, %v4033_v34  ;;  %v10055_v55 = vpop.eup %10054  ;;  %v7071_v34 = vld [vmem:[%s12315_s14 + $0x8] sm:$0xff] }
 0xc37   :  { %v10057_v59 = vpop.eup %10056 }
 0xc38   :  { %v4035_v41 = vadd.f32 %v10053_v61, %v4034_v39  ;;  %v10059_v60 = vpop.eup %10058  ;;  %v7107_v39 = vld [vmem:[%s12315_s14 + $0x18] sm:$0xff] }
 0xc39   :  { %v10061_v11 = vpop.eup %10060 }
 0xc3a   :  { %v4036_v3 = vadd.f32 %v10055_v55, %v4035_v41  ;;  %v7143_v41 = vld [vmem:[%s12315_s14 + $0x28] sm:$0xff] }
 0xc3c   :  { %v4037_v8 = vadd.f32 %v10057_v59, %v4036_v3  ;;  %v7179_v3 = vld [vmem:[%s12315_s14 + $0x38] sm:$0xff] }
 0xc3e   :  { %v4038_v1 = vadd.f32 %v10059_v60, %v4037_v8  ;;  %v4157_v8 = vld [vmem:[%s12317_s16] sm:$0xff] }
 0xc40   :  { %v4039_v15 = vadd.f32 %v10061_v11, %v4038_v1 }
 0xc42   :  { %10062 = vrcp.f32 %v4039_v15 }
 0xc4c   :  { %v10063_v19 = vpop.eup %10062 }
 0xc4d   :  { %v4041_v26 = vmul.f32 %v10063_v19, %v10047_v31  ;;  %v4046_v51 = vmul.f32 %v10063_v19, %v10049_v5  ;;  %v4051_v38 = vmul.f32 %v10063_v19, %v10051_v37  ;;  %v4056_v48 = vmul.f32 %v10063_v19, %v10053_v61  ;;  %v7089_v37 = vld [vmem:[%s12315_s14 + $0x10] sm:$0xff]  ;;  %v7125_v61 = vld [vmem:[%s12315_s14 + $0x20] sm:$0xff] }
 0xc4e   :  { %v4061_v53 = vmul.f32 %v10063_v19, %v10055_v55  ;;  %v4066_v58 = vmul.f32 %v10063_v19, %v10057_v59  ;;  %v4071_v63 = vmul.f32 %v10063_v19, %v10059_v60  ;;  %v4076_v14 = vmul.f32 %v10063_v19, %v10061_v11  ;;  %v7161_v55 = vld [vmem:[%s12315_s14 + $0x30] sm:$0xff]  ;;  %v7197_v59 = vld [vmem:[%s12315_s14 + $0x40] sm:$0xff]  ;;  %v4158_v60 = vld [vmem:[%s12317_s16 + $0x8] sm:$0xff] }
 0xc4f   :  { %v4042_v29 = vmul.f32 0.0, %v4041_v26  ;;  %v4044_v32 = vmul.f32 %v4041_v26, %v11184_v2  ;;  %v4047_v36 = vmul.f32 0.125, %v4046_v51  ;;  %v4049_v40 = vmul.f32 %v4046_v51, %v11186_v9  ;;  %v4159_v19 = vld [vmem:[%s12317_s16 + $0x10] sm:$0xff]  ;;  %v4160_v26 = vld [vmem:[%s12317_s16 + $0x18] sm:$0xff] }
 0xc50   :  { %v4054_v6 = vmul.f32 %v4051_v38, %v11198_v49  ;;  %v4059_v44 = vmul.f32 %v4056_v48, %v11200_v50  ;;  %v4052_v13 = vmul.f32 0.25, %v4051_v38  ;;  %v4064_v17 = vmul.f32 %v4061_v53, %v11225_v18 }
 0xc51   :  { %v4048_v12 = vadd.f32 %v4047_v36, %v4042_v29  ;;  %v4050_v47 = vadd.f32 %v4049_v40, %v4044_v32  ;;  %v4069_v21 = vmul.f32 %v4066_v58, %v11227_v22  ;;  %v4074_v52 = vmul.f32 %v4071_v63, %v11274_v46  ;;  %v4163_v32 = vld [vmem:[%s12317_s16 + $0x30] sm:$0xff]  ;;  %v4164_v36 = vld [vmem:[%s12317_s16 + $0x38] sm:$0xff] }
 0xc52   :  { %v4057_v56 = vmul.f32 0.375, %v4056_v48  ;;  %v4079_v2 = vmul.f32 %v4076_v14, %v11276_v54  ;;  %v4062_v27 = vmul.f32 0.5, %v4061_v53  ;;  %v4067_v50 = vmul.f32 0.625, %v4066_v58  ;;  %v4083_v54 = vld [vmem:[%s12315_s14] sm:$0xff]  ;;  %v4162_v58 = vld [vmem:[%s12317_s16 + $0x28] sm:$0xff] }
 0xc53   :  { %v4053_v57 = vadd.f32 %v4052_v13, %v4048_v12  ;;  %v4055_v16 = vadd.f32 %v4054_v6, %v4050_v47  ;;  %v4072_v45 = vmul.f32 0.75, %v4071_v63  ;;  %v4077_v31 = vmul.f32 0.875, %v4076_v14  ;;  %v4161_v53 = vld [vmem:[%s12317_s16 + $0x20] sm:$0xff]  ;;  %v4166_v47 = vld [vmem:[%s12317_s16 + $0x48] sm:$0xff] }
 0xc54   :  { %v11392_v15 = vpack.c.bf16 %v4158_v60, %v4157_v8  ;;  %v11401_v48 = vpack.c.bf16 %v4160_v26, %v4159_v19  ;;  %v11415_v29 = vpack.c.bf16 %v4162_v58, %v4161_v53  ;;  %v4165_v12 = vld [vmem:[%s12317_s16 + $0x40] sm:$0xff]  ;;  %v7104_v60 = vld [vmem:[%s12317_s16 + $0x168] sm:$0xff]  ;;  %v7106_v19 = vld [vmem:[%s12317_s16 + $0x178] sm:$0xff] }
 0xc55   :  { %v4058_v24 = vadd.f32 %v4057_v56, %v4053_v57  ;;  %v4060_v9 = vadd.f32 %v4059_v44, %v4055_v16  ;;  %v11427_v44 = vpack.c.bf16 %v4164_v36, %v4163_v32  ;;  %v4168_v57 = vld [vmem:[%s12317_s16 + $0x58] sm:$0xff]  ;;  %v4169_v56 = vld [vmem:[%s12317_s16 + $0x60] sm:$0xff] }
 0xc56   :  { %v7103_v8 = vld [vmem:[%s12317_s16 + $0x160] sm:$0xff]  ;;  %v7112_v32 = vld [vmem:[%s12317_s16 + $0x198] sm:$0xff] }
 0xc57   :  { %v4063_v49 = vadd.f32 %v4062_v27, %v4058_v24  ;;  %v4065_v28 = vadd.f32 %v4064_v17, %v4060_v9  ;;  %v4171_v9 = vld [vmem:[%s12317_s16 + $0x70] sm:$0xff]  ;;  %v4172_v27 = vld [vmem:[%s12317_s16 + $0x78] sm:$0xff] }
 0xc59   :  { %v4068_v30 = vadd.f32 %v4067_v50, %v4063_v49  ;;  %v4070_v42 = vadd.f32 %v4069_v21, %v4065_v28  ;;  %v11439_v21 = vpack.c.bf16 %v4166_v47, %v4165_v12  ;;  %v11469_v49 = vpack.c.bf16 %v4172_v27, %v4171_v9  ;;  %v7091_v28 = vld [vmem:[%s12317_s16 + $0x100] sm:$0xff]  ;;  %v7092_v50 = vld [vmem:[%s12317_s16 + $0x108] sm:$0xff]  ;;  %v7119_v27 = vld [vmem:[%s12317_s16 + $0x1d0] sm:$0xff] }
 0xc5a   :  { %v7113_v12 = vld [vmem:[%s12317_s16 + $0x1a0] sm:$0xff]  ;;  %v7114_v47 = vld [vmem:[%s12317_s16 + $0x1a8] sm:$0xff] }
 0xc5b   :  { %v4073_v43 = vadd.f32 %v4072_v45, %v4068_v30  ;;  %v4075_v18 = vadd.f32 %v4074_v52, %v4070_v42  ;;  %v4167_v52 = vld [vmem:[%s12317_s16 + $0x50] sm:$0xff]  ;;  %v11479_v30 = vpack.c.bf16 %v7092_v50, %v7091_v28  ;;  %v7120_v28 = vld [vmem:[%s12317_s16 + $0x1d8] sm:$0xff] }
 0xc5c   :  { %v11449_v16 = vpack.c.bf16 %v4168_v57, %v4167_v52  ;;  %v7093_v45 = vld [vmem:[%s12317_s16 + $0x110] sm:$0xff]  ;;  %v7116_v52 = vld [vmem:[%s12317_s16 + $0x1b8] sm:$0xff]  ;;  %v11618_v50 = vpack.c.bf16 %v7120_v28, %v7119_v27  ;;  %v7140_v27 = vld [vmem:[%s12317_s16 + $0x268] sm:$0xff] }
 0xc5d   :  { %v4078_v22 = vadd.f32 %v4077_v31, %v4073_v43  ;;  %v4080_v5 = vadd.f32 %v4079_v2, %v4075_v18  ;;  %v4170_v2 = vld [vmem:[%s12317_s16 + $0x68] sm:$0xff]  ;;  %v7094_v43 = vld [vmem:[%s12317_s16 + $0x118] sm:$0xff] }
 0xc5e   :  { %v11459_v24 = vpack.c.bf16 %v4170_v2, %v4169_v56  ;;  %v11491_v31 = vpack.c.bf16 %v7094_v43, %v7093_v45  ;;  %v7117_v56 = vld [vmem:[%s12317_s16 + $0x1c0] sm:$0xff]  ;;  %v7118_v2 = vld [vmem:[%s12317_s16 + $0x1c8] sm:$0xff] }
 0xc5f   :  { %4081 = vst [vmem:[%s12320_s19] sm:$0x1] %v4078_v22  ;;  %v4082_v46 = vmul.f32 0.125, %v4080_v5  ;;  %v7095_v22 = vld [vmem:[%s12317_s16 + $0x120] sm:$0xff]  ;;  %v7096_v5 = vld [vmem:[%s12317_s16 + $0x128] sm:$0xff]  ;;  %v11608_v9 = vpack.c.bf16 %v7118_v2, %v7117_v56 }
 0xc60   :  { %v7121_v45 = vld [vmem:[%s12317_s16 + $0x1e0] sm:$0xff]  ;;  %v7122_v43 = vld [vmem:[%s12317_s16 + $0x1e8] sm:$0xff] }
 0xc61   :  { %8492 = vmatpush3.msra.mxu0 %v4082_v46  ;;  %v7139_v2 = vld [vmem:[%s12317_s16 + $0x260] sm:$0xff] }
 0xc62   :  { %8494 = vmatmul.mubr.msk.f32.vlgmr.msra.gmra.mrb[26].mxu0 %vm1500_vm4, %v4083_v54  ;;  %8496 = vmatprep.subr.mxu0 %v12324_v0  ;;  %v7097_v54 = vld [vmem:[%s12317_s16 + $0x130] sm:$0xff]  ;;  %v11713_v28 = vpack.c.bf16 %v7140_v27, %v7139_v2  ;;  %v7154_v2 = vld [vmem:[%s12317_s16 + $0x2c8] sm:$0xff] }
 0xc63   :  { %8497 = vmatpush3.msra.mxu0 %v4082_v46  ;;  %8498 = vmatprep.mubr.msk.f32.mxu0 %vm10094_vm0, %v12324_v0 }
 0xc64   :  { %8571 = vmatprep.subr.mxu0 %v12324_v0 }
 0xc66   :  { %8499 = vmatmul.mubr.msk.f32.vlgmr.msra.gmra.mrb[28].mxu0 %vm1500_vm4, %v7071_v34  ;;  %v7098_v34 = vld [vmem:[%s12317_s16 + $0x138] sm:$0xff] }
 0xc67   :  { %8572 = vmatpush3.msra.mxu0 %v4082_v46  ;;  %8573 = vmatprep.mubr.msk.f32.mxu0 %vm10094_vm0, %v12324_v0 }
 0xc68   :  { %8611 = vmatprep.subr.mxu0 %v12324_v0 }
 0xc6a   :  { %8574 = vmatmul.mubr.msk.f32.vlgmr.msra.gmra.mrb[30].mxu0 %vm1500_vm4, %v7089_v37  ;;  %v11513_v37 = vpack.c.bf16 %v7098_v34, %v7097_v54  ;;  %v7127_v34 = vld [vmem:[%s12317_s16 + $0x200] sm:$0xff] }
 0xc6b   :  { %8612 = vmatpush3.msra.mxu0 %v4082_v46  ;;  %8613 = vmatprep.mubr.msk.f32.mxu0 %vm10094_vm0, %v12324_v0 }
 0xc6c   :  { %8651 = vmatprep.subr.mxu0 %v12324_v0 }
 0xc6e   :  { %8614 = vmatmul.mubr.msk.f32.vlgmr.msra.gmra.mrb[32].mxu0 %vm1500_vm4, %v7107_v39  ;;  %v7099_v39 = vld [vmem:[%s12317_s16 + $0x140] sm:$0xff] }
 0xc6f   :  { %8652 = vmatpush3.msra.mxu0 %v4082_v46  ;;  %8653 = vmatprep.mubr.msk.f32.mxu0 %vm10094_vm0, %v12324_v0 }
 0xc70   :  { %8691 = vmatprep.subr.mxu0 %v12324_v0 }
 0xc72   :  { %8654 = vmatmul.mubr.msk.f32.vlgmr.msra.gmra.mrb[34].mxu0 %vm1500_vm4, %v7125_v61  ;;  %v7100_v61 = vld [vmem:[%s12317_s16 + $0x148] sm:$0xff] }
 0xc73   :  { %8692 = vmatpush3.msra.mxu0 %v4082_v46  ;;  %8693 = vmatprep.mubr.msk.f32.mxu0 %vm10094_vm0, %v12324_v0 }
 0xc74   :  { %8731 = vmatprep.subr.mxu0 %v12324_v0 }
 0xc76   :  { %8694 = vmatmul.mubr.msk.f32.vlgmr.msra.gmra.mrb[36].mxu0 %vm1500_vm4, %v7143_v41  ;;  %v11523_v41 = vpack.c.bf16 %v7100_v61, %v7099_v39  ;;  %v7128_v39 = vld [vmem:[%s12317_s16 + $0x208] sm:$0xff] }
 0xc77   :  { %8732 = vmatpush3.msra.mxu0 %v4082_v46  ;;  %8733 = vmatprep.mubr.msk.f32.mxu0 %vm10094_vm0, %v12324_v0  ;;  %v11648_v61 = vpack.c.bf16 %v7128_v39, %v7127_v34  ;;  %v7146_v34 = vld [vmem:[%s12317_s16 + $0x288] sm:$0xff] }
 0xc78   :  { %8771 = vmatprep.subr.mxu0 %v12324_v0 }
 0xc7a   :  { %8734 = vmatmul.mubr.msk.f32.vlgmr.msra.gmra.mrb[38].mxu0 %vm1500_vm4, %v7161_v55  ;;  %v7101_v55 = vld [vmem:[%s12317_s16 + $0x150] sm:$0xff] }
 0xc7b   :  { %8772 = vmatpush3.msra.mxu0 %v4082_v46  ;;  %8773 = vmatprep.mubr.msk.f32.mxu0 %vm10094_vm0, %v12324_v0 }
 0xc7c   :  { %8811 = vmatprep.subr.mxu0 %v12324_v0 }
 0xc7e   :  { %8774 = vmatmul.mubr.msk.f32.vlgmr.msra.gmra.mrb[40].mxu0 %vm1500_vm4, %v7179_v3  ;;  %v7102_v3 = vld [vmem:[%s12317_s16 + $0x158] sm:$0xff] }
 0xc7f   :  { %8812 = vmatpush3.msra.mxu0 %v4082_v46  ;;  %8813 = vmatprep.mubr.msk.f32.mxu0 %vm10094_vm0, %v12324_v0  ;;  %v11503_v46 = vpack.c.bf16 %v7096_v5, %v7095_v22  ;;  %v7123_v22 = vld [vmem:[%s12317_s16 + $0x1f0] sm:$0xff]  ;;  %v7124_v5 = vld [vmem:[%s12317_s16 + $0x1f8] sm:$0xff] }
 0xc80   :  { %8851 = vmatprep.subr.mxu0 %v12324_v0  ;;  %v11638_v54 = vpack.c.bf16 %v7124_v5, %v7123_v22  ;;  %v7145_v5 = vld [vmem:[%s12317_s16 + $0x280] sm:$0xff] }
 0xc81   :  { %v11733_v39 = vpack.c.bf16 %v7146_v34, %v7145_v5  ;;  %v7157_v34 = vld [vmem:[%s12317_s16 + $0x2e0] sm:$0xff] }
 0xc82   :  { %8814 = vmatmul.mubr.msk.f32.vlgmr.msra.gmra.mrb[42].mxu0 %vm1500_vm4, %v7197_v59  ;;  %v11533_v59 = vpack.c.bf16 %v7102_v3, %v7101_v55  ;;  %v7129_v3 = vld [vmem:[%s12317_s16 + $0x210] sm:$0xff] }
 0xc83   :  { %8853 = vmatprep.mubr.msk.f32.mxu0 %vm10094_vm0, %v12324_v0 }
 0xd35   :  { %v4153_v1 = vpop.f32.mrb[26].mxu0 }
 0xd36   :  { %v8495_v11 = vpop.f32.mrb[27].mxu0 }
 0xd37   :  { %v7105_v11 = vld [vmem:[%s12317_s16 + $0x170] sm:$0xff] }
 0xd38   :  { %v11553_v26 = vpack.c.bf16 %v7106_v19, %v7105_v11  ;;  %v7131_v19 = vld [vmem:[%s12317_s16 + $0x220] sm:$0xff] }
 0xd39   :  { %v4244_v51 = vpop.f32.mrb[28].mxu0 }
 0xd3a   :  { %8534 = vmatmul.mubr.f32.vlgmr.msra.gmra.mrb[38].mxu1 %v4244_v51  ;;  %v8500_v38 = vpop.f32.mrb[29].mxu0  ;;  %v7109_v51 = vld [vmem:[%s12317_s16 + $0x180] sm:$0xff] }
 0xd3b   :  { %9561 = vmatpush3.bf16.msra.mxu1 %v11392_v15  ;;  %8568 = vmatprep.mubr.msk.f32.mxu1 %vm10094_vm0, %v12324_v0  ;;  %v7110_v38 = vld [vmem:[%s12317_s16 + $0x188] sm:$0xff] }
 0xd3c   :  { %9562 = vmatprep.subr.bf16.mxu1 %v10095_v7  ;;  %v11563_v53 = vpack.c.bf16 %v7110_v38, %v7109_v51  ;;  %v7132_v51 = vld [vmem:[%s12317_s16 + $0x228] sm:$0xff]  ;;  %v7133_v38 = vld [vmem:[%s12317_s16 + $0x230] sm:$0xff] }
 0xd3d   :  { %v11412_v63 = vpop.f32.mrb[30].mxu0 }
 0xd3e   :  { %v8575_v14 = vpop.f32.mrb[31].mxu0 }
 0xd3f   :  { %9564 = vmatpush3.bf16.msra.mxu1 %v11401_v48  ;;  %v7111_v14 = vld [vmem:[%s12317_s16 + $0x190] sm:$0xff] }
 0xd40   :  { %9565 = vmatprep.subr.bf16.mxu1 %v10095_v7 }
 0xd41   :  { %v11424_v40 = vpop.f32.mrb[32].mxu0 }
 0xd42   :  { %v8615_v6 = vpop.f32.mrb[33].mxu0 }
 0xd43   :  { %9567 = vmatpush3.bf16.msra.mxu1 %v11415_v29  ;;  %v11576_v6 = vpack.c.bf16 %v7112_v32, %v7111_v14  ;;  %v7134_v14 = vld [vmem:[%s12317_s16 + $0x238] sm:$0xff] }
 0xd44   :  { %9568 = vmatprep.subr.bf16.mxu1 %v10095_v7  ;;  %v11683_v32 = vpack.c.bf16 %v7134_v14, %v7133_v38  ;;  %v7149_v38 = vld [vmem:[%s12317_s16 + $0x2a0] sm:$0xff]  ;;  %v7150_v14 = vld [vmem:[%s12317_s16 + $0x2a8] sm:$0xff] }
 0xd45   :  { %v11436_v13 = vpop.f32.mrb[34].mxu0 }
 0xd46   :  { %v8655_v17 = vpop.f32.mrb[35].mxu0 }
 0xd47   :  { %9570 = vmatpush3.bf16.msra.mxu1 %v11427_v44  ;;  %v7115_v17 = vld [vmem:[%s12317_s16 + $0x1b0] sm:$0xff] }
 0xd48   :  { %9571 = vmatprep.subr.bf16.mxu1 %v10095_v7  ;;  %v11598_v57 = vpack.c.bf16 %v7116_v52, %v7115_v17  ;;  %v7137_v17 = vld [vmem:[%s12317_s16 + $0x250] sm:$0xff]  ;;  %v7138_v52 = vld [vmem:[%s12317_s16 + $0x258] sm:$0xff] }
 0xd49   :  { %v11481_v42 = vpop.f32.mrb[36].mxu0  ;;  %v11703_v56 = vpack.c.bf16 %v7138_v52, %v7137_v17  ;;  %v7153_v52 = vld [vmem:[%s12317_s16 + $0x2c0] sm:$0xff] }
 0xd4a   :  { %v8695_v18 = vpop.f32.mrb[37].mxu0  ;;  %v11778_v27 = vpack.c.bf16 %v7154_v2, %v7153_v52  ;;  %v7165_v2 = vld [vmem:[%s12317_s16 + $0x310] sm:$0xff] }
 0xd4b   :  { %9573 = vmatpush3.bf16.msra.mxu1 %v11439_v21  ;;  %v11628_v18 = vpack.c.bf16 %v7122_v43, %v7121_v45  ;;  %v7141_v45 = vld [vmem:[%s12317_s16 + $0x270] sm:$0xff]  ;;  %v7142_v43 = vld [vmem:[%s12317_s16 + $0x278] sm:$0xff] }
 0xd4c   :  { %9574 = vmatprep.subr.bf16.mxu1 %v10095_v7  ;;  %v11723_v22 = vpack.c.bf16 %v7142_v43, %v7141_v45  ;;  %v7155_v45 = vld [vmem:[%s12317_s16 + $0x2d0] sm:$0xff]  ;;  %v7156_v43 = vld [vmem:[%s12317_s16 + $0x2d8] sm:$0xff] }
 0xd4d   :  { %v11565_v58 = vpop.f32.mrb[38].mxu0  ;;  %v11788_v5 = vpack.c.bf16 %v7156_v43, %v7155_v45  ;;  %v7166_v45 = vld [vmem:[%s12317_s16 + $0x318] sm:$0xff] }
 0xd4e   :  { %v8735_v36 = vpop.f32.mrb[39].mxu0  ;;  %v11829_v43 = vpack.c.bf16 %v7166_v45, %v7165_v2  ;;  %v7172_v2 = vld [vmem:[%s12317_s16 + $0x348] sm:$0xff] }
 0xd4f   :  { %9576 = vmatpush3.bf16.msra.mxu1 %v11449_v16  ;;  %v7135_v36 = vld [vmem:[%s12317_s16 + $0x240] sm:$0xff] }
 0xd50   :  { %9577 = vmatprep.subr.bf16.mxu1 %v10095_v7 }
 0xd51   :  { %v11650_v55 = vpop.f32.mrb[40].mxu0 }
 0xd53   :  { %9579 = vmatpush3.bf16.msra.mxu1 %v11459_v24 }
 0xd54   :  { %9580 = vmatprep.subr.bf16.mxu1 %v10095_v7 }
 0xd57   :  { %9582 = vmatpush3.bf16.msra.mxu1 %v11469_v49 }
 0xd58   :  { %9583 = vmatprep.subr.bf16.mxu1 %v10095_v7 }
 0xd5a   :  { %8569 = vmatmul.mubr.f32.vlgmr.msra.gmra.mrb[38].mxu1 %v4153_v1  ;;  %v11543_v1 = vpack.c.bf16 %v7104_v60, %v7103_v8  ;;  %v7130_v8 = vld [vmem:[%s12317_s16 + $0x218] sm:$0xff]  ;;  %v8775_v60 = vpop.f32.mrb[41].mxu0 }
 0xd5b   :  { %9585 = vmatpush3.bf16.msra.mxu1 %v11479_v30  ;;  %8608 = vmatprep.mubr.msk.f32.mxu1 %vm10094_vm0, %v12324_v0  ;;  %v11661_v11 = vpack.c.bf16 %v7130_v8, %v7129_v3  ;;  %v7147_v3 = vld [vmem:[%s12317_s16 + $0x290] sm:$0xff]  ;;  %v7148_v8 = vld [vmem:[%s12317_s16 + $0x298] sm:$0xff]  ;;  %v11742_v60 = vpop.f32.mrb[42].mxu0 }
 0xd5c   :  { %9586 = vmatprep.subr.bf16.mxu1 %v10095_v7 }
 0xd5f   :  { %9588 = vmatpush3.bf16.msra.mxu1 %v11491_v31 }
 0xd60   :  { %9589 = vmatprep.subr.bf16.mxu1 %v10095_v7 }
 0xd63   :  { %9591 = vmatpush3.bf16.msra.mxu1 %v11503_v46 }
 0xd64   :  { %9592 = vmatprep.subr.bf16.mxu1 %v10095_v7 }
 0xd67   :  { %9594 = vmatpush3.bf16.msra.mxu1 %v11513_v37 }
 0xd68   :  { %9595 = vmatprep.subr.bf16.mxu1 %v10095_v7 }
 0xd6b   :  { %9597 = vmatpush3.bf16.msra.mxu1 %v11523_v41 }
 0xd6c   :  { %9598 = vmatprep.subr.bf16.mxu1 %v10095_v7 }
 0xd6f   :  { %9600 = vmatpush3.bf16.msra.mxu1 %v11533_v59 }
 0xd70   :  { %9601 = vmatprep.subr.bf16.mxu1 %v10095_v7 }
 0xd73   :  { %9603 = vmatpush3.bf16.msra.mxu1 %v11543_v1 }
 0xd74   :  { %9604 = vmatprep.subr.bf16.mxu1 %v10095_v7 }
 0xd77   :  { %9606 = vmatpush3.bf16.msra.mxu1 %v11553_v26 }
 0xd78   :  { %9607 = vmatprep.subr.bf16.mxu1 %v10095_v7 }
 0xd7a   :  { %8609 = vmatmul.mubr.f32.vlgmr.msra.gmra.mrb[38].mxu1 %v11412_v63  ;;  %v11588_v63 = vpack.c.bf16 %v7114_v47, %v7113_v12  ;;  %v7136_v12 = vld [vmem:[%s12317_s16 + $0x248] sm:$0xff] }
 0xd7b   :  { %9609 = vmatpush3.bf16.msra.mxu1 %v11563_v53  ;;  %8648 = vmatprep.mubr.msk.f32.mxu1 %vm10094_vm0, %v12324_v0  ;;  %v11693_v47 = vpack.c.bf16 %v7136_v12, %v7135_v36  ;;  %v7151_v36 = vld [vmem:[%s12317_s16 + $0x2b0] sm:$0xff]  ;;  %v7152_v12 = vld [vmem:[%s12317_s16 + $0x2b8] sm:$0xff] }
 0xd7c   :  { %9610 = vmatprep.subr.bf16.mxu1 %v10095_v7  ;;  %v11768_v17 = vpack.c.bf16 %v7152_v12, %v7151_v36  ;;  %v7163_v36 = vld [vmem:[%s12317_s16 + $0x300] sm:$0xff]  ;;  %v7164_v12 = vld [vmem:[%s12317_s16 + $0x308] sm:$0xff] }
 0xd7d   :  { %v11818_v52 = vpack.c.bf16 %v7164_v12, %v7163_v36  ;;  %v7171_v12 = vld [vmem:[%s12317_s16 + $0x340] sm:$0xff] }
 0xd7e   :  { %v11861_v45 = vpack.c.bf16 %v7172_v2, %v7171_v12  ;;  %v7176_v12 = vld [vmem:[%s12317_s16 + $0x368] sm:$0xff] }
 0xd7f   :  { %9612 = vmatpush3.bf16.msra.mxu1 %v11576_v6 }
 0xd80   :  { %9613 = vmatprep.subr.bf16.mxu1 %v10095_v7  ;;  %12349 = vst [vmem:[#allocation5_spill] sm:$0xff] %v11861_v45 }
 0xd83   :  { %9615 = vmatpush3.bf16.msra.mxu1 %v11588_v63 }
 0xd84   :  { %9616 = vmatprep.subr.bf16.mxu1 %v10095_v7 }
 0xd87   :  { %9618 = vmatpush3.bf16.msra.mxu1 %v11598_v57 }
 0xd88   :  { %9619 = vmatprep.subr.bf16.mxu1 %v10095_v7 }
 0xd8b   :  { %9621 = vmatpush3.bf16.msra.mxu1 %v11608_v9 }
 0xd8c   :  { %9622 = vmatprep.subr.bf16.mxu1 %v10095_v7 }
 0xd8f   :  { %9624 = vmatpush3.bf16.msra.mxu1 %v11618_v50 }
 0xd90   :  { %9625 = vmatprep.subr.bf16.mxu1 %v10095_v7 }
 0xd93   :  { %9627 = vmatpush3.bf16.msra.mxu1 %v11628_v18 }
 0xd94   :  { %9628 = vmatprep.subr.bf16.mxu1 %v10095_v7 }
 0xd97   :  { %9630 = vmatpush3.bf16.msra.mxu1 %v11638_v54 }
 0xd98   :  { %9631 = vmatprep.subr.bf16.mxu1 %v10095_v7 }
 0xd9a   :  { %8649 = vmatmul.mubr.f32.vlgmr.msra.gmra.mrb[38].mxu1 %v11424_v40  ;;  %v11673_v40 = vpack.c.bf16 %v7132_v51, %v7131_v19  ;;  %v8815_v19 = vpop.f32.mrb[43].mxu0  ;;  %v11746_v51 = vpack.c.bf16 %v7148_v8, %v7147_v3  ;;  %v7158_v3 = vld [vmem:[%s12317_s16 + $0x2e8] sm:$0xff] }
 0xd9b   :  { %9633 = vmatpush3.bf16.msra.mxu1 %v11648_v61  ;;  %8688 = vmatprep.mubr.msk.f32.mxu1 %vm10094_vm0, %v12324_v0  ;;  %v11798_v8 = vpack.c.bf16 %v7158_v3, %v7157_v34  ;;  %v7159_v19 = vld [vmem:[%s12317_s16 + $0x2f0] sm:$0xff]  ;;  %v7167_v34 = vld [vmem:[%s12317_s16 + $0x320] sm:$0xff]  ;;  %v7168_v3 = vld [vmem:[%s12317_s16 + $0x328] sm:$0xff] }
 0xd9c   :  { %9634 = vmatprep.subr.bf16.mxu1 %v10095_v7 }
 0xd9f   :  { %9636 = vmatpush3.bf16.msra.mxu1 %v11661_v11 }
 0xda0   :  { %9637 = vmatprep.subr.bf16.mxu1 %v10095_v7 }
 0xda3   :  { %9639 = vmatpush3.bf16.msra.mxu1 %v11673_v40 }
 0xda4   :  { %9640 = vmatprep.subr.bf16.mxu1 %v10095_v7 }
 0xda7   :  { %9642 = vmatpush3.bf16.msra.mxu1 %v11683_v32 }
 0xda8   :  { %9643 = vmatprep.subr.bf16.mxu1 %v10095_v7 }
 0xdab   :  { %9645 = vmatpush3.bf16.msra.mxu1 %v11693_v47 }
 0xdac   :  { %9646 = vmatprep.subr.bf16.mxu1 %v10095_v7 }
 0xdaf   :  { %9648 = vmatpush3.bf16.msra.mxu1 %v11703_v56 }
 0xdb0   :  { %9649 = vmatprep.subr.bf16.mxu1 %v10095_v7 }
 0xdb3   :  { %9651 = vmatpush3.bf16.msra.mxu1 %v11713_v28 }
 0xdb4   :  { %9652 = vmatprep.subr.bf16.mxu1 %v10095_v7 }
 0xdb7   :  { %9654 = vmatpush3.bf16.msra.mxu1 %v11723_v22 }
 0xdb8   :  { %9655 = vmatprep.subr.bf16.mxu1 %v10095_v7 }
 0xdba   :  { %8689 = vmatmul.mubr.f32.vlgmr.msra.gmra.mrb[38].mxu1 %v11436_v13  ;;  %v11758_v13 = vpack.c.bf16 %v7150_v14, %v7149_v38  ;;  %v7160_v38 = vld [vmem:[%s12317_s16 + $0x2f8] sm:$0xff] }
 0xdbb   :  { %9657 = vmatpush3.bf16.msra.mxu1 %v11733_v39  ;;  %8728 = vmatprep.mubr.msk.f32.mxu1 %vm10094_vm0, %v12324_v0  ;;  %v11808_v14 = vpack.c.bf16 %v7160_v38, %v7159_v19  ;;  %v7169_v19 = vld [vmem:[%s12317_s16 + $0x330] sm:$0xff]  ;;  %v7170_v38 = vld [vmem:[%s12317_s16 + $0x338] sm:$0xff] }
 0xdbc   :  { %9658 = vmatprep.subr.bf16.mxu1 %v10095_v7  ;;  %v11851_v36 = vpack.c.bf16 %v7170_v38, %v7169_v19  ;;  %v7175_v38 = vld [vmem:[%s12317_s16 + $0x360] sm:$0xff] }
 0xdbd   :  { %v11881_v2 = vpack.c.bf16 %v7176_v12, %v7175_v38  ;;  %v7181_v38 = vld [vmem:[%s12317_s16 + $0x380] sm:$0xff]  ;;  %v7182_v12 = vld [vmem:[%s12317_s16 + $0x388] sm:$0xff] }
 0xdbf   :  { %9660 = vmatpush3.bf16.msra.mxu1 %v11746_v51  ;;  %12351 = vst [vmem:[#allocation7_spill] sm:$0xff] %v11881_v2 }
 0xdc0   :  { %9661 = vmatprep.subr.bf16.mxu1 %v10095_v7 }
 0xdc3   :  { %9663 = vmatpush3.bf16.msra.mxu1 %v11758_v13 }
 0xdc4   :  { %9664 = vmatprep.subr.bf16.mxu1 %v10095_v7 }
 0xdc7   :  { %9666 = vmatpush3.bf16.msra.mxu1 %v11768_v17 }
 0xdc8   :  { %9667 = vmatprep.subr.bf16.mxu1 %v10095_v7 }
 0xdcb   :  { %9669 = vmatpush3.bf16.msra.mxu1 %v11778_v27 }
 0xdcc   :  { %9670 = vmatprep.subr.bf16.mxu1 %v10095_v7 }
 0xdcf   :  { %9672 = vmatpush3.bf16.msra.mxu1 %v11788_v5 }
 0xdd0   :  { %9673 = vmatprep.subr.bf16.mxu1 %v10095_v7 }
 0xdd3   :  { %9675 = vmatpush3.bf16.msra.mxu1 %v11798_v8 }
 0xdd4   :  { %9676 = vmatprep.subr.bf16.mxu1 %v10095_v7 }
 0xdd7   :  { %9678 = vmatpush3.bf16.msra.mxu1 %v11808_v14 }
 0xdd8   :  { %9679 = vmatprep.subr.bf16.mxu1 %v10095_v7 }
 0xdda   :  { %8729 = vmatmul.mubr.f32.vlgmr.msra.gmra.mrb[38].mxu1 %v11481_v42  ;;  %v11841_v42 = vpack.c.bf16 %v7168_v3, %v7167_v34  ;;  %v7173_v34 = vld [vmem:[%s12317_s16 + $0x350] sm:$0xff]  ;;  %v7174_v3 = vld [vmem:[%s12317_s16 + $0x358] sm:$0xff] }
 0xddb   :  { %9681 = vmatpush3.bf16.msra.mxu1 %v11818_v52  ;;  %8768 = vmatprep.mubr.msk.f32.mxu1 %vm10094_vm0, %v12324_v0  ;;  %v11871_v19 = vpack.c.bf16 %v7174_v3, %v7173_v34  ;;  %v7177_v34 = vld [vmem:[%s12317_s16 + $0x370] sm:$0xff]  ;;  %v7178_v3 = vld [vmem:[%s12317_s16 + $0x378] sm:$0xff] }
 0xddc   :  { %9682 = vmatprep.subr.bf16.mxu1 %v10095_v7  ;;  %v11891_v0 = vpack.c.bf16 %v7178_v3, %v7177_v34  ;;  %v7183_v34 = vld [vmem:[%s12317_s16 + $0x390] sm:$0xff]  ;;  %v7184_v3 = vld [vmem:[%s12317_s16 + $0x398] sm:$0xff] }
 0xddd   :  { %12350 = vst [vmem:[#allocation6_spill] sm:$0xff] %v11871_v19 }
 0xddf   :  { %9684 = vmatpush3.bf16.msra.mxu1 %v11829_v43 }
 0xde0   :  { %9685 = vmatprep.subr.bf16.mxu1 %v10095_v7 }
 0xde3   :  { %9687 = vmatpush3.bf16.msra.mxu1 %v11841_v42 }
 0xde4   :  { %9688 = vmatprep.subr.bf16.mxu1 %v10095_v7 }
 0xde7   :  { %9690 = vmatpush3.bf16.msra.mxu1 %v11851_v36 }
 0xde8   :  { %9691 = vmatprep.subr.bf16.mxu1 %v10095_v7 }
 0xdeb   :  { %9693 = vmatpush3.bf16.msra.mxu1 %v11861_v45  ;;  %v12354_v45 = vmov 0.0  }
 0xdec   :  { %9694 = vmatprep.subr.bf16.mxu1 %v10095_v7 }
 0xdef   :  { %9696 = vmatpush3.bf16.msra.mxu1 %v11871_v19  ;;  %v11901_v19 = vpack.c.bf16 %v7182_v12, %v7181_v38  ;;  %v7185_v38 = vld [vmem:[%s12317_s16 + $0x3a0] sm:$0xff]  ;;  %v7186_v12 = vld [vmem:[%s12317_s16 + $0x3a8] sm:$0xff] }
 0xdf0   :  { %9697 = vmatprep.subr.bf16.mxu1 %v10095_v7 }
 0xdf1   :  { %12352 = vst [vmem:[#allocation8_spill] sm:$0xff] %v11901_v19 }
 0xdf3   :  { %9699 = vmatpush3.bf16.msra.mxu1 %v11881_v2  ;;  %v11912_v2 = vpack.c.bf16 %v7184_v3, %v7183_v34  ;;  %v7187_v34 = vld [vmem:[%s12317_s16 + $0x3b0] sm:$0xff]  ;;  %v7188_v3 = vld [vmem:[%s12317_s16 + $0x3b8] sm:$0xff] }
 0xdf4   :  { %9700 = vmatprep.subr.bf16.mxu1 %v10095_v7 }
 0xdf5   :  { %12353 = vst [vmem:[#allocation9_spill] sm:$0xff] %v11912_v2 }
 0xdf7   :  { %9702 = vmatpush3.bf16.msra.mxu1 %v11891_v0 }
 0xdf8   :  { %9703 = vmatprep.subr.bf16.mxu1 %v10095_v7 }
 0xdfa   :  { %8769 = vmatmul.mubr.f32.vlgmr.msra.gmra.mrb[38].mxu1 %v11565_v58  ;;  %v11924_v58 = vpack.c.bf16 %v7186_v12, %v7185_v38  ;;  %v7189_v38 = vld [vmem:[%s12317_s16 + $0x3c0] sm:$0xff]  ;;  %v7190_v12 = vld [vmem:[%s12317_s16 + $0x3c8] sm:$0xff] }
 0xdfb   :  { %9705 = vmatpush3.bf16.msra.mxu1 %v11901_v19  ;;  %8808 = vmatprep.mubr.msk.f32.mxu1 %vm10094_vm0, %v12354_v45  ;;  %v11934_v19 = vpack.c.bf16 %v7188_v3, %v7187_v34  ;;  %v7191_v34 = vld [vmem:[%s12317_s16 + $0x3d0] sm:$0xff]  ;;  %v7192_v3 = vld [vmem:[%s12317_s16 + $0x3d8] sm:$0xff] }
 0xdfc   :  { %9706 = vmatprep.subr.bf16.mxu1 %v10095_v7  ;;  %12355 = vst [vmem:[#allocation10_spill] sm:$0xff] %v11924_v58 }
 0xdfd   :  { %12356 = vst [vmem:[#allocation11_spill] sm:$0xff] %v11934_v19 }
 0xdff   :  { %9708 = vmatpush3.bf16.msra.mxu1 %v11912_v2  ;;  %v11944_v2 = vpack.c.bf16 %v7190_v12, %v7189_v38  ;;  %v7193_v38 = vld [vmem:[%s12317_s16 + $0x3e0] sm:$0xff]  ;;  %v7194_v12 = vld [vmem:[%s12317_s16 + $0x3e8] sm:$0xff] }
 0xe00   :  { %9709 = vmatprep.subr.bf16.mxu1 %v10095_v7 }
 0xe01   :  { %12357 = vst [vmem:[#allocation12_spill] sm:$0xff] %v11944_v2 }
 0xe03   :  { %9711 = vmatpush3.bf16.msra.mxu1 %v11924_v58  ;;  %v11954_v58 = vpack.c.bf16 %v7192_v3, %v7191_v34  ;;  %v7195_v34 = vld [vmem:[%s12317_s16 + $0x3f0] sm:$0xff]  ;;  %v7196_v3 = vld [vmem:[%s12317_s16 + $0x3f8] sm:$0xff] }
 0xe04   :  { %9712 = vmatprep.subr.bf16.mxu1 %v10095_v7 }
 0xe05   :  { %12358 = vst [vmem:[#allocation13_spill] sm:$0xff] %v11954_v58 }
 0xe07   :  { %9714 = vmatpush3.bf16.msra.mxu1 %v11934_v19  ;;  %v11964_v19 = vpack.c.bf16 %v7194_v12, %v7193_v38  ;;  %v7199_v38 = vld [vmem:[%s12317_s16 + $0x400] sm:$0xff]  ;;  %v7200_v12 = vld [vmem:[%s12317_s16 + $0x408] sm:$0xff] }
 0xe08   :  { %9715 = vmatprep.subr.bf16.mxu1 %v10095_v7 }
 0xe09   :  { %12359 = vst [vmem:[#allocation14_spill] sm:$0xff] %v11964_v19 }
 0xe0b   :  { %9717 = vmatpush3.bf16.msra.mxu1 %v11944_v2  ;;  %v11974_v2 = vpack.c.bf16 %v7196_v3, %v7195_v34  ;;  %v7201_v34 = vld [vmem:[%s12317_s16 + $0x410] sm:$0xff]  ;;  %v7202_v3 = vld [vmem:[%s12317_s16 + $0x418] sm:$0xff] }
 0xe0c   :  { %9718 = vmatprep.subr.bf16.mxu1 %v10095_v7 }
 0xe0f   :  { %9720 = vmatpush3.bf16.msra.mxu1 %v11954_v58  ;;  %v11984_v58 = vpack.c.bf16 %v7200_v12, %v7199_v38  ;;  %v7203_v38 = vld [vmem:[%s12317_s16 + $0x420] sm:$0xff]  ;;  %v7204_v12 = vld [vmem:[%s12317_s16 + $0x428] sm:$0xff] }
 0xe10   :  { %9721 = vmatprep.subr.bf16.mxu1 %v10095_v7 }
 0xe11   :  { %12360 = vst [vmem:[#allocation15_spill] sm:$0xff] %v11984_v58 }
 0xe13   :  { %9723 = vmatpush3.bf16.msra.mxu1 %v11964_v19  ;;  %v11995_v19 = vpack.c.bf16 %v7202_v3, %v7201_v34  ;;  %v7205_v34 = vld [vmem:[%s12317_s16 + $0x430] sm:$0xff]  ;;  %v7206_v3 = vld [vmem:[%s12317_s16 + $0x438] sm:$0xff] }
 0xe14   :  { %9724 = vmatprep.subr.bf16.mxu1 %v10095_v7 }
 0xe15   :  { %12361 = vst [vmem:[#allocation16_spill] sm:$0xff] %v11995_v19 }
 0xe17   :  { %9726 = vmatpush3.bf16.msra.mxu1 %v11974_v2 }
 0xe18   :  { %9727 = vmatprep.subr.bf16.mxu1 %v10095_v7 }
 0xe1a   :  { %8809 = vmatmul.mubr.f32.vlgmr.msra.gmra.mrb[38].mxu1 %v11650_v55  ;;  %v12007_v55 = vpack.c.bf16 %v7204_v12, %v7203_v38  ;;  %v7207_v38 = vld [vmem:[%s12317_s16 + $0x440] sm:$0xff]  ;;  %v7208_v12 = vld [vmem:[%s12317_s16 + $0x448] sm:$0xff] }
 0xe1b   :  { %9729 = vmatpush3.bf16.msra.mxu1 %v11984_v58  ;;  %8848 = vmatprep.mubr.msk.f32.mxu1 %vm10094_vm0, %v12354_v45  ;;  %v12017_v58 = vpack.c.bf16 %v7206_v3, %v7205_v34  ;;  %v7209_v34 = vld [vmem:[%s12317_s16 + $0x450] sm:$0xff]  ;;  %v7210_v3 = vld [vmem:[%s12317_s16 + $0x458] sm:$0xff] }
 0xe1c   :  { %9730 = vmatprep.subr.bf16.mxu1 %v10095_v7  ;;  %12362 = vst [vmem:[#allocation17_spill] sm:$0xff] %v12007_v55 }
 0xe1d   :  { %12363 = vst [vmem:[#allocation18_spill] sm:$0xff] %v12017_v58 }
 0xe1f   :  { %9732 = vmatpush3.bf16.msra.mxu1 %v11995_v19  ;;  %v12027_v19 = vpack.c.bf16 %v7208_v12, %v7207_v38  ;;  %v7211_v38 = vld [vmem:[%s12317_s16 + $0x460] sm:$0xff]  ;;  %v7212_v12 = vld [vmem:[%s12317_s16 + $0x468] sm:$0xff] }
 0xe20   :  { %9733 = vmatprep.subr.bf16.mxu1 %v10095_v7 }
 0xe21   :  { %12364 = vst [vmem:[#allocation19_spill] sm:$0xff] %v12027_v19 }
 0xe23   :  { %9735 = vmatpush3.bf16.msra.mxu1 %v12007_v55  ;;  %v12037_v55 = vpack.c.bf16 %v7210_v3, %v7209_v34  ;;  %v7213_v34 = vld [vmem:[%s12317_s16 + $0x470] sm:$0xff]  ;;  %v7214_v3 = vld [vmem:[%s12317_s16 + $0x478] sm:$0xff] }
 0xe24   :  { %9736 = vmatprep.subr.bf16.mxu1 %v10095_v7 }
 0xe27   :  { %9738 = vmatpush3.bf16.msra.mxu1 %v12017_v58  ;;  %v12047_v58 = vpack.c.bf16 %v7212_v12, %v7211_v38 }
 0xe28   :  { %9739 = vmatprep.subr.bf16.mxu1 %v10095_v7 }
 0xe2b   :  { %9741 = vmatpush3.bf16.msra.mxu1 %v12027_v19  ;;  %v12057_v19 = vpack.c.bf16 %v7214_v3, %v7213_v34 }
 0xe2c   :  { %9742 = vmatprep.subr.bf16.mxu1 %v10095_v7 }
 0xe2f   :  { %9744 = vmatpush3.bf16.msra.mxu1 %v12037_v55 }
 0xe30   :  { %9745 = vmatprep.subr.bf16.mxu1 %v10095_v7 }
 0xe33   :  { %9747 = vmatpush3.bf16.msra.mxu1 %v12047_v58 }
 0xe34   :  { %9748 = vmatprep.subr.bf16.mxu1 %v10095_v7 }
 0xe37   :  { %9750 = vmatpush3.bf16.msra.mxu1 %v12057_v19 }
 0xe38   :  { %9751 = vmatprep.subr.bf16.mxu1 %v10095_v7 }
 0xe3a   :  { %8849 = vmatmul.mubr.f32.vlgmr.msra.gmra.mrb[38].mxu1 %v11742_v60  ;;  %v12375_v60 = vld [vmem:[#allocation15_spill] sm:$0xff] }
 0xe3b   :  { %9753 = vmatpush3.bf16.msra.mxu1 %v11220_v10  ;;  %8893 = vmatprep.mubr.msk.f32.mxu1 %vm10094_vm0, %v12354_v45 }
 0xe3c   :  { %9754 = vmatprep.subr.bf16.mxu1 %v10095_v7 }
 0xe3f   :  { %9756 = vmatpush3.bf16.msra.mxu1 %v11235_v4 }
 0xe40   :  { %9757 = vmatprep.subr.bf16.mxu1 %v10095_v7 }
 0xe43   :  { %9759 = vmatpush3.bf16.msra.mxu1 %v11245_v20 }
 0xe44   :  { %9760 = vmatprep.subr.bf16.mxu1 %v10095_v7 }
 0xe47   :  { %9762 = vmatpush3.bf16.msra.mxu1 %v11255_v23  ;;  %v5547_v23 = vld [vmem:[%s12316_s15] sm:$0x7] }
 0xe48   :  { %9763 = vmatprep.subr.bf16.mxu1 %v10095_v7 }
 0xe4b   :  { %9765 = vmatpush3.bf16.msra.mxu1 %v11265_v35  ;;  %v7216_v35 = vld [vmem:[%s12316_s15 + $0x4] sm:$0x7] }
 0xe4c   :  { %9766 = vmatprep.subr.bf16.mxu1 %v10095_v7 }
 0xe4f   :  { %9768 = vmatpush3.bf16.msra.mxu1 %v11283_v62 }
 0xe50   :  { %9769 = vmatprep.subr.bf16.mxu1 %v10095_v7 }
 0xe53   :  { %9771 = vmatpush3.bf16.msra.mxu1 %v11293_v33 }
 0xe54   :  { %9772 = vmatprep.subr.bf16.mxu1 %v10095_v7 }
 0xe57   :  { %9774 = vmatpush3.bf16.msra.mxu1 %v11303_v25  ;;  %v7218_v25 = vld [vmem:[%s12316_s15 + $0x8] sm:$0x7] }
 0xe58   :  { %9171 = vmatprep.subr.mxu1 %v12354_v45 }
 0xf0d   :  { %v5541_v10 = vpop.f32.mrb[38].mxu1 }
 0xf0e   :  { %v12081_v4 = vmax.f32 %v5541_v10, 0.0  ;;  %v8850_v20 = vpop.f32.mrb[39].mxu1 }
 0xf10   :  { %8852 = vmatpush3.msra.mxu0 %v12081_v4 }
 0xf11   :  { %8854 = vmatmul.mubr.msk.f32.vlgmr.msra.gmra.mrb[44].mxu0 %vm1500_vm4, %v5547_v23  ;;  %8856 = vmatprep.subr.mxu0 %v12354_v45 }
 0xf12   :  { %8857 = vmatpush3.msra.mxu0 %v12081_v4  ;;  %8858 = vmatprep.mubr.msk.f32.mxu0 %vm10094_vm0, %v12354_v45 }
 0xf13   :  { %9775 = vmatprep.subr.bf16.mxu0 %v10095_v7 }
 0xf15   :  { %8859 = vmatmul.mubr.msk.f32.vlgmr.msra.gmra.mrb[46].mxu0 %vm1500_vm4, %v7216_v35 }
 0xf16   :  { %9777 = vmatpush3.bf16.msra.mxu0 %v11392_v15  ;;  %8928 = vmatprep.mubr.msk.f32.mxu0 %vm10094_vm0, %v12354_v45 }
 0xf17   :  { %9778 = vmatprep.subr.bf16.mxu0 %v10095_v7 }
 0xf1a   :  { %9780 = vmatpush3.bf16.msra.mxu0 %v11401_v48 }
 0xf1b   :  { %9781 = vmatprep.subr.bf16.mxu0 %v10095_v7 }
 0xf1e   :  { %9783 = vmatpush3.bf16.msra.mxu0 %v11415_v29 }
 0xf1f   :  { %9784 = vmatprep.subr.bf16.mxu0 %v10095_v7 }
 0xf22   :  { %9786 = vmatpush3.bf16.msra.mxu0 %v11427_v44 }
 0xf23   :  { %9787 = vmatprep.subr.bf16.mxu0 %v10095_v7 }
 0xf26   :  { %9789 = vmatpush3.bf16.msra.mxu0 %v11439_v21 }
 0xf27   :  { %9790 = vmatprep.subr.bf16.mxu0 %v10095_v7 }
 0xf2a   :  { %9792 = vmatpush3.bf16.msra.mxu0 %v11449_v16 }
 0xf2b   :  { %9793 = vmatprep.subr.bf16.mxu0 %v10095_v7 }
 0xf2e   :  { %9795 = vmatpush3.bf16.msra.mxu0 %v11459_v24  ;;  %v7220_v24 = vld [vmem:[%s12316_s15 + $0xc] sm:$0x7] }
 0xf2f   :  { %9796 = vmatprep.subr.bf16.mxu0 %v10095_v7 }
 0xf32   :  { %9798 = vmatpush3.bf16.msra.mxu0 %v11469_v49 }
 0xf33   :  { %8931 = vmatprep.subr.mxu0 %v12354_v45 }
 0xfe4   :  { %v5617_v62 = vpop.f32.mrb[44].mxu0 }
 0xfe5   :  { %8929 = vmatmul.mubr.f32.vlgmr.msra.gmra.mrb[48].mxu0 %v5617_v62  ;;  %v8855_v33 = vpop.f32.mrb[45].mxu0 }
 0xfe6   :  { %8932 = vmatpush3.msra.mxu0 %v12081_v4  ;;  %8933 = vmatprep.mubr.msk.f32.mxu0 %vm10094_vm0, %v12354_v45 }
 0xfe7   :  { %9799 = vmatprep.subr.bf16.mxu0 %v10095_v7 }
 0xfe8   :  { %v5692_v15 = vpop.f32.mrb[46].mxu0 }
 0xfe9   :  { %8894 = vmatmul.mubr.f32.vlgmr.msra.gmra.mrb[40].mxu1 %v5692_v15  ;;  %8934 = vmatmul.mubr.msk.f32.vlgmr.msra.gmra.mrb[50].mxu0 %vm1500_vm4, %v7218_v25  ;;  %v8860_v48 = vpop.f32.mrb[47].mxu0 }
 0xfea   :  { %9172 = vmatpush3.msra.mxu1 %v12081_v4  ;;  %9801 = vmatpush3.bf16.msra.mxu0 %v11479_v30 }
 0xfeb   :  { %9802 = vmatprep.subr.bf16.mxu0 %v10095_v7  ;;  %8968 = vmatprep.mubr.msk.f32.mxu0 %vm10094_vm0, %v12354_v45 }
 0xfec   :  { %9173 = vmatprep.mubr.msk.f32.mxu1 %vm10094_vm0, %v12354_v45 }
 0xfee   :  { %9804 = vmatpush3.bf16.msra.mxu0 %v11491_v31  ;;  %v7222_v31 = vld [vmem:[%s12316_s15 + $0x10] sm:$0x7] }
 0xfef   :  { %9805 = vmatprep.subr.bf16.mxu0 %v10095_v7 }
 0xff2   :  { %9807 = vmatpush3.bf16.msra.mxu0 %v11503_v46 }
 0xff3   :  { %9808 = vmatprep.subr.bf16.mxu0 %v10095_v7 }
 0xff6   :  { %9810 = vmatpush3.bf16.msra.mxu0 %v11513_v37 }
 0xff7   :  { %9811 = vmatprep.subr.bf16.mxu0 %v10095_v7 }
 0xffa   :  { %9813 = vmatpush3.bf16.msra.mxu0 %v11523_v41  ;;  %v7224_v41 = vld [vmem:[%s12316_s15 + $0x14] sm:$0x7] }
 0xffb   :  { %9814 = vmatprep.subr.bf16.mxu0 %v10095_v7 }
 0xffe   :  { %9816 = vmatpush3.bf16.msra.mxu0 %v11533_v59 }
 0xfff   :  { %9817 = vmatprep.subr.bf16.mxu0 %v10095_v7 }
0x1002   :  { %9819 = vmatpush3.bf16.msra.mxu0 %v11543_v1 }
0x1003   :  { %9820 = vmatprep.subr.bf16.mxu0 %v10095_v7 }
0x1006   :  { %9822 = vmatpush3.bf16.msra.mxu0 %v11553_v26  ;;  %v7226_v26 = vld [vmem:[%s12316_s15 + $0x18] sm:$0x7] }
0x1007   :  { %8971 = vmatprep.subr.mxu0 %v12354_v45 }
0x10bc   :  { %v5907_v29 = vpop.f32.mrb[50].mxu0  ;;  %v12144_v44 = vpop.f32.mrb[40].mxu1 }
0x10bd   :  { %8969 = vmatmul.mubr.f32.vlgmr.msra.gmra.mrb[48].mxu0 %v5907_v29  ;;  %v8935_v21 = vpop.f32.mrb[51].mxu0  ;;  %v8895_v16 = vpop.f32.mrb[41].mxu1 }
0x10be   :  { %8972 = vmatpush3.msra.mxu0 %v12081_v4  ;;  %8973 = vmatprep.mubr.msk.f32.mxu0 %vm10094_vm0, %v12354_v45 }
0x10bf   :  { %9823 = vmatprep.subr.bf16.mxu0 %v10095_v7 }
0x10c1   :  { %8974 = vmatmul.mubr.msk.f32.vlgmr.msra.gmra.mrb[52].mxu0 %vm1500_vm4, %v7220_v24 }
0x10c2   :  { %9825 = vmatpush3.bf16.msra.mxu0 %v11563_v53  ;;  %9008 = vmatprep.mubr.msk.f32.mxu0 %vm10094_vm0, %v12354_v45  ;;  %v12365_v53 = vld [vmem:[#allocation5_spill] sm:$0xff] }
0x10c3   :  { %9826 = vmatprep.subr.bf16.mxu0 %v10095_v7 }
0x10c6   :  { %9828 = vmatpush3.bf16.msra.mxu0 %v11576_v6  ;;  %v12366_v6 = vld [vmem:[#allocation6_spill] sm:$0xff] }
0x10c7   :  { %9829 = vmatprep.subr.bf16.mxu0 %v10095_v7 }
0x10ca   :  { %9831 = vmatpush3.bf16.msra.mxu0 %v11588_v63  ;;  %v12367_v63 = vld [vmem:[#allocation7_spill] sm:$0xff] }
0x10cb   :  { %9832 = vmatprep.subr.bf16.mxu0 %v10095_v7 }
0x10ce   :  { %9834 = vmatpush3.bf16.msra.mxu0 %v11598_v57  ;;  %v7230_v57 = vld [vmem:[%s12316_s15 + $0x20] sm:$0x7] }
0x10cf   :  { %9835 = vmatprep.subr.bf16.mxu0 %v10095_v7  ;;  %9174 = vmatmul.mubr.msk.f32.vlgmr.msra.gmra.mrb[42].mxu1 %vm1500_vm4, %v7230_v57 }
0x10d2   :  { %9837 = vmatpush3.bf16.msra.mxu0 %v11608_v9 }
0x10d3   :  { %9838 = vmatprep.subr.bf16.mxu0 %v10095_v7 }
0x10d6   :  { %9840 = vmatpush3.bf16.msra.mxu0 %v11618_v50 }
0x10d7   :  { %9841 = vmatprep.subr.bf16.mxu0 %v10095_v7 }
0x10da   :  { %9843 = vmatpush3.bf16.msra.mxu0 %v11628_v18  ;;  %v12368_v18 = vld [vmem:[#allocation8_spill] sm:$0xff] }
0x10db   :  { %9844 = vmatprep.subr.bf16.mxu0 %v10095_v7 }
0x10de   :  { %9846 = vmatpush3.bf16.msra.mxu0 %v11638_v54  ;;  %v12369_v54 = vld [vmem:[#allocation9_spill] sm:$0xff] }
0x10df   :  { %9011 = vmatprep.subr.mxu0 %v12354_v45 }
0x1194   :  { %v6053_v49 = vpop.f32.mrb[52].mxu0 }
0x1195   :  { %9009 = vmatmul.mubr.f32.vlgmr.msra.gmra.mrb[48].mxu0 %v6053_v49  ;;  %v8975_v30 = vpop.f32.mrb[53].mxu0 }
0x1196   :  { %9012 = vmatpush3.msra.mxu0 %v12081_v4  ;;  %9013 = vmatprep.mubr.msk.f32.mxu0 %vm10094_vm0, %v12354_v45 }
0x1197   :  { %9847 = vmatprep.subr.bf16.mxu0 %v10095_v7 }
0x1199   :  { %9014 = vmatmul.mubr.msk.f32.vlgmr.msra.gmra.mrb[54].mxu0 %vm1500_vm4, %v7222_v31 }
0x119a   :  { %9849 = vmatpush3.bf16.msra.mxu0 %v11648_v61  ;;  %9048 = vmatprep.mubr.msk.f32.mxu0 %vm10094_vm0, %v12354_v45  ;;  %v12370_v61 = vld [vmem:[#allocation10_spill] sm:$0xff] }
0x119b   :  { %9850 = vmatprep.subr.bf16.mxu0 %v10095_v7 }
0x119e   :  { %9852 = vmatpush3.bf16.msra.mxu0 %v11661_v11  ;;  %v12371_v11 = vld [vmem:[#allocation11_spill] sm:$0xff] }
0x119f   :  { %9853 = vmatprep.subr.bf16.mxu0 %v10095_v7 }
0x11a2   :  { %9855 = vmatpush3.bf16.msra.mxu0 %v11673_v40  ;;  %v12372_v40 = vld [vmem:[#allocation12_spill] sm:$0xff] }
0x11a3   :  { %9856 = vmatprep.subr.bf16.mxu0 %v10095_v7 }
0x11a6   :  { %9858 = vmatpush3.bf16.msra.mxu0 %v11683_v32  ;;  %v12373_v32 = vld [vmem:[#allocation13_spill] sm:$0xff] }
0x11a7   :  { %9859 = vmatprep.subr.bf16.mxu0 %v10095_v7 }
0x11aa   :  { %9861 = vmatpush3.bf16.msra.mxu0 %v11693_v47  ;;  %v12374_v47 = vld [vmem:[#allocation14_spill] sm:$0xff] }
0x11ab   :  { %9862 = vmatprep.subr.bf16.mxu0 %v10095_v7 }
0x11ae   :  { %9864 = vmatpush3.bf16.msra.mxu0 %v11703_v56  ;;  %v6783_v56 = vpop.f32.mrb[42].mxu1 }
0x11af   :  { %9865 = vmatprep.subr.bf16.mxu0 %v10095_v7 }
0x11b2   :  { %9867 = vmatpush3.bf16.msra.mxu0 %v11713_v28  ;;  %v9175_v28 = vpop.f32.mrb[43].mxu1 }
0x11b3   :  { %9868 = vmatprep.subr.bf16.mxu0 %v10095_v7 }
0x11b6   :  { %9870 = vmatpush3.bf16.msra.mxu0 %v11723_v22 }
0x11b7   :  { %9051 = vmatprep.subr.mxu0 %v12354_v45 }
0x126c   :  { %v6199_v46 = vpop.f32.mrb[54].mxu0 }
0x126d   :  { %9049 = vmatmul.mubr.f32.vlgmr.msra.gmra.mrb[48].mxu0 %v6199_v46  ;;  %v9015_v37 = vpop.f32.mrb[55].mxu0 }
0x126e   :  { %9052 = vmatpush3.msra.mxu0 %v12081_v4  ;;  %9053 = vmatprep.mubr.msk.f32.mxu0 %vm10094_vm0, %v12354_v45 }
0x126f   :  { %9871 = vmatprep.subr.bf16.mxu0 %v10095_v7 }
0x1271   :  { %9054 = vmatmul.mubr.msk.f32.vlgmr.msra.gmra.mrb[56].mxu0 %vm1500_vm4, %v7224_v41 }
0x1272   :  { %9873 = vmatpush3.bf16.msra.mxu0 %v11733_v39  ;;  %9088 = vmatprep.mubr.msk.f32.mxu0 %vm10094_vm0, %v12354_v45 }
0x1273   :  { %9874 = vmatprep.subr.bf16.mxu0 %v10095_v7 }
0x1276   :  { %9876 = vmatpush3.bf16.msra.mxu0 %v11746_v51  ;;  %v12376_v51 = vld [vmem:[#allocation16_spill] sm:$0xff] }
0x1277   :  { %9877 = vmatprep.subr.bf16.mxu0 %v10095_v7 }
0x127a   :  { %9879 = vmatpush3.bf16.msra.mxu0 %v11758_v13  ;;  %v12377_v13 = vld [vmem:[#allocation17_spill] sm:$0xff] }
0x127b   :  { %9880 = vmatprep.subr.bf16.mxu0 %v10095_v7 }
0x127e   :  { %9882 = vmatpush3.bf16.msra.mxu0 %v11768_v17  ;;  %v12378_v17 = vld [vmem:[#allocation18_spill] sm:$0xff] }
0x127f   :  { %9883 = vmatprep.subr.bf16.mxu0 %v10095_v7 }
0x1282   :  { %9885 = vmatpush3.bf16.msra.mxu0 %v11778_v27  ;;  %v12379_v27 = vld [vmem:[#allocation19_spill] sm:$0xff] }
0x1283   :  { %9886 = vmatprep.subr.bf16.mxu0 %v10095_v7 }
0x1286   :  { %9888 = vmatpush3.bf16.msra.mxu0 %v11788_v5 }
0x1287   :  { %9889 = vmatprep.subr.bf16.mxu0 %v10095_v7 }
0x128a   :  { %9891 = vmatpush3.bf16.msra.mxu0 %v11798_v8 }
0x128b   :  { %9892 = vmatprep.subr.bf16.mxu0 %v10095_v7 }
0x128e   :  { %9894 = vmatpush3.bf16.msra.mxu0 %v11808_v14 }
0x128f   :  { %9091 = vmatprep.subr.mxu0 %v12354_v45 }
0x1344   :  { %v6345_v59 = vpop.f32.mrb[56].mxu0 }
0x1345   :  { %9089 = vmatmul.mubr.f32.vlgmr.msra.gmra.mrb[48].mxu0 %v6345_v59  ;;  %v9055_v1 = vpop.f32.mrb[57].mxu0 }
0x1346   :  { %9092 = vmatpush3.msra.mxu0 %v12081_v4  ;;  %9093 = vmatprep.mubr.msk.f32.mxu0 %vm10094_vm0, %v12354_v45 }
0x1347   :  { %9895 = vmatprep.subr.bf16.mxu0 %v10095_v7 }
0x1349   :  { %9094 = vmatmul.mubr.msk.f32.vlgmr.msra.gmra.mrb[58].mxu0 %vm1500_vm4, %v7226_v26 }
0x134a   :  { %9897 = vmatpush3.bf16.msra.mxu0 %v11818_v52  ;;  %9128 = vmatprep.mubr.msk.f32.mxu0 %vm10094_vm0, %v12354_v45 }
0x134b   :  { %9898 = vmatprep.subr.bf16.mxu0 %v10095_v7 }
0x134e   :  { %9900 = vmatpush3.bf16.msra.mxu0 %v11829_v43 }
0x134f   :  { %9901 = vmatprep.subr.bf16.mxu0 %v10095_v7 }
0x1352   :  { %9903 = vmatpush3.bf16.msra.mxu0 %v11841_v42 }
0x1353   :  { %9904 = vmatprep.subr.bf16.mxu0 %v10095_v7 }
0x1356   :  { %9906 = vmatpush3.bf16.msra.mxu0 %v11851_v36 }
0x1357   :  { %9907 = vmatprep.subr.bf16.mxu0 %v10095_v7 }
0x135a   :  { %9909 = vmatpush3.bf16.msra.mxu0 %v12365_v53 }
0x135b   :  { %9910 = vmatprep.subr.bf16.mxu0 %v10095_v7 }
0x135e   :  { %9912 = vmatpush3.bf16.msra.mxu0 %v12366_v6 }
0x135f   :  { %9913 = vmatprep.subr.bf16.mxu0 %v10095_v7 }
0x1362   :  { %9915 = vmatpush3.bf16.msra.mxu0 %v12367_v63 }
0x1363   :  { %9916 = vmatprep.subr.bf16.mxu0 %v10095_v7 }
0x1366   :  { %9918 = vmatpush3.bf16.msra.mxu0 %v11891_v0  ;;  %v7228_v0 = vld [vmem:[%s12316_s15 + $0x1c] sm:$0x7] }
0x1367   :  { %9131 = vmatprep.subr.mxu0 %v12354_v45 }
0x141c   :  { %v6491_v9 = vpop.f32.mrb[58].mxu0 }
0x141d   :  { %9129 = vmatmul.mubr.f32.vlgmr.msra.gmra.mrb[48].mxu0 %v6491_v9  ;;  %v9095_v50 = vpop.f32.mrb[59].mxu0 }
0x141e   :  { %9132 = vmatpush3.msra.mxu0 %v12081_v4  ;;  %9133 = vmatprep.mubr.msk.f32.mxu0 %vm10094_vm0, %v12354_v45 }
0x141f   :  { %9919 = vmatprep.subr.bf16.mxu0 %v10095_v7 }
0x1421   :  { %9134 = vmatmul.mubr.msk.f32.vlgmr.msra.gmra.mrb[60].mxu0 %vm1500_vm4, %v7228_v0 }
0x1422   :  { %9921 = vmatpush3.bf16.msra.mxu0 %v12368_v18  ;;  %9168 = vmatprep.mubr.msk.f32.mxu0 %vm10094_vm0, %v12354_v45 }
0x1423   :  { %9922 = vmatprep.subr.bf16.mxu0 %v10095_v7 }
0x1426   :  { %9924 = vmatpush3.bf16.msra.mxu0 %v12369_v54 }
0x1427   :  { %9925 = vmatprep.subr.bf16.mxu0 %v10095_v7 }
0x142a   :  { %9927 = vmatpush3.bf16.msra.mxu0 %v12370_v61 }
0x142b   :  { %9928 = vmatprep.subr.bf16.mxu0 %v10095_v7 }
0x142e   :  { %9930 = vmatpush3.bf16.msra.mxu0 %v12371_v11 }
0x142f   :  { %9931 = vmatprep.subr.bf16.mxu0 %v10095_v7 }
0x1432   :  { %9933 = vmatpush3.bf16.msra.mxu0 %v12372_v40 }
0x1433   :  { %9934 = vmatprep.subr.bf16.mxu0 %v10095_v7 }
0x1436   :  { %9936 = vmatpush3.bf16.msra.mxu0 %v12373_v32 }
0x1437   :  { %9937 = vmatprep.subr.bf16.mxu0 %v10095_v7 }
0x143a   :  { %9939 = vmatpush3.bf16.msra.mxu0 %v12374_v47 }
0x143b   :  { %9940 = vmatprep.subr.bf16.mxu0 %v10095_v7 }
0x143e   :  { %9942 = vmatpush3.bf16.msra.mxu0 %v11974_v2 }
0x143f   :  { %9943 = vmatprep.subr.bf16.mxu0 %v10095_v7 }
0x14f4   :  { %v6637_v22 = vpop.f32.mrb[60].mxu0 }
0x14f5   :  { %9169 = vmatmul.mubr.f32.vlgmr.msra.gmra.mrb[48].mxu0 %v6637_v22  ;;  %v9135_v39 = vpop.f32.mrb[61].mxu0 }
0x14f6   :  { %9945 = vmatpush3.bf16.msra.mxu0 %v12375_v60  ;;  %9208 = vmatprep.mubr.msk.f32.mxu0 %vm10094_vm0, %v12354_v45 }
0x14f7   :  { %9946 = vmatprep.subr.bf16.mxu0 %v10095_v7 }
0x14fa   :  { %9948 = vmatpush3.bf16.msra.mxu0 %v12376_v51 }
0x14fb   :  { %9949 = vmatprep.subr.bf16.mxu0 %v10095_v7 }
0x14fe   :  { %9951 = vmatpush3.bf16.msra.mxu0 %v12377_v13 }
0x14ff   :  { %9952 = vmatprep.subr.bf16.mxu0 %v10095_v7 }
0x1502   :  { %9954 = vmatpush3.bf16.msra.mxu0 %v12378_v17 }
0x1503   :  { %9955 = vmatprep.subr.bf16.mxu0 %v10095_v7 }
0x1506   :  { %9957 = vmatpush3.bf16.msra.mxu0 %v12379_v27 }
0x1507   :  { %9958 = vmatprep.subr.bf16.mxu0 %v10095_v7 }
0x150a   :  { %9960 = vmatpush3.bf16.msra.mxu0 %v12037_v55 }
0x150b   :  { %9961 = vmatprep.subr.bf16.mxu0 %v10095_v7 }
0x150e   :  { %9963 = vmatpush3.bf16.msra.mxu0 %v12047_v58 }
0x150f   :  { %9964 = vmatprep.subr.bf16.mxu0 %v10095_v7 }
0x1512   :  { %9966 = vmatpush3.bf16.msra.mxu0 %v12057_v19 }
0x1515   :  { %9209 = vmatmul.mubr.f32.vlgmr.msra.gmra.mrb[48].mxu0 %v6783_v56 }
0x15e8   :  { %v6853_v5 = vpop.f32.mrb[48].mxu0 }
0x15e9   :  { %v9967_v8 = vadd.f32 %v6853_v5, %v12144_v44  ;;  %v9210_v14 = vpop.f32.mrb[49].mxu0 }
0x15eb   :  { %10064 = vtanh.f32 %v9967_v8 }
0x15f5   :  { %v10065_v52 = vpop.eup %10064 }
0x15f6   :  { %v6859_v43 = vmul.f32 0.5, %v10065_v52 }
0x15f8   :  { %6860 = vst [vmem:[%s12319_s18] sm:$0x7] %v6859_v43 }
0x15f9   :  { %6873 = vsyncpa [#allocation3], 1 }

</bundles_post_ra>
